<compile_context>
chip_gen: v7x
topology: tpu7x:2x2x1
jax: 0.10.0
libtpu: 0.0.40
codegen_flags: <defaults>
</compile_context>

<pallas_src>
import functools

import jax
import jax.numpy as jnp
from jax.experimental import pallas as pl
from jax.experimental.pallas import tpu as pltpu


# ----------------------------- in-kernel helpers ------------------------------
def _lin(x, w, b):
    return jnp.dot(x, w, preferred_element_type=jnp.float32) + b


def _ln(x, g, b, eps=1e-5):
    mu = jnp.mean(x, axis=-1, keepdims=True)
    var = jnp.mean((x - mu) ** 2, axis=-1, keepdims=True)
    return (x - mu) * jax.lax.rsqrt(var + eps) * g + b


def _gelu_exact(x):
    # PyTorch nn.GELU() default is the exact (erf) formulation.
    return 0.5 * x * (1.0 + jax.lax.erf(x * jnp.float32(0.7071067811865476)))


def _full_spec(arr):
    nd = arr.ndim
    return pl.BlockSpec(arr.shape, lambda *_, nd=nd: (0,) * nd)


def _pack3(p, i):
    # Pack LayerNorm-layer vectors (bias, gamma, beta), each (1, dim), into one (3, dim) array
    # so the kernel has fewer tiny constant inputs to buffer/DMA.
    return jnp.concatenate([p[f"b{i}"], p[f"g{i}"], p[f"be{i}"]], axis=0)


def _tile(total, want):
    """Pick a row-tile size and padded row count (padded % tile == 0)."""
    if total <= want:
        return total, total                      # single step; block == full (always legal)
    t = max(8, (want // 8) * 8)                  # multi-step: tile must be a multiple of 8
    padded = -(-total // t) * t
    return t, padded


# --------------------- Kernel 1: geometric feature extractor ------------------
def _geo_kernel(geom_ref, w1, v1, w2, v2, w3, v3, w4, v4, w5, b5, out_ref, *, k, tm):
    x = geom_ref[...]                                            # (tm*k, 10)
    p1, p2, p3, p4 = v1[...], v2[...], v3[...], v4[...]

    # encoder: Linear -> LN -> ReLU (x2), Linear -> LN
    h = jax.nn.relu(_ln(_lin(x, w1[...], p1[0:1]), p1[1:2], p1[2:3]))
    h = jax.nn.relu(_ln(_lin(h, w2[...], p2[0:1]), p2[1:2], p2[2:3]))
    h = _ln(_lin(h, w3[...], p3[0:1]), p3[1:2], p3[2:3])         # (tm*k, D)

    # mean over the k neighbors of each point (sublane regroup; last dim unchanged)
    m = jnp.mean(h.reshape(tm, k, h.shape[-1]), axis=1)          # (tm, D)

    # aggregator: Linear -> LN -> ReLU -> Linear
    a = jax.nn.relu(_ln(_lin(m, w4[...], p4[0:1]), p4[1:2], p4[2:3]))
    out_ref[...] = _lin(a, w5[...], b5[...]).astype(out_ref.dtype)


def geometric_extractor_pallas(geom_flat, p, *, k, tm):
    # geom_flat: [BN_pad * k, 10] float32, neighbor index fastest-varying within a point.
    BNk, F = geom_flat.shape
    BN_pad = BNk // k
    D = p["w5"].shape[1]
    v1, v2, v3, v4 = _pack3(p, 1), _pack3(p, 2), _pack3(p, 3), _pack3(p, 4)
    weights = [p["w1"], v1, p["w2"], v2, p["w3"], v3, p["w4"], v4, p["w5"], p["b5"]]
    return pl.pallas_call(
        functools.partial(_geo_kernel, k=k, tm=tm),
        out_shape=jax.ShapeDtypeStruct((BN_pad, D), jnp.float32),
        grid_spec=pltpu.PrefetchScalarGridSpec(
            num_scalar_prefetch=0,
            grid=(BN_pad // tm,),
            in_specs=[pl.BlockSpec((tm * k, F), lambda i: (i, 0))]
                     + [_full_spec(w) for w in weights],
            out_specs=pl.BlockSpec((tm, D), lambda i: (i, 0)),
        ),
        compiler_params=pltpu.CompilerParams(dimension_semantics=("parallel",)),
    )(geom_flat, *weights)


# --------------------------- Kernel 2: scale fusion ----------------------------
def _fusion_kernel(x_ref, w1, v1, w2, v2, out_ref):
    x = x_ref[...]
    p1, p2 = v1[...], v2[...]
    h = _gelu_exact(_ln(_lin(x, w1[...], p1[0:1]), p1[1:2], p1[2:3]))
    out_ref[...] = _ln(_lin(h, w2[...], p2[0:1]), p2[1:2], p2[2:3]).astype(out_ref.dtype)


def scale_fusion_pallas(x, p, *, tm):
    BN_pad, Din = x.shape
    D = p["w2"].shape[1]
    v1, v2 = _pack3(p, 1), _pack3(p, 2)
    weights = [p["w1"], v1, p["w2"], v2]
    return pl.pallas_call(
        _fusion_kernel,
        out_shape=jax.ShapeDtypeStruct((BN_pad, D), jnp.float32),
        grid_spec=pltpu.PrefetchScalarGridSpec(
            num_scalar_prefetch=0,
            grid=(BN_pad // tm,),
            in_specs=[pl.BlockSpec((tm, Din), lambda i: (i, 0))]
                     + [_full_spec(w) for w in weights],
            out_specs=pl.BlockSpec((tm, D), lambda i: (i, 0)),
        ),
        compiler_params=pltpu.CompilerParams(dimension_semantics=("parallel",)),
    )(x, *weights)


# --------------- Kernel 3: fused (enhanced + rel) gating, lane-dense -----------
def _gate_kernel(enh_ref, rel_ref, wv_ref, wt_ref, opv_ref, opt_ref):
    ctx = enh_ref[...] + rel_ref[...]                            # fused residual add
    opv_ref[...] = ctx * wv_ref[...]
    opt_ref[...] = ctx * (wt_ref[...] * 0.5)


def gate_apply_pallas(enhanced, rel, wv, wt, *, tn=512):
    B, N, D = enhanced.shape
    # lane-dense view: pure per-batch scalar scaling, so any 128-wide reinterpretation is valid.
    W = 128 if (N * D) % 128 == 0 else D
    rows = (N * D) // W
    enh2 = enhanced.reshape(B, rows, W).astype(jnp.float32)
    rel2 = rel.reshape(B, rows, W).astype(jnp.float32)
    tn_eff, rows_pad = _tile(rows, tn)
    if rows_pad != rows:
        pad = ((0, 0), (0, rows_pad - rows), (0, 0))
        enh2 = jnp.pad(enh2, pad)
        rel2 = jnp.pad(rel2, pad)
    wv_in = jnp.broadcast_to(wv.reshape(B, 1, 1).astype(jnp.float32), (B, 1, W))
    wt_in = jnp.broadcast_to(wt.reshape(B, 1, 1).astype(jnp.float32), (B, 1, W))

    row_spec = pl.BlockSpec((1, tn_eff, W), lambda b, i: (b, i, 0))
    scal_spec = pl.BlockSpec((1, 1, W), lambda b, i: (b, 0, 0))
    out_pv, out_pt = pl.pallas_call(
        _gate_kernel,
        out_shape=(jax.ShapeDtypeStruct((B, rows_pad, W), jnp.float32),
                   jax.ShapeDtypeStruct((B, rows_pad, W), jnp.float32)),
        grid_spec=pltpu.PrefetchScalarGridSpec(
            num_scalar_prefetch=0,
            grid=(B, rows_pad // tn_eff),
            in_specs=[row_spec, row_spec, scal_spec, scal_spec],
            out_specs=(row_spec, row_spec),
        ),
        compiler_params=pltpu.CompilerParams(
            dimension_semantics=("parallel", "parallel")),
    )(enh2, rel2, wv_in, wt_in)
    ctx_pv = out_pv[:, :rows].reshape(B, N, D)
    ctx_pt = out_pt[:, :rows].reshape(B, N, D)
    return ctx_pv, ctx_pt


# ------------------------------ plain-JAX glue ---------------------------------
def _ln_host(x, g, b, eps=1e-5):
    mu = jnp.mean(x, axis=-1, keepdims=True)
    var = jnp.mean((x - mu) ** 2, axis=-1, keepdims=True)
    return (x - mu) / jnp.sqrt(var + eps) * g + b


def _gate_weights(q, gp):
    # pv/pt gates: Linear -> ReLU -> Linear -> Sigmoid, per batch (tiny; kept in plain JAX).
    hv = jax.nn.relu(q @ gp["pv_w1"] + gp["pv_b1"])
    wv = jax.nn.sigmoid(hv @ gp["pv_w2"] + gp["pv_b2"])[:, 0]
    ht = jax.nn.relu(q @ gp["pt_w1"] + gp["pt_b1"])
    wt = jax.nn.sigmoid(ht @ gp["pt_w2"] + gp["pt_b2"])[:, 0]
    return wv, wt


def superpoint_generator(coords, voxel_size=0.2, max_superpoints=256):
    # TODO(synk): data-dependent unique()/bincount -> eager JAX per batch; not jittable end-to-end.
    vox = (coords / voxel_size).astype(jnp.int32)          # trunc toward zero, like .long()
    vids = vox[..., 0] * 10000 + vox[..., 1] * 100 + vox[..., 2]
    out = []
    for b in range(vids.shape[0]):
        uniq, inv = jnp.unique(vids[b], return_inverse=True)
        inv = inv.astype(jnp.int32)
        if int(uniq.shape[0]) > max_superpoints:
            counts = jnp.bincount(inv, length=int(uniq.shape[0]))
            large = jnp.argsort(-counts)[:max_superpoints]
            lab = jnp.full_like(inv, -1)
            for new_id, old_id in enumerate(list(large)):
                lab = jnp.where(inv == int(old_id), new_id, lab)
        else:
            lab = inv
        out.append(lab)
    return jnp.stack(out)


def build_geom_features(coords, k):
    # coords [B, N, 3] -> 10-D geometric features per (point, neighbor): [B, N, k, 10]
    d2 = jnp.sum((coords[:, :, None, :] - coords[:, None, :, :]) ** 2, axis=-1)
    dist = jnp.sqrt(jnp.maximum(d2, 0.0))
    _, idx = jax.lax.top_k(-dist, k)                       # k nearest incl. self
    neighbor = jax.vmap(lambda c, i: c[i])(coords, idx)    # [B,N,k,3]
    rel = neighbor - coords[:, :, None, :]
    dnk = jnp.linalg.norm(rel, axis=-1, keepdims=True)
    reln = rel / (dnk + 1e-6)
    axy = jnp.arctan2(reln[..., 1], reln[..., 0])[..., None]
    axz = jnp.arctan2(reln[..., 2], reln[..., 0])[..., None]
    ayz = jnp.arctan2(reln[..., 2], reln[..., 1])[..., None]
    return jnp.concatenate([dnk, rel, axy, axz, ayz, reln], axis=-1)


def superpoint_consistency(features, labels, p):
    # Per-superpoint masked multi-head self-attention (data-dependent -> plain JAX).
    # TODO(synk): torch path for superpoints >32 points uses torch.randperm sampling; only the
    #             <=32-point path is implemented (sufficient at these sizes). Dropout = eval mode.
    B, N, D = features.shape
    H = p["num_heads"]
    dh = D // H
    w = jax.nn.sigmoid(p["consistency_weight"])

    def per_batch(feat, lab):
        q = feat @ p["wq"] + p["bq"]
        k_ = feat @ p["wk"] + p["bk"]
        v = feat @ p["wv"] + p["bv"]
        qh = q.reshape(N, H, dh).transpose(1, 0, 2)
        kh = k_.reshape(N, H, dh).transpose(1, 0, 2)
        vh = v.reshape(N, H, dh).transpose(1, 0, 2)
        scores = jnp.einsum("hqd,hkd->hqk", qh, kh) / jnp.sqrt(jnp.float32(dh))

        def per_sp(s):
            mask = (lab == s) & (lab != -1)
            size = jnp.sum(mask)
            do = size >= 3
            sc = jnp.where(mask[None, None, :], scores, -1e30)
            attn = jax.nn.softmax(sc, axis=-1)
            oh = jnp.einsum("hqk,hkd->hqd", attn, vh)
            o = oh.transpose(1, 0, 2).reshape(N, D) @ p["wo"] + p["bo"]
            pooled = jnp.sum(o * mask[:, None], axis=0) / jnp.maximum(size, 1)
            a = _ln_host(pooled @ p["aw1"] + p["ab1"], p["ag1"], p["abt1"])
            a = jax.nn.gelu(a, approximate=False)
            a = a @ p["aw2"] + p["ab2"]
            return do, mask, a

        dos, masks, aggs = jax.vmap(per_sp)(jnp.arange(N))
        use = dos[:, None] & masks                                   # [S, N]
        applied = jnp.any(use, axis=0)
        agg_pt = jnp.einsum("sn,sd->nd", use.astype(feat.dtype), aggs)
        return jnp.where(applied[:, None], (1 - w) * feat + w * agg_pt, feat)

    return jax.vmap(per_batch)(features, labels)


def relation_encoder(coords, labels, p):
    # Per-superpoint center statistics + small MLPs (data-dependent -> plain JAX).
    B, N, _ = coords.shape

    def per_batch(c, lab):
        S = N  # candidate superpoint ids

        def stats(s):
            mask = (lab == s) & (lab != -1)
            cnt = jnp.sum(mask)
            qual = cnt >= 2
            center = jnp.sum(c * mask[:, None], axis=0) / jnp.maximum(cnt, 1)
            return qual, mask, center

        quals, masks, centers = jax.vmap(stats)(jnp.arange(S))
        M = jnp.sum(quals)
        ok = M >= 2
        d = jnp.sqrt(jnp.maximum(
            jnp.sum((centers[:, None, :] - centers[None, :, :]) ** 2, axis=-1), 0.0))
        qf = quals.astype(jnp.float32)
        mean_d = jnp.sum(d * qf[None, :], axis=1) / jnp.maximum(M, 1)
        min_d = jnp.min(jnp.where(quals[None, :], d, 1e30), axis=1)
        z = centers[:, 2]
        frac = jnp.sum((z[:, None] > z[None, :]) * qf[None, :], axis=1) / jnp.maximum(M, 1)
        rel = jnp.stack([mean_d, min_d, z, frac], axis=-1)           # [S, 4]
        rel = jnp.where(quals[:, None], rel, 0.0)

        h = jax.nn.gelu(rel @ p["mw1"] + p["mb1"], approximate=False)
        h = h @ p["mw2"] + p["mb2"]
        a = _ln_host(h @ p["aw1"] + p["ab1"], p["ag1"], p["abt1"])
        a = jax.nn.gelu(a, approximate=False)
        a = a @ p["aw2"] + p["ab2"]                                  # [S, D]

        use = (quals & ok)[:, None] & masks                          # [S, N]
        return jnp.einsum("sn,sd->nd", use.astype(jnp.float32), a)

    return jax.vmap(per_batch)(coords, labels)


# --------------------------------- forward -------------------------------------
def spatial_context_forward(coords, question_features, params, *, k_neighbors=(8,),
                            voxel_size=0.2, max_superpoints=256, tm=512, tn=512):
    B, N, _ = coords.shape
    D = params["fusion_dim"]
    BN = B * N

    labels = superpoint_generator(coords, voxel_size, max_superpoints)

    # one row-tile size / padding shared by the geo + fusion kernels (handles ragged B*N)
    tm_eff, BN_pad = _tile(BN, tm)

    scale_feats = []
    for si, k in enumerate(k_neighbors):
        geom = build_geom_features(coords, k)                        # [B,N,k,10]
        geom_flat = geom.reshape(BN * k, 10).astype(jnp.float32)     # plain reshape, no transpose
        if BN_pad != BN:
            geom_flat = jnp.pad(geom_flat, ((0, (BN_pad - BN) * k), (0, 0)))
        scale_feats.append(
            geometric_extractor_pallas(geom_flat, params["geo"][si], k=k, tm=tm_eff))
    ms = jnp.concatenate(scale_feats, axis=-1)                       # [BN_pad, D*num_scales]

    fused = scale_fusion_pallas(ms, params["fusion"], tm=tm_eff)[:BN].reshape(B, N, D)

    enhanced = superpoint_consistency(fused, labels, params["sp"])
    rel = relation_encoder(coords, labels, params["rel"])

    wv, wt = _gate_weights(question_features.astype(jnp.float32), params["gate"])
    ctx_pv, ctx_pt = gate_apply_pallas(enhanced, rel, wv, wt, tn=tn)

    spatial_info = {
        "num_superpoints": [int(jnp.unique(labels[b]).shape[0]) for b in range(B)],
        "pv_weight": wv,
        "pt_weight": wt,
    }
    return {"spatial_context_pv": ctx_pv,
            "spatial_context_pt": ctx_pt,
            "superpoint_labels": labels,
            "spatial_info": spatial_info}


# ----------------------------- parameter setup ----------------------------------
def init_params(key, D=32, k_neighbors=(8,), num_heads=8):
    keys = iter(jax.random.split(key, 128))

    def w(shape, scale=0.05):
        return jax.random.normal(next(keys), shape, jnp.float32) * scale

    zeros = lambda s: jnp.zeros(s, jnp.float32)
    ones = lambda s: jnp.ones(s, jnp.float32)
    D4, D2 = D // 4, D // 2

    geo = []
    for _ in k_neighbors:
        geo.append(dict(
            w1=w((10, D4)), b1=w((1, D4), 0.02), g1=ones((1, D4)), be1=zeros((1, D4)),
            w2=w((D4, D2)), b2=w((1, D2), 0.02), g2=ones((1, D2)), be2=zeros((1, D2)),
            w3=w((D2, D)),  b3=w((1, D), 0.02),  g3=ones((1, D)),  be3=zeros((1, D)),
            w4=w((D, D)),   b4=w((1, D), 0.02),  g4=ones((1, D)),  be4=zeros((1, D)),
            w5=w((D, D)),   b5=w((1, D), 0.02),
        ))

    S = len(k_neighbors)
    fusion = dict(
        w1=w((D * S, 2 * D)), b1=w((1, 2 * D), 0.02), g1=ones((1, 2 * D)), be1=zeros((1, 2 * D)),
        w2=w((2 * D, D)),     b2=w((1, D), 0.02),     g2=ones((1, D)),     be2=zeros((1, D)),
    )

    sp = dict(
        num_heads=num_heads,
        wq=w((D, D)), bq=w((D,), 0.02), wk=w((D, D)), bk=w((D,), 0.02),
        wv=w((D, D)), bv=w((D,), 0.02), wo=w((D, D)), bo=w((D,), 0.02),
        aw1=w((D, D)), ab1=w((D,), 0.02), ag1=ones((D,)), abt1=zeros((D,)),
        aw2=w((D, D)), ab2=w((D,), 0.02),
        consistency_weight=jnp.float32(0.3),
    )

    rel = dict(
        mw1=w((4, D4)), mb1=w((D4,), 0.02), mw2=w((D4, D)), mb2=w((D,), 0.02),
        aw1=w((D, D)), ab1=w((D,), 0.02), ag1=ones((D,)), abt1=zeros((D,)),
        aw2=w((D, D)), ab2=w((D,), 0.02),
    )

    gate = dict(
        pv_w1=w((D, D2)), pv_b1=w((1, D2), 0.02), pv_w2=w((D2, 1)), pv_b2=w((1, 1), 0.02),
        pt_w1=w((D, D2)), pt_b1=w((1, D2), 0.02), pt_w2=w((D2, 1)), pt_b2=w((1, 1), 0.02),
    )

    return dict(fusion_dim=D, geo=geo, fusion=fusion, sp=sp, rel=rel, gate=gate)


# ------------------------------------ main ---------------------------------------
if __name__ == "__main__":
    key = jax.random.PRNGKey(0)
    kc, kq, kp = jax.random.split(key, 3)

    B, N, D = 2, 16, 32            # small shapes; fusion_dim=32 (divisible by 4 and by 8 heads)
    k_neighbors = (8,)             # num_scales = len(k_neighbors) = 1 (kept self-consistent)

    coords = jax.random.normal(kc, (B, N, 3), jnp.float32)
    question_features = jax.random.normal(kq, (B, D), jnp.float32)
    params = init_params(kp, D=D, k_neighbors=k_neighbors)

    out = spatial_context_forward(coords, question_features, params,
                                  k_neighbors=k_neighbors, tm=512, tn=512)

    jax.block_until_ready(out["spatial_context_pv"])
    jax.block_until_ready(out["spatial_context_pt"])
    jax.block_until_ready(out["superpoint_labels"])
    print("KERNEL_OK")
</pallas_src>

<mosaic_0001>
module attributes {stable_mosaic.version = 11 : i64} {
  func.func @_geo_kernel(%arg0: i32, %arg1: memref<256x10xf32, #tpu.memory_space<vmem>>, %arg2: memref<10x8xf32, #tpu.memory_space<vmem>>, %arg3: memref<3x8xf32, #tpu.memory_space<vmem>>, %arg4: memref<8x16xf32, #tpu.memory_space<vmem>>, %arg5: memref<3x16xf32, #tpu.memory_space<vmem>>, %arg6: memref<16x32xf32, #tpu.memory_space<vmem>>, %arg7: memref<3x32xf32, #tpu.memory_space<vmem>>, %arg8: memref<32x32xf32, #tpu.memory_space<vmem>>, %arg9: memref<3x32xf32, #tpu.memory_space<vmem>>, %arg10: memref<32x32xf32, #tpu.memory_space<vmem>>, %arg11: memref<1x32xf32, #tpu.memory_space<vmem>>, %arg12: memref<32x32xf32, #tpu.memory_space<vmem>>) attributes {dimension_semantics = [#tpu.dimension_semantics<parallel>], iteration_bounds = array<i64: 1>, scalar_prefetch = 0 : i64, scratch_operands = 0 : i64, tpu.core_type = #tpu.core_type<tc>, window_params = [{transform_indices = @transform_0, window_bounds = array<i64: 256, 10>}, {pipeline_mode = #tpu.pipeline_mode<synchronous>, transform_indices = @transform_1, window_bounds = array<i64: 10, 8>}, {pipeline_mode = #tpu.pipeline_mode<synchronous>, transform_indices = @transform_2, window_bounds = array<i64: 3, 8>}, {pipeline_mode = #tpu.pipeline_mode<synchronous>, transform_indices = @transform_3, window_bounds = array<i64: 8, 16>}, {pipeline_mode = #tpu.pipeline_mode<synchronous>, transform_indices = @transform_4, window_bounds = array<i64: 3, 16>}, {pipeline_mode = #tpu.pipeline_mode<synchronous>, transform_indices = @transform_5, window_bounds = array<i64: 16, 32>}, {pipeline_mode = #tpu.pipeline_mode<synchronous>, transform_indices = @transform_6, window_bounds = array<i64: 3, 32>}, {pipeline_mode = #tpu.pipeline_mode<synchronous>, transform_indices = @transform_7, window_bounds = array<i64: 32, 32>}, {pipeline_mode = #tpu.pipeline_mode<synchronous>, transform_indices = @transform_8, window_bounds = array<i64: 3, 32>}, {pipeline_mode = #tpu.pipeline_mode<synchronous>, transform_indices = @transform_9, window_bounds = array<i64: 32, 32>}, {pipeline_mode = #tpu.pipeline_mode<synchronous>, transform_indices = @transform_10, window_bounds = array<i64: 1, 32>}, {transform_indices = @transform_11, window_bounds = array<i64: 32, 32>}]} {
    %c0 = arith.constant 0 : index
    %c0_0 = arith.constant 0 : index
    %0 = vector.load %arg1[%c0, %c0_0] : memref<256x10xf32, #tpu.memory_space<vmem>>, vector<256x10xf32>
    %c0_1 = arith.constant 0 : index
    %c0_2 = arith.constant 0 : index
    %1 = vector.load %arg3[%c0_1, %c0_2] : memref<3x8xf32, #tpu.memory_space<vmem>>, vector<3x8xf32>
    %c0_3 = arith.constant 0 : index
    %c0_4 = arith.constant 0 : index
    %2 = vector.load %arg5[%c0_3, %c0_4] : memref<3x16xf32, #tpu.memory_space<vmem>>, vector<3x16xf32>
    %c0_5 = arith.constant 0 : index
    %c0_6 = arith.constant 0 : index
    %3 = vector.load %arg7[%c0_5, %c0_6] : memref<3x32xf32, #tpu.memory_space<vmem>>, vector<3x32xf32>
    %c0_7 = arith.constant 0 : index
    %c0_8 = arith.constant 0 : index
    %4 = vector.load %arg9[%c0_7, %c0_8] : memref<3x32xf32, #tpu.memory_space<vmem>>, vector<3x32xf32>
    %c0_9 = arith.constant 0 : index
    %c0_10 = arith.constant 0 : index
    %5 = vector.load %arg2[%c0_9, %c0_10] : memref<10x8xf32, #tpu.memory_space<vmem>>, vector<10x8xf32>
    %6 = vector.extract_strided_slice %1 {offsets = [0, 0], sizes = [1, 8], strides = [1, 1]} : vector<3x8xf32> to vector<1x8xf32>
    %cst = arith.constant dense<0.000000e+00> : vector<256x8xf32>
    %7 = tpu.matmul %0, %5, %cst {dimension_numbers = #tpu.dot_dimension_numbers<[1], [0], [0], [1], [0, 0, 1, 1], [], []>} : vector<256x10xf32>, vector<10x8xf32>, vector<256x8xf32> -> vector<256x8xf32>
    %8 = vector.broadcast %6 : vector<1x8xf32> to vector<256x8xf32>
    %9 = arith.addf %7, %8 : vector<256x8xf32>
    %10 = vector.extract_strided_slice %1 {offsets = [1, 0], sizes = [1, 8], strides = [1, 1]} : vector<3x8xf32> to vector<1x8xf32>
    %11 = vector.extract_strided_slice %1 {offsets = [2, 0], sizes = [1, 8], strides = [1, 1]} : vector<3x8xf32> to vector<1x8xf32>
    %cst_11 = arith.constant dense<0.000000e+00> : vector<256xf32>
    %12 = vector.multi_reduction <add>, %9, %cst_11 [1] : vector<256x8xf32> to vector<256xf32>
    %13 = vector.shape_cast %12 : vector<256xf32> to vector<256x1xf32>
    %cst_12 = arith.constant 8.000000e+00 : f32
    %14 = vector.broadcast %cst_12 : f32 to vector<256x1xf32>
    %15 = arith.divf %13, %14 : vector<256x1xf32>
    %16 = vector.broadcast %15 : vector<256x1xf32> to vector<256x8xf32>
    %17 = arith.subf %9, %16 : vector<256x8xf32>
    %18 = arith.mulf %17, %17 : vector<256x8xf32>
    %cst_13 = arith.constant dense<0.000000e+00> : vector<256xf32>
    %19 = vector.multi_reduction <add>, %18, %cst_13 [1] : vector<256x8xf32> to vector<256xf32>
    %20 = vector.shape_cast %19 : vector<256xf32> to vector<256x1xf32>
    %cst_14 = arith.constant 8.000000e+00 : f32
    %21 = vector.broadcast %cst_14 : f32 to vector<256x1xf32>
    %22 = arith.divf %20, %21 : vector<256x1xf32>
    %23 = vector.broadcast %15 : vector<256x1xf32> to vector<256x8xf32>
    %24 = arith.subf %9, %23 : vector<256x8xf32>
    %cst_15 = arith.constant 9.99999974E-6 : f32
    %25 = vector.broadcast %cst_15 : f32 to vector<256x1xf32>
    %26 = arith.addf %22, %25 : vector<256x1xf32>
    %27 = math.rsqrt %26 : vector<256x1xf32>
    %28 = vector.broadcast %27 : vector<256x1xf32> to vector<256x8xf32>
    %29 = arith.mulf %24, %28 : vector<256x8xf32>
    %30 = vector.broadcast %10 : vector<1x8xf32> to vector<256x8xf32>
    %31 = arith.mulf %29, %30 : vector<256x8xf32>
    %32 = vector.broadcast %11 : vector<1x8xf32> to vector<256x8xf32>
    %33 = arith.addf %31, %32 : vector<256x8xf32>
    %cst_16 = arith.constant 0.000000e+00 : f32
    %34 = vector.broadcast %cst_16 : f32 to vector<256x8xf32>
    %35 = arith.maximumf %33, %34 : vector<256x8xf32>
    %c0_17 = arith.constant 0 : index
    %c0_18 = arith.constant 0 : index
    %36 = vector.load %arg4[%c0_17, %c0_18] : memref<8x16xf32, #tpu.memory_space<vmem>>, vector<8x16xf32>
    %37 = vector.extract_strided_slice %2 {offsets = [0, 0], sizes = [1, 16], strides = [1, 1]} : vector<3x16xf32> to vector<1x16xf32>
    %cst_19 = arith.constant dense<0.000000e+00> : vector<256x16xf32>
    %38 = tpu.matmul %35, %36, %cst_19 {dimension_numbers = #tpu.dot_dimension_numbers<[1], [0], [0], [1], [0, 0, 1, 1], [], []>} : vector<256x8xf32>, vector<8x16xf32>, vector<256x16xf32> -> vector<256x16xf32>
    %39 = vector.broadcast %37 : vector<1x16xf32> to vector<256x16xf32>
    %40 = arith.addf %38, %39 : vector<256x16xf32>
    %41 = vector.extract_strided_slice %2 {offsets = [1, 0], sizes = [1, 16], strides = [1, 1]} : vector<3x16xf32> to vector<1x16xf32>
    %42 = vector.extract_strided_slice %2 {offsets = [2, 0], sizes = [1, 16], strides = [1, 1]} : vector<3x16xf32> to vector<1x16xf32>
    %cst_20 = arith.constant dense<0.000000e+00> : vector<256xf32>
    %43 = vector.multi_reduction <add>, %40, %cst_20 [1] : vector<256x16xf32> to vector<256xf32>
    %44 = vector.shape_cast %43 : vector<256xf32> to vector<256x1xf32>
    %cst_21 = arith.constant 1.600000e+01 : f32
    %45 = vector.broadcast %cst_21 : f32 to vector<256x1xf32>
    %46 = arith.divf %44, %45 : vector<256x1xf32>
    %47 = vector.broadcast %46 : vector<256x1xf32> to vector<256x16xf32>
    %48 = arith.subf %40, %47 : vector<256x16xf32>
    %49 = arith.mulf %48, %48 : vector<256x16xf32>
    %cst_22 = arith.constant dense<0.000000e+00> : vector<256xf32>
    %50 = vector.multi_reduction <add>, %49, %cst_22 [1] : vector<256x16xf32> to vector<256xf32>
    %51 = vector.shape_cast %50 : vector<256xf32> to vector<256x1xf32>
    %cst_23 = arith.constant 1.600000e+01 : f32
    %52 = vector.broadcast %cst_23 : f32 to vector<256x1xf32>
    %53 = arith.divf %51, %52 : vector<256x1xf32>
    %54 = vector.broadcast %46 : vector<256x1xf32> to vector<256x16xf32>
    %55 = arith.subf %40, %54 : vector<256x16xf32>
    %cst_24 = arith.constant 9.99999974E-6 : f32
    %56 = vector.broadcast %cst_24 : f32 to vector<256x1xf32>
    %57 = arith.addf %53, %56 : vector<256x1xf32>
    %58 = math.rsqrt %57 : vector<256x1xf32>
    %59 = vector.broadcast %58 : vector<256x1xf32> to vector<256x16xf32>
    %60 = arith.mulf %55, %59 : vector<256x16xf32>
    %61 = vector.broadcast %41 : vector<1x16xf32> to vector<256x16xf32>
    %62 = arith.mulf %60, %61 : vector<256x16xf32>
    %63 = vector.broadcast %42 : vector<1x16xf32> to vector<256x16xf32>
    %64 = arith.addf %62, %63 : vector<256x16xf32>
    %cst_25 = arith.constant 0.000000e+00 : f32
    %65 = vector.broadcast %cst_25 : f32 to vector<256x16xf32>
    %66 = arith.maximumf %64, %65 : vector<256x16xf32>
    %c0_26 = arith.constant 0 : index
    %c0_27 = arith.constant 0 : index
    %67 = vector.load %arg6[%c0_26, %c0_27] : memref<16x32xf32, #tpu.memory_space<vmem>>, vector<16x32xf32>
    %68 = vector.extract_strided_slice %3 {offsets = [0, 0], sizes = [1, 32], strides = [1, 1]} : vector<3x32xf32> to vector<1x32xf32>
    %cst_28 = arith.constant dense<0.000000e+00> : vector<256x32xf32>
    %69 = tpu.matmul %66, %67, %cst_28 {dimension_numbers = #tpu.dot_dimension_numbers<[1], [0], [0], [1], [0, 0, 1, 1], [], []>} : vector<256x16xf32>, vector<16x32xf32>, vector<256x32xf32> -> vector<256x32xf32>
    %70 = vector.broadcast %68 : vector<1x32xf32> to vector<256x32xf32>
    %71 = arith.addf %69, %70 : vector<256x32xf32>
    %72 = vector.extract_strided_slice %3 {offsets = [1, 0], sizes = [1, 32], strides = [1, 1]} : vector<3x32xf32> to vector<1x32xf32>
    %73 = vector.extract_strided_slice %3 {offsets = [2, 0], sizes = [1, 32], strides = [1, 1]} : vector<3x32xf32> to vector<1x32xf32>
    %cst_29 = arith.constant dense<0.000000e+00> : vector<256xf32>
    %74 = vector.multi_reduction <add>, %71, %cst_29 [1] : vector<256x32xf32> to vector<256xf32>
    %75 = vector.shape_cast %74 : vector<256xf32> to vector<256x1xf32>
    %cst_30 = arith.constant 3.200000e+01 : f32
    %76 = vector.broadcast %cst_30 : f32 to vector<256x1xf32>
    %77 = arith.divf %75, %76 : vector<256x1xf32>
    %78 = vector.broadcast %77 : vector<256x1xf32> to vector<256x32xf32>
    %79 = arith.subf %71, %78 : vector<256x32xf32>
    %80 = arith.mulf %79, %79 : vector<256x32xf32>
    %cst_31 = arith.constant dense<0.000000e+00> : vector<256xf32>
    %81 = vector.multi_reduction <add>, %80, %cst_31 [1] : vector<256x32xf32> to vector<256xf32>
    %82 = vector.shape_cast %81 : vector<256xf32> to vector<256x1xf32>
    %cst_32 = arith.constant 3.200000e+01 : f32
    %83 = vector.broadcast %cst_32 : f32 to vector<256x1xf32>
    %84 = arith.divf %82, %83 : vector<256x1xf32>
    %85 = vector.broadcast %77 : vector<256x1xf32> to vector<256x32xf32>
    %86 = arith.subf %71, %85 : vector<256x32xf32>
    %cst_33 = arith.constant 9.99999974E-6 : f32
    %87 = vector.broadcast %cst_33 : f32 to vector<256x1xf32>
    %88 = arith.addf %84, %87 : vector<256x1xf32>
    %89 = math.rsqrt %88 : vector<256x1xf32>
    %90 = vector.broadcast %89 : vector<256x1xf32> to vector<256x32xf32>
    %91 = arith.mulf %86, %90 : vector<256x32xf32>
    %92 = vector.broadcast %72 : vector<1x32xf32> to vector<256x32xf32>
    %93 = arith.mulf %91, %92 : vector<256x32xf32>
    %94 = vector.broadcast %73 : vector<1x32xf32> to vector<256x32xf32>
    %95 = arith.addf %93, %94 : vector<256x32xf32>
    %96 = vector.shape_cast %95 : vector<256x32xf32> to vector<32x8x32xf32>
    %cst_34 = arith.constant dense<0.000000e+00> : vector<32x32xf32>
    %97 = vector.multi_reduction <add>, %96, %cst_34 [1] : vector<32x8x32xf32> to vector<32x32xf32>
    %cst_35 = arith.constant 8.000000e+00 : f32
    %98 = vector.broadcast %cst_35 : f32 to vector<32x32xf32>
    %99 = arith.divf %97, %98 : vector<32x32xf32>
    %c0_36 = arith.constant 0 : index
    %c0_37 = arith.constant 0 : index
    %100 = vector.load %arg8[%c0_36, %c0_37] : memref<32x32xf32, #tpu.memory_space<vmem>>, vector<32x32xf32>
    %101 = vector.extract_strided_slice %4 {offsets = [0, 0], sizes = [1, 32], strides = [1, 1]} : vector<3x32xf32> to vector<1x32xf32>
    %cst_38 = arith.constant dense<0.000000e+00> : vector<32x32xf32>
    %102 = tpu.matmul %99, %100, %cst_38 {dimension_numbers = #tpu.dot_dimension_numbers<[1], [0], [0], [1], [0, 0, 1, 1], [], []>} : vector<32x32xf32>, vector<32x32xf32>, vector<32x32xf32> -> vector<32x32xf32>
    %103 = vector.broadcast %101 : vector<1x32xf32> to vector<32x32xf32>
    %104 = arith.addf %102, %103 : vector<32x32xf32>
    %105 = vector.extract_strided_slice %4 {offsets = [1, 0], sizes = [1, 32], strides = [1, 1]} : vector<3x32xf32> to vector<1x32xf32>
    %106 = vector.extract_strided_slice %4 {offsets = [2, 0], sizes = [1, 32], strides = [1, 1]} : vector<3x32xf32> to vector<1x32xf32>
    %cst_39 = arith.constant dense<0.000000e+00> : vector<32xf32>
    %107 = vector.multi_reduction <add>, %104, %cst_39 [1] : vector<32x32xf32> to vector<32xf32>
    %108 = vector.shape_cast %107 : vector<32xf32> to vector<32x1xf32>
    %cst_40 = arith.constant 3.200000e+01 : f32
    %109 = vector.broadcast %cst_40 : f32 to vector<32x1xf32>
    %110 = arith.divf %108, %109 : vector<32x1xf32>
    %111 = vector.broadcast %110 : vector<32x1xf32> to vector<32x32xf32>
    %112 = arith.subf %104, %111 : vector<32x32xf32>
    %113 = arith.mulf %112, %112 : vector<32x32xf32>
    %cst_41 = arith.constant dense<0.000000e+00> : vector<32xf32>
    %114 = vector.multi_reduction <add>, %113, %cst_41 [1] : vector<32x32xf32> to vector<32xf32>
    %115 = vector.shape_cast %114 : vector<32xf32> to vector<32x1xf32>
    %cst_42 = arith.constant 3.200000e+01 : f32
    %116 = vector.broadcast %cst_42 : f32 to vector<32x1xf32>
    %117 = arith.divf %115, %116 : vector<32x1xf32>
    %118 = vector.broadcast %110 : vector<32x1xf32> to vector<32x32xf32>
    %119 = arith.subf %104, %118 : vector<32x32xf32>
    %cst_43 = arith.constant 9.99999974E-6 : f32
    %120 = vector.broadcast %cst_43 : f32 to vector<32x1xf32>
    %121 = arith.addf %117, %120 : vector<32x1xf32>
    %122 = math.rsqrt %121 : vector<32x1xf32>
    %123 = vector.broadcast %122 : vector<32x1xf32> to vector<32x32xf32>
    %124 = arith.mulf %119, %123 : vector<32x32xf32>
    %125 = vector.broadcast %105 : vector<1x32xf32> to vector<32x32xf32>
    %126 = arith.mulf %124, %125 : vector<32x32xf32>
    %127 = vector.broadcast %106 : vector<1x32xf32> to vector<32x32xf32>
    %128 = arith.addf %126, %127 : vector<32x32xf32>
    %cst_44 = arith.constant 0.000000e+00 : f32
    %129 = vector.broadcast %cst_44 : f32 to vector<32x32xf32>
    %130 = arith.maximumf %128, %129 : vector<32x32xf32>
    %c0_45 = arith.constant 0 : index
    %c0_46 = arith.constant 0 : index
    %131 = vector.load %arg10[%c0_45, %c0_46] : memref<32x32xf32, #tpu.memory_space<vmem>>, vector<32x32xf32>
    %c0_47 = arith.constant 0 : index
    %c0_48 = arith.constant 0 : index
    %132 = vector.load %arg11[%c0_47, %c0_48] : memref<1x32xf32, #tpu.memory_space<vmem>>, vector<1x32xf32>
    %cst_49 = arith.constant dense<0.000000e+00> : vector<32x32xf32>
    %133 = tpu.matmul %130, %131, %cst_49 {dimension_numbers = #tpu.dot_dimension_numbers<[1], [0], [0], [1], [0, 0, 1, 1], [], []>} : vector<32x32xf32>, vector<32x32xf32>, vector<32x32xf32> -> vector<32x32xf32>
    %134 = vector.broadcast %132 : vector<1x32xf32> to vector<32x32xf32>
    %135 = arith.addf %133, %134 : vector<32x32xf32>
    %c0_50 = arith.constant 0 : index
    %c0_51 = arith.constant 0 : index
    %136 = vector.load %arg12[%c0_50, %c0_51] : memref<32x32xf32, #tpu.memory_space<vmem>>, vector<32x32xf32>
    tpu.vector_store %arg12[%c0_50, %c0_51], %135 {strides = array<i32>} : memref<32x32xf32, #tpu.memory_space<vmem>>, vector<32x32xf32>,
    return
  }
  func.func @transform_0(%arg0: i32) -> (i32, i32) {
    %c0_i32 = arith.constant 0 : i32
    %c0_i32_0 = arith.constant 0 : i32
    return %arg0, %c0_i32 : i32, i32
  }
  func.func @transform_1(%arg0: i32) -> (i32, i32) {
    %c0_i32 = arith.constant 0 : i32
    %c0_i32_0 = arith.constant 0 : i32
    %c0_i32_1 = arith.constant 0 : i32
    return %c0_i32, %c0_i32_0 : i32, i32
  }
  func.func @transform_2(%arg0: i32) -> (i32, i32) {
    %c0_i32 = arith.constant 0 : i32
    %c0_i32_0 = arith.constant 0 : i32
    %c0_i32_1 = arith.constant 0 : i32
    return %c0_i32, %c0_i32_0 : i32, i32
  }
  func.func @transform_3(%arg0: i32) -> (i32, i32) {
    %c0_i32 = arith.constant 0 : i32
    %c0_i32_0 = arith.constant 0 : i32
    %c0_i32_1 = arith.constant 0 : i32
    return %c0_i32, %c0_i32_0 : i32, i32
  }
  func.func @transform_4(%arg0: i32) -> (i32, i32) {
    %c0_i32 = arith.constant 0 : i32
    %c0_i32_0 = arith.constant 0 : i32
    %c0_i32_1 = arith.constant 0 : i32
    return %c0_i32, %c0_i32_0 : i32, i32
  }
  func.func @transform_5(%arg0: i32) -> (i32, i32) {
    %c0_i32 = arith.constant 0 : i32
    %c0_i32_0 = arith.constant 0 : i32
    %c0_i32_1 = arith.constant 0 : i32
    return %c0_i32, %c0_i32_0 : i32, i32
  }
  func.func @transform_6(%arg0: i32) -> (i32, i32) {
    %c0_i32 = arith.constant 0 : i32
    %c0_i32_0 = arith.constant 0 : i32
    %c0_i32_1 = arith.constant 0 : i32
    return %c0_i32, %c0_i32_0 : i32, i32
  }
  func.func @transform_7(%arg0: i32) -> (i32, i32) {
    %c0_i32 = arith.constant 0 : i32
    %c0_i32_0 = arith.constant 0 : i32
    %c0_i32_1 = arith.constant 0 : i32
    return %c0_i32, %c0_i32_0 : i32, i32
  }
  func.func @transform_8(%arg0: i32) -> (i32, i32) {
    %c0_i32 = arith.constant 0 : i32
    %c0_i32_0 = arith.constant 0 : i32
    %c0_i32_1 = arith.constant 0 : i32
    return %c0_i32, %c0_i32_0 : i32, i32
  }
  func.func @transform_9(%arg0: i32) -> (i32, i32) {
    %c0_i32 = arith.constant 0 : i32
    %c0_i32_0 = arith.constant 0 : i32
    %c0_i32_1 = arith.constant 0 : i32
    return %c0_i32, %c0_i32_0 : i32, i32
  }
  func.func @transform_10(%arg0: i32) -> (i32, i32) {
    %c0_i32 = arith.constant 0 : i32
    %c0_i32_0 = arith.constant 0 : i32
    %c0_i32_1 = arith.constant 0 : i32
    return %c0_i32, %c0_i32_0 : i32, i32
  }
  func.func @transform_11(%arg0: i32) -> (i32, i32) {
    %c0_i32 = arith.constant 0 : i32
    %c0_i32_0 = arith.constant 0 : i32
    return %arg0, %c0_i32 : i32, i32
  }
}

</mosaic_0001>

<bundles_post_ra>
// kernel: tpu_custom_call.1
= control target key start
LH: loop header
LB: loop body
LE: loop exit
PB: predicated region body
PF: predicated region fallthrough
CT: control target
= control target key end

     0   :  { %vm178_vm0 = vcmask 1041408   ;;  %vm3879_vm1 = vmmov 1   ;;  %vm81_vm3 = vcmask 80896   ;;  %s5812_s0 = inlined_call_operand.vmem [shape: f32[256,10], index: 0, kind: input, shape index: {}]   ;;  %s5813_s1 = inlined_call_operand.vmem [shape: f32[10,8], index: 1, kind: input, shape index: {}]   ;;  %s5814_s2 = inlined_call_operand.vmem [shape: f32[3,8], index: 2, kind: input, shape index: {}]   ;;  %s5815_s3 = inlined_call_operand.vmem [shape: f32[8,16], index: 3, kind: input, shape index: {}]   ;;  %s5816_s4 = inlined_call_operand.vmem [shape: f32[3,16], index: 4, kind: input, shape index: {}]   ;;  %s5817_s5 = inlined_call_operand.vmem [shape: f32[16,32], index: 5, kind: input, shape index: {}]   ;;  %s5818_s6 = inlined_call_operand.vmem [shape: f32[3,32], index: 6, kind: input, shape index: {}]   ;;  %s5819_s7 = inlined_call_operand.vmem [shape: f32[32,32], index: 7, kind: input, shape index: {}]   ;;  %s5820_s8 = inlined_call_operand.vmem [shape: f32[3,32], index: 8, kind: input, shape index: {}]   ;;  %s5821_s9 = inlined_call_operand.vmem [shape: f32[32,32], index: 9, kind: input, shape index: {}]   ;;  %s5822_s10 = inlined_call_operand.vmem [shape: f32[1,32], index: 10, kind: input, shape index: {}]   ;;  %s5823_s11 = inlined_call_operand.hbm [shape: f32[32,32], index: 11, kind: output, shape index: {}]  }
   0x1   :  { %v75_v0 = vld [vmem:[%s5813_s1] sm:$0xff]  ;;  %v76_v1 = vld [vmem:[%s5813_s1 + $0x8] sm:$0x3]  ;;  %vm3624_vm2 = vmpackc.low %vm178_vm0, %vm3879_vm1 }
   0x2   :  { %v39_v2 = vld [vmem:[%s5812_s0] sm:$0xff]  ;;  %v3623_v3 = vpack.c.bf16 %v76_v1, %v75_v0  ;;  %v40_v4 = vld [vmem:[%s5812_s0 + $0x8] sm:$0xff]  ;;  %v41_v5 = vld [vmem:[%s5812_s0 + $0x10] sm:$0xff] }
   0x3   :  { %3445 = vmatprep.mubr.msk.f32.mxu0 %vm81_vm3, %v39_v2  ;;  %v42_v6 = vld [vmem:[%s5812_s0 + $0x18] sm:$0xff]  ;;  %v43_v7 = vld [vmem:[%s5812_s0 + $0x20] sm:$0xff]  ;;  %v44_v8 = vld [vmem:[%s5812_s0 + $0x28] sm:$0xff] }
   0x4   :  { %3625 = vmatprep.subr.msk.bf16.mxu0 %vm3624_vm2, %v3623_v3 }
   0x5   :  { %3628 = vmatpush3.bf16.msk.msra.mxu0 %vm3624_vm2, %v3623_v3 }
   0x8   :  { %3446 = vmatmul.mubr.msk.f32.vlgmr.msra.gmra.mrb[0].mxu0 %vm81_vm3, %v40_v4 }
   0x9   :  { %3448 = vmatprep.mubr.msk.f32.mxu0 %vm81_vm3, %v41_v5 }
   0xc   :  { %3449 = vmatmul.mubr.msk.f32.gmra.mrb[2].mxu0 %vm81_vm3, %v42_v6 }
   0xd   :  { %3451 = vmatprep.mubr.msk.f32.mxu0 %vm81_vm3, %v43_v7 }
   0xe   :  { %16 = vsyncpa [#allocation3], 0  ;;  %v45_v9 = vld [vmem:[%s5812_s0 + $0x30] sm:$0xff]  ;;  %v46_v10 = vld [vmem:[%s5812_s0 + $0x38] sm:$0xff]  ;;  %v77_v35 = vlaneseq  ;;  %vm407_vm4 = vcmask 64512   ;;  %vm1255_vm5 = vcmask 130048  }
   0xf   :  { %v47_v11 = vld [vmem:[%s5812_s0 + $0x40] sm:$0xff]  ;;  %v48_v12 = vld [vmem:[%s5812_s0 + $0x48] sm:$0xff]  ;;  %v49_v13 = vld [vmem:[%s5812_s0 + $0x50] sm:$0xff]  ;;  %vm2104_vm6 = vcmask 261120   ;;  %vm2890_vm7 = vcmask 1041409   ;;  %vm2892_vm8 = vcmask 1042434  }
  0x10   :  { %3452 = vmatmul.mubr.msk.f32.gmra.mrb[4].mxu0 %vm81_vm3, %v44_v8  ;;  %v50_v14 = vld [vmem:[%s5812_s0 + $0x58] sm:$0xff]  ;;  %v51_v15 = vld [vmem:[%s5812_s0 + $0x60] sm:$0xff]  ;;  %v52_v16 = vld [vmem:[%s5812_s0 + $0x68] sm:$0xff]  ;;  %v4077_v36 = vshrl.u32 %v77_v35, 7  ;;  %vm2894_vm9 = vcmask 1043459   ;;  %vm2896_vm10 = vcmask 1044484  }
  0x11   :  { %3454 = vmatprep.mubr.msk.f32.mxu0 %vm81_vm3, %v45_v9  ;;  %v53_v17 = vld [vmem:[%s5812_s0 + $0x70] sm:$0xff]  ;;  %v54_v18 = vld [vmem:[%s5812_s0 + $0x78] sm:$0xff]  ;;  %v55_v19 = vld [vmem:[%s5812_s0 + $0x80] sm:$0xff]  ;;  %vm2898_vm11 = vcmask 1045509   ;;  %vm2900_vm12 = vcmask 1046534   ;;  %vm2902_vm13 = vcmask 1047559  }
  0x12   :  { %v56_v20 = vld [vmem:[%s5812_s0 + $0x88] sm:$0xff]  ;;  %v57_v21 = vld [vmem:[%s5812_s0 + $0x90] sm:$0xff]  ;;  %v58_v22 = vld [vmem:[%s5812_s0 + $0x98] sm:$0xff]  ;;  %v4080_v37 = vsub.s32 0, %v4077_v36 }
  0x13   :  { %v59_v23 = vld [vmem:[%s5812_s0 + $0xa0] sm:$0xff]  ;;  %v60_v24 = vld [vmem:[%s5812_s0 + $0xa8] sm:$0xff]  ;;  %v61_v25 = vld [vmem:[%s5812_s0 + $0xb0] sm:$0xff] }
  0x14   :  { %3455 = vmatmul.mubr.msk.f32.gmra.mrb[6].mxu0 %vm81_vm3, %v46_v10  ;;  %v62_v26 = vld [vmem:[%s5812_s0 + $0xb8] sm:$0xff]  ;;  %v63_v27 = vld [vmem:[%s5812_s0 + $0xc0] sm:$0xff]  ;;  %v64_v28 = vld [vmem:[%s5812_s0 + $0xc8] sm:$0xff] }
  0x15   :  { %3457 = vmatprep.mubr.msk.f32.mxu0 %vm81_vm3, %v47_v11  ;;  %v65_v29 = vld [vmem:[%s5812_s0 + $0xd0] sm:$0xff]  ;;  %v66_v30 = vld [vmem:[%s5812_s0 + $0xd8] sm:$0xff]  ;;  %v67_v31 = vld [vmem:[%s5812_s0 + $0xe0] sm:$0xff] }
  0x16   :  { %v68_v32 = vld [vmem:[%s5812_s0 + $0xe8] sm:$0xff]  ;;  %v69_v33 = vld [vmem:[%s5812_s0 + $0xf0] sm:$0xff]  ;;  %v70_v34 = vld [vmem:[%s5812_s0 + $0xf8] sm:$0xff] }
  0x17   :  { %v4085_v38 = vld [vmem:[%s5814_s2] sm:$0x7]  ;;  %s3880_s2 = smov [#allocation2]  }
  0x18   :  { %3458 = vmatmul.mubr.msk.f32.gmra.mrb[8].mxu0 %vm81_vm3, %v48_v12  ;;  %v4089_v39 = vrot.slane %v4085_v38, %v4080_v37 }
  0x19   :  { %3460 = vmatprep.mubr.msk.f32.mxu0 %vm81_vm3, %v49_v13 }
  0x1c   :  { %3461 = vmatmul.mubr.msk.f32.gmra.mrb[10].mxu0 %vm81_vm3, %v50_v14 }
  0x1d   :  { %3463 = vmatprep.mubr.msk.f32.mxu0 %vm81_vm3, %v51_v15 }
  0x20   :  { %3464 = vmatmul.mubr.msk.f32.gmra.mrb[12].mxu0 %vm81_vm3, %v52_v16 }
  0x21   :  { %3466 = vmatprep.mubr.msk.f32.mxu0 %vm81_vm3, %v53_v17 }
  0x24   :  { %3467 = vmatmul.mubr.msk.f32.gmra.mrb[14].mxu0 %vm81_vm3, %v54_v18 }
  0x25   :  { %3469 = vmatprep.mubr.msk.f32.mxu0 %vm81_vm3, %v55_v19 }
  0x28   :  { %3470 = vmatmul.mubr.msk.f32.gmra.mrb[16].mxu0 %vm81_vm3, %v56_v20 }
  0x29   :  { %3472 = vmatprep.mubr.msk.f32.mxu0 %vm81_vm3, %v57_v21 }
  0x2c   :  { %3473 = vmatmul.mubr.msk.f32.gmra.mrb[18].mxu0 %vm81_vm3, %v58_v22 }
  0x2d   :  { %3475 = vmatprep.mubr.msk.f32.mxu0 %vm81_vm3, %v59_v23 }
  0x30   :  { %3476 = vmatmul.mubr.msk.f32.gmra.mrb[20].mxu0 %vm81_vm3, %v60_v24 }
  0x31   :  { %3478 = vmatprep.mubr.msk.f32.mxu0 %vm81_vm3, %v61_v25 }
  0x34   :  { %3479 = vmatmul.mubr.msk.f32.gmra.mrb[22].mxu0 %vm81_vm3, %v62_v26 }
  0x35   :  { %3481 = vmatprep.mubr.msk.f32.mxu0 %vm81_vm3, %v63_v27 }
  0x38   :  { %3482 = vmatmul.mubr.msk.f32.gmra.mrb[24].mxu0 %vm81_vm3, %v64_v28 }
  0x39   :  { %3484 = vmatprep.mubr.msk.f32.mxu0 %vm81_vm3, %v65_v29 }
  0x3c   :  { %3485 = vmatmul.mubr.msk.f32.gmra.mrb[26].mxu0 %vm81_vm3, %v66_v30 }
  0x3d   :  { %3487 = vmatprep.mubr.msk.f32.mxu0 %vm81_vm3, %v67_v31 }
  0x40   :  { %3488 = vmatmul.mubr.msk.f32.gmra.mrb[28].mxu0 %vm81_vm3, %v68_v32 }
  0x41   :  { %3490 = vmatprep.mubr.msk.f32.mxu0 %vm81_vm3, %v69_v33 }
  0x44   :  { %3491 = vmatmul.mubr.msk.f32.gmra.mrb[30].mxu0 %vm81_vm3, %v70_v34 }
  0xdb   :  { %v3447_v40 = vpop.f32.mrb[0].mxu0 }
  0xdc   :  { %v248_v41 = vpop.f32.mrb[1].mxu0  ;;  %v4095_v43 = vadd.f32 %v3447_v40, %v4089_v39 }
  0xdd   :  { %v4092_v42 = vadd.f32 %v248_v41, %v4089_v39 }
  0xde   :  { %v411_v51 = vsel %vm407_vm4, %v4095_v43, 0.0 }
  0xdf   :  { %v3450_v44 = vpop.f32.mrb[2].mxu0  ;;  %v408_v45 = vsel %vm407_vm4, %v4092_v42, 0.0 }
  0xe0   :  { %v258_v46 = vpop.f32.mrb[3].mxu0  ;;  %409 = vadd.xlane.f32.xlu0 %v408_v45  ;;  %v4103_v48 = vadd.f32 %v3450_v44, %v4089_v39 }
  0xe1   :  { %v4100_v47 = vadd.f32 %v258_v46, %v4089_v39 }
  0xe2   :  { %v417_v56 = vsel %vm407_vm4, %v4103_v48, 0.0 }
  0xe3   :  { %v3453_v49 = vpop.f32.mrb[4].mxu0  ;;  %v414_v50 = vsel %vm407_vm4, %v4100_v47, 0.0 }
  0xe4   :  { %v268_v52 = vpop.f32.mrb[5].mxu0  ;;  %415 = vadd.xlane.f32.xlu1 %v414_v50  ;;  %412 = vadd.xlane.f32.xlu0 %v411_v51  ;;  %v4113_v54 = vadd.f32 %v3453_v49, %v4089_v39 }
  0xe5   :  { %v4110_v53 = vadd.f32 %v268_v52, %v4089_v39 }
  0xe6   :  { %v423_v62 = vsel %vm407_vm4, %v4113_v54, 0.0 }
  0xe7   :  { %v3456_v55 = vpop.f32.mrb[6].mxu0  ;;  %v420_v57 = vsel %vm407_vm4, %v4110_v53, 0.0 }
  0xe8   :  { %v278_v58 = vpop.f32.mrb[7].mxu0  ;;  %418 = vadd.xlane.f32.xlu1 %v417_v56  ;;  %421 = vadd.xlane.f32.xlu0 %v420_v57  ;;  %v4123_v60 = vadd.f32 %v3456_v55, %v4089_v39 }
  0xe9   :  { %v4120_v59 = vadd.f32 %v278_v58, %v4089_v39 }
  0xea   :  { %v429_v4 = vsel %vm407_vm4, %v4123_v60, 0.0 }
  0xeb   :  { %v3459_v61 = vpop.f32.mrb[8].mxu0  ;;  %v426_v63 = vsel %vm407_vm4, %v4120_v59, 0.0 }
  0xec   :  { %v288_v0 = vpop.f32.mrb[9].mxu0  ;;  %424 = vadd.xlane.f32.xlu1 %v423_v62  ;;  %427 = vadd.xlane.f32.xlu0 %v426_v63  ;;  %v4133_v2 = vadd.f32 %v3459_v61, %v4089_v39 }
  0xed   :  { %v4130_v1 = vadd.f32 %v288_v0, %v4089_v39 }
  0xee   :  { %v435_v10 = vsel %vm407_vm4, %v4133_v2, 0.0 }
  0xef   :  { %v3462_v3 = vpop.f32.mrb[10].mxu0  ;;  %v432_v5 = vsel %vm407_vm4, %v4130_v1, 0.0 }
  0xf0   :  { %v298_v6 = vpop.f32.mrb[11].mxu0  ;;  %430 = vadd.xlane.f32.xlu1 %v429_v4  ;;  %433 = vadd.xlane.f32.xlu0 %v432_v5  ;;  %v4143_v8 = vadd.f32 %v3462_v3, %v4089_v39 }
  0xf1   :  { %v4140_v7 = vadd.f32 %v298_v6, %v4089_v39 }
  0xf2   :  { %v441_v16 = vsel %vm407_vm4, %v4143_v8, 0.0 }
  0xf3   :  { %v3465_v9 = vpop.f32.mrb[12].mxu0  ;;  %v438_v11 = vsel %vm407_vm4, %v4140_v7, 0.0 }
  0xf4   :  { %v308_v12 = vpop.f32.mrb[13].mxu0  ;;  %436 = vadd.xlane.f32.xlu1 %v435_v10  ;;  %439 = vadd.xlane.f32.xlu0 %v438_v11  ;;  %v4153_v14 = vadd.f32 %v3465_v9, %v4089_v39 }
  0xf5   :  { %v4150_v13 = vadd.f32 %v308_v12, %v4089_v39 }
  0xf6   :  { %v447_v22 = vsel %vm407_vm4, %v4153_v14, 0.0 }
  0xf7   :  { %v3468_v15 = vpop.f32.mrb[14].mxu0  ;;  %v444_v17 = vsel %vm407_vm4, %v4150_v13, 0.0 }
  0xf8   :  { %v318_v18 = vpop.f32.mrb[15].mxu0  ;;  %442 = vadd.xlane.f32.xlu1 %v441_v16  ;;  %445 = vadd.xlane.f32.xlu0 %v444_v17  ;;  %v4163_v20 = vadd.f32 %v3468_v15, %v4089_v39 }
  0xf9   :  { %v4160_v19 = vadd.f32 %v318_v18, %v4089_v39 }
  0xfa   :  { %v453_v28 = vsel %vm407_vm4, %v4163_v20, 0.0 }
  0xfb   :  { %v3471_v21 = vpop.f32.mrb[16].mxu0  ;;  %v450_v23 = vsel %vm407_vm4, %v4160_v19, 0.0 }
  0xfc   :  { %v328_v24 = vpop.f32.mrb[17].mxu0  ;;  %448 = vadd.xlane.f32.xlu1 %v447_v22  ;;  %451 = vadd.xlane.f32.xlu0 %v450_v23  ;;  %v4173_v26 = vadd.f32 %v3471_v21, %v4089_v39 }
  0xfd   :  { %v4170_v25 = vadd.f32 %v328_v24, %v4089_v39 }
  0xfe   :  { %v459_v34 = vsel %vm407_vm4, %v4173_v26, 0.0 }
  0xff   :  { %v3474_v27 = vpop.f32.mrb[18].mxu0  ;;  %v456_v29 = vsel %vm407_vm4, %v4170_v25, 0.0 }
 0x100   :  { %v338_v30 = vpop.f32.mrb[19].mxu0  ;;  %454 = vadd.xlane.f32.xlu1 %v453_v28  ;;  %457 = vadd.xlane.f32.xlu0 %v456_v29  ;;  %v4183_v32 = vadd.f32 %v3474_v27, %v4089_v39 }
 0x101   :  { %v4180_v31 = vadd.f32 %v338_v30, %v4089_v39  ;;  %v929_v30 = vld [vmem:[%s5815_s3] sm:$0xff]  ;;  %s3207_s3 = sshll.u32 %s3880_s2, 4  ;;  %s3208_s3 = int_to_ptr.vmem [resolvable:$true] %s3207_s3 }
 0x102   :  { %v465_v46 = vsel %vm407_vm4, %v4183_v32, 0.0  ;;  %3493 = vmatprep.subr.mxu0 %v929_v30  ;;  %3649 = vmatprep.subr.mxu1 %v929_v30  ;;  %p3860_p1 = scmp.lt.s32.totalorder %s3208_s3, %s3208_s3 }
 0x103   :  { %v3477_v33 = vpop.f32.mrb[20].mxu0  ;;  %v462_v35 = vsel %vm407_vm4, %v4180_v31, 0.0  ;;  %3494 = vmatpush3.msra.mxu0 %v929_v30  ;;  %3650 = vmatpush3.msra.mxu1 %v929_v30 }
 0x104   :  { %v348_v40 = vpop.f32.mrb[21].mxu0  ;;  %460 = vadd.xlane.f32.xlu1 %v459_v34  ;;  %463 = vadd.xlane.f32.xlu0 %v462_v35  ;;  %v4193_v44 = vadd.f32 %v3477_v33, %v4089_v39 }
 0x105   :  { %v4190_v41 = vadd.f32 %v348_v40, %v4089_v39 }
 0x106   :  { %v471_v56 = vsel %vm407_vm4, %v4193_v44, 0.0 }
 0x107   :  { %v3480_v45 = vpop.f32.mrb[22].mxu0  ;;  %v468_v49 = vsel %vm407_vm4, %v4190_v41, 0.0 }
 0x108   :  { %v358_v50 = vpop.f32.mrb[23].mxu0  ;;  %466 = vadd.xlane.f32.xlu1 %v465_v46  ;;  %469 = vadd.xlane.f32.xlu0 %v468_v49  ;;  %v4203_v52 = vadd.f32 %v3480_v45, %v4089_v39 }
 0x109   :  { %v4200_v51 = vadd.f32 %v358_v50, %v4089_v39 }
 0x10a   :  { %v477_v0 = vsel %vm407_vm4, %v4203_v52, 0.0 }
 0x10b   :  { %v3483_v55 = vpop.f32.mrb[24].mxu0  ;;  %v474_v57 = vsel %vm407_vm4, %v4200_v51, 0.0 }
 0x10c   :  { %v368_v58 = vpop.f32.mrb[25].mxu0  ;;  %472 = vadd.xlane.f32.xlu1 %v471_v56  ;;  %475 = vadd.xlane.f32.xlu0 %v474_v57  ;;  %v4213_v62 = vadd.f32 %v3483_v55, %v4089_v39 }
 0x10d   :  { %v4210_v61 = vadd.f32 %v368_v58, %v4089_v39 }
 0x10e   :  { %v483_v10 = vsel %vm407_vm4, %v4213_v62, 0.0 }
 0x10f   :  { %v3486_v63 = vpop.f32.mrb[26].mxu0  ;;  %v480_v3 = vsel %vm407_vm4, %v4210_v61, 0.0 }
 0x110   :  { %v378_v4 = vpop.f32.mrb[27].mxu0  ;;  %478 = vadd.xlane.f32.xlu1 %v477_v0  ;;  %481 = vadd.xlane.f32.xlu0 %v480_v3  ;;  %v4220_v5 = vadd.f32 %v3486_v63, %v4089_v39 }
 0x111   :  { %v4223_v6 = vadd.f32 %v378_v4, %v4089_v39 }
 0x112   :  { %v489_v17 = vsel %vm407_vm4, %v4220_v5, 0.0 }
 0x113   :  { %v3489_v9 = vpop.f32.mrb[28].mxu0  ;;  %v486_v11 = vsel %vm407_vm4, %v4223_v6, 0.0 }
 0x114   :  { %v388_v12 = vpop.f32.mrb[29].mxu0  ;;  %484 = vadd.xlane.f32.xlu1 %v483_v10  ;;  %487 = vadd.xlane.f32.xlu0 %v486_v11  ;;  %v4230_v15 = vadd.f32 %v3489_v9, %v4089_v39 }
 0x115   :  { %v4233_v16 = vadd.f32 %v388_v12, %v4089_v39 }
 0x116   :  { %v495_v27 = vsel %vm407_vm4, %v4230_v15, 0.0 }
 0x117   :  { %v3492_v18 = vpop.f32.mrb[30].mxu0  ;;  %v492_v21 = vsel %vm407_vm4, %v4233_v16, 0.0 }
 0x118   :  { %v4240_v22 = vadd.f32 %v3492_v18, %v4089_v39  ;;  %v398_v23 = vpop.f32.mrb[31].mxu0  ;;  %490 = vadd.xlane.f32.xlu1 %v489_v17  ;;  %493 = vadd.xlane.f32.xlu0 %v492_v21 }
 0x119   :  { %v4243_v24 = vadd.f32 %v398_v23, %v4089_v39 }
 0x11a   :  { %v501_v29 = vsel %vm407_vm4, %v4240_v22, 0.0 }
 0x11b   :  { %v498_v28 = vsel %vm407_vm4, %v4243_v24, 0.0 }
 0x11c   :  { %496 = vadd.xlane.f32.xlu1 %v495_v27  ;;  %499 = vadd.xlane.f32.xlu0 %v498_v28 }
 0x120   :  { %502 = vadd.xlane.f32.xlu1 %v501_v29 }
 0x16d   :  { %v410_v39 = vpop.xlane.xlu0 %409 }
 0x16e   :  { %v505_v33 = vmul.f32 0.125, %v410_v39 }
 0x170   :  { %v4255_v34 = vsub.f32 %v4092_v42, %v505_v33 }
 0x171   :  { %v416_v35 = vpop.xlane.xlu1 %415  ;;  %v413_v40 = vpop.xlane.xlu0 %412 }
 0x172   :  { %v507_v45 = vmul.f32 0.125, %v416_v35  ;;  %v506_v46 = vmul.f32 0.125, %v413_v40  ;;  %v569_v49 = vmul.f32 %v4255_v34, %v4255_v34 }
 0x174   :  { %v4260_v50 = vsub.f32 %v4100_v47, %v507_v45  ;;  %v4263_v55 = vsub.f32 %v4095_v43, %v506_v46  ;;  %v601_v56 = vsel %vm407_vm4, %v569_v49, 0.0 }
 0x175   :  { %v419_v57 = vpop.xlane.xlu1 %418  ;;  %602 = vadd.xlane.f32.xlu0 %v601_v56  ;;  %v422_v58 = vpop.xlane.xlu0 %421 }
 0x176   :  { %v508_v42 = vmul.f32 0.125, %v419_v57  ;;  %v509_v63 = vmul.f32 0.125, %v422_v58  ;;  %v571_v0 = vmul.f32 %v4260_v50, %v4260_v50  ;;  %v570_v3 = vmul.f32 %v4263_v55, %v4263_v55 }
 0x178   :  { %v4271_v4 = vsub.f32 %v4103_v48, %v508_v42  ;;  %v4274_v47 = vsub.f32 %v4110_v53, %v509_v63  ;;  %v607_v43 = vsel %vm407_vm4, %v571_v0, 0.0  ;;  %v604_v9 = vsel %vm407_vm4, %v570_v3, 0.0 }
 0x179   :  { %v425_v10 = vpop.xlane.xlu1 %424  ;;  %608 = vadd.xlane.f32.xlu0 %v607_v43  ;;  %605 = vadd.xlane.f32.xlu1 %v604_v9  ;;  %v428_v11 = vpop.xlane.xlu0 %427 }
 0x17a   :  { %v510_v12 = vmul.f32 0.125, %v425_v10  ;;  %v511_v17 = vmul.f32 0.125, %v428_v11  ;;  %v572_v18 = vmul.f32 %v4271_v4, %v4271_v4  ;;  %v573_v48 = vmul.f32 %v4274_v47, %v4274_v47 }
 0x17c   :  { %v4283_v21 = vsub.f32 %v4113_v54, %v510_v12  ;;  %v4286_v53 = vsub.f32 %v4120_v59, %v511_v17  ;;  %v610_v23 = vsel %vm407_vm4, %v572_v18, 0.0  ;;  %v613_v27 = vsel %vm407_vm4, %v573_v48, 0.0 }
 0x17d   :  { %v431_v28 = vpop.xlane.xlu1 %430  ;;  %611 = vadd.xlane.f32.xlu1 %v610_v23  ;;  %614 = vadd.xlane.f32.xlu0 %v613_v27  ;;  %v434_v29 = vpop.xlane.xlu0 %433 }
 0x17e   :  { %v512_v30 = vmul.f32 0.125, %v431_v28  ;;  %v513_v39 = vmul.f32 0.125, %v434_v29  ;;  %v574_v33 = vmul.f32 %v4283_v21, %v4283_v21  ;;  %v575_v54 = vmul.f32 %v4286_v53, %v4286_v53 }
 0x180   :  { %v4295_v35 = vsub.f32 %v4123_v60, %v512_v30  ;;  %v4298_v59 = vsub.f32 %v4130_v1, %v513_v39  ;;  %v616_v40 = vsel %vm407_vm4, %v574_v33, 0.0  ;;  %v619_v45 = vsel %vm407_vm4, %v575_v54, 0.0 }
 0x181   :  { %v437_v46 = vpop.xlane.xlu1 %436  ;;  %617 = vadd.xlane.f32.xlu1 %v616_v40  ;;  %620 = vadd.xlane.f32.xlu0 %v619_v45  ;;  %v440_v49 = vpop.xlane.xlu0 %439 }
 0x182   :  { %v514_v56 = vmul.f32 0.125, %v437_v46  ;;  %v515_v57 = vmul.f32 0.125, %v440_v49  ;;  %v576_v58 = vmul.f32 %v4295_v35, %v4295_v35  ;;  %v577_v60 = vmul.f32 %v4298_v59, %v4298_v59 }
 0x184   :  { %v4307_v42 = vsub.f32 %v4133_v2, %v514_v56  ;;  %v4310_v1 = vsub.f32 %v4140_v7, %v515_v57  ;;  %v622_v63 = vsel %vm407_vm4, %v576_v58, 0.0  ;;  %v625_v0 = vsel %vm407_vm4, %v577_v60, 0.0 }
 0x185   :  { %v443_v3 = vpop.xlane.xlu1 %442  ;;  %623 = vadd.xlane.f32.xlu1 %v622_v63  ;;  %626 = vadd.xlane.f32.xlu0 %v625_v0  ;;  %v446_v43 = vpop.xlane.xlu0 %445 }
 0x186   :  { %v516_v9 = vmul.f32 0.125, %v443_v3  ;;  %v517_v10 = vmul.f32 0.125, %v446_v43  ;;  %v578_v11 = vmul.f32 %v4307_v42, %v4307_v42  ;;  %v579_v2 = vmul.f32 %v4310_v1, %v4310_v1 }
 0x188   :  { %v4319_v12 = vsub.f32 %v4143_v8, %v516_v9  ;;  %v4322_v7 = vsub.f32 %v4150_v13, %v517_v10  ;;  %v628_v17 = vsel %vm407_vm4, %v578_v11, 0.0  ;;  %v631_v18 = vsel %vm407_vm4, %v579_v2, 0.0 }
 0x189   :  { %v449_v48 = vpop.xlane.xlu1 %448  ;;  %629 = vadd.xlane.f32.xlu1 %v628_v17  ;;  %632 = vadd.xlane.f32.xlu0 %v631_v18  ;;  %v452_v23 = vpop.xlane.xlu0 %451 }
 0x18a   :  { %v518_v27 = vmul.f32 0.125, %v449_v48  ;;  %v519_v28 = vmul.f32 0.125, %v452_v23  ;;  %v580_v29 = vmul.f32 %v4319_v12, %v4319_v12  ;;  %v581_v8 = vmul.f32 %v4322_v7, %v4322_v7 }
 0x18c   :  { %v4331_v30 = vsub.f32 %v4153_v14, %v518_v27  ;;  %v4334_v13 = vsub.f32 %v4160_v19, %v519_v28  ;;  %v634_v39 = vsel %vm407_vm4, %v580_v29, 0.0  ;;  %v637_v33 = vsel %vm407_vm4, %v581_v8, 0.0 }
 0x18d   :  { %v455_v54 = vpop.xlane.xlu1 %454  ;;  %635 = vadd.xlane.f32.xlu1 %v634_v39  ;;  %638 = vadd.xlane.f32.xlu0 %v637_v33  ;;  %v458_v40 = vpop.xlane.xlu0 %457 }
 0x18e   :  { %v520_v45 = vmul.f32 0.125, %v455_v54  ;;  %v521_v46 = vmul.f32 0.125, %v458_v40  ;;  %v582_v49 = vmul.f32 %v4331_v30, %v4331_v30  ;;  %v583_v14 = vmul.f32 %v4334_v13, %v4334_v13 }
 0x190   :  { %v4343_v56 = vsub.f32 %v4163_v20, %v520_v45  ;;  %v4346_v19 = vsub.f32 %v4170_v25, %v521_v46  ;;  %v640_v57 = vsel %vm407_vm4, %v582_v49, 0.0  ;;  %v643_v58 = vsel %vm407_vm4, %v583_v14, 0.0 }
 0x191   :  { %v461_v60 = vpop.xlane.xlu1 %460  ;;  %641 = vadd.xlane.f32.xlu1 %v640_v57  ;;  %644 = vadd.xlane.f32.xlu0 %v643_v58  ;;  %v464_v63 = vpop.xlane.xlu0 %463 }
 0x192   :  { %v522_v0 = vmul.f32 0.125, %v461_v60  ;;  %v523_v3 = vmul.f32 0.125, %v464_v63  ;;  %v584_v43 = vmul.f32 %v4343_v56, %v4343_v56  ;;  %v585_v20 = vmul.f32 %v4346_v19, %v4346_v19 }
 0x194   :  { %v4355_v9 = vsub.f32 %v4173_v26, %v522_v0  ;;  %v4358_v25 = vsub.f32 %v4180_v31, %v523_v3  ;;  %v646_v10 = vsel %vm407_vm4, %v584_v43, 0.0  ;;  %v649_v11 = vsel %vm407_vm4, %v585_v20, 0.0 }
 0x195   :  { %v467_v2 = vpop.xlane.xlu1 %466  ;;  %647 = vadd.xlane.f32.xlu1 %v646_v10  ;;  %650 = vadd.xlane.f32.xlu0 %v649_v11  ;;  %v470_v17 = vpop.xlane.xlu0 %469 }
 0x196   :  { %v524_v18 = vmul.f32 0.125, %v467_v2  ;;  %v525_v48 = vmul.f32 0.125, %v470_v17  ;;  %v586_v23 = vmul.f32 %v4355_v9, %v4355_v9  ;;  %v587_v26 = vmul.f32 %v4358_v25, %v4358_v25 }
 0x198   :  { %v4367_v27 = vsub.f32 %v4183_v32, %v524_v18  ;;  %v4370_v31 = vsub.f32 %v4190_v41, %v525_v48  ;;  %v652_v28 = vsel %vm407_vm4, %v586_v23, 0.0  ;;  %v655_v29 = vsel %vm407_vm4, %v587_v26, 0.0 }
 0x199   :  { %v473_v8 = vpop.xlane.xlu1 %472  ;;  %653 = vadd.xlane.f32.xlu1 %v652_v28  ;;  %656 = vadd.xlane.f32.xlu0 %v655_v29  ;;  %v476_v39 = vpop.xlane.xlu0 %475 }
 0x19a   :  { %v526_v33 = vmul.f32 0.125, %v473_v8  ;;  %v527_v54 = vmul.f32 0.125, %v476_v39  ;;  %v588_v40 = vmul.f32 %v4367_v27, %v4367_v27  ;;  %v589_v32 = vmul.f32 %v4370_v31, %v4370_v31 }
 0x19c   :  { %v4379_v45 = vsub.f32 %v4193_v44, %v526_v33  ;;  %v4382_v41 = vsub.f32 %v4200_v51, %v527_v54  ;;  %v658_v46 = vsel %vm407_vm4, %v588_v40, 0.0  ;;  %v661_v49 = vsel %vm407_vm4, %v589_v32, 0.0 }
 0x19d   :  { %v479_v14 = vpop.xlane.xlu1 %478  ;;  %659 = vadd.xlane.f32.xlu1 %v658_v46  ;;  %662 = vadd.xlane.f32.xlu0 %v661_v49  ;;  %v482_v57 = vpop.xlane.xlu0 %481 }
 0x19e   :  { %v528_v58 = vmul.f32 0.125, %v479_v14  ;;  %v529_v60 = vmul.f32 0.125, %v482_v57  ;;  %v590_v63 = vmul.f32 %v4379_v45, %v4379_v45  ;;  %v591_v44 = vmul.f32 %v4382_v41, %v4382_v41 }
 0x1a0   :  { %v4391_v0 = vsub.f32 %v4203_v52, %v528_v58  ;;  %v4394_v51 = vsub.f32 %v4210_v61, %v529_v60  ;;  %v664_v3 = vsel %vm407_vm4, %v590_v63, 0.0  ;;  %v667_v43 = vsel %vm407_vm4, %v591_v44, 0.0 }
 0x1a1   :  { %v485_v20 = vpop.xlane.xlu1 %484  ;;  %665 = vadd.xlane.f32.xlu1 %v664_v3  ;;  %668 = vadd.xlane.f32.xlu0 %v667_v43  ;;  %v488_v10 = vpop.xlane.xlu0 %487 }
 0x1a2   :  { %v530_v11 = vmul.f32 0.125, %v485_v20  ;;  %v531_v2 = vmul.f32 0.125, %v488_v10  ;;  %v592_v17 = vmul.f32 %v4391_v0, %v4391_v0  ;;  %v593_v52 = vmul.f32 %v4394_v51, %v4394_v51 }
 0x1a4   :  { %v4403_v18 = vsub.f32 %v4213_v62, %v530_v11  ;;  %v4406_v61 = vsub.f32 %v4223_v6, %v531_v2  ;;  %v670_v48 = vsel %vm407_vm4, %v592_v17, 0.0  ;;  %v673_v23 = vsel %vm407_vm4, %v593_v52, 0.0 }
 0x1a5   :  { %v491_v26 = vpop.xlane.xlu1 %490  ;;  %671 = vadd.xlane.f32.xlu1 %v670_v48  ;;  %674 = vadd.xlane.f32.xlu0 %v673_v23  ;;  %v494_v28 = vpop.xlane.xlu0 %493 }
 0x1a6   :  { %v532_v29 = vmul.f32 0.125, %v491_v26  ;;  %v533_v8 = vmul.f32 0.125, %v494_v28  ;;  %v594_v39 = vmul.f32 %v4403_v18, %v4403_v18  ;;  %v595_v62 = vmul.f32 %v4406_v61, %v4406_v61 }
 0x1a8   :  { %v4415_v33 = vsub.f32 %v4220_v5, %v532_v29  ;;  %v4418_v6 = vsub.f32 %v4233_v16, %v533_v8  ;;  %v676_v54 = vsel %vm407_vm4, %v594_v39, 0.0  ;;  %v679_v40 = vsel %vm407_vm4, %v595_v62, 0.0 }
 0x1a9   :  { %v497_v32 = vpop.xlane.xlu1 %496  ;;  %677 = vadd.xlane.f32.xlu1 %v676_v54  ;;  %680 = vadd.xlane.f32.xlu0 %v679_v40  ;;  %v500_v46 = vpop.xlane.xlu0 %499 }
 0x1aa   :  { %v534_v49 = vmul.f32 0.125, %v497_v32  ;;  %v535_v14 = vmul.f32 0.125, %v500_v46  ;;  %v596_v57 = vmul.f32 %v4415_v33, %v4415_v33  ;;  %v597_v5 = vmul.f32 %v4418_v6, %v4418_v6 }
 0x1ab   :  { %v4447_v32 = vsub.s32 1, %v4077_v36 }
 0x1ac   :  { %v4427_v58 = vsub.f32 %v4230_v15, %v534_v49  ;;  %v4430_v16 = vsub.f32 %v4243_v24, %v535_v14  ;;  %v682_v60 = vsel %vm407_vm4, %v596_v57, 0.0  ;;  %v685_v63 = vsel %vm407_vm4, %v597_v5, 0.0 }
 0x1ad   :  { %v503_v44 = vpop.xlane.xlu1 %502  ;;  %683 = vadd.xlane.f32.xlu1 %v682_v60  ;;  %686 = vadd.xlane.f32.xlu0 %v685_v63  ;;  %v4450_v14 = vsub.s32 2, %v4077_v36 }
 0x1ae   :  { %v536_v3 = vmul.f32 0.125, %v503_v44  ;;  %v598_v43 = vmul.f32 %v4427_v58, %v4427_v58  ;;  %v599_v20 = vmul.f32 %v4430_v16, %v4430_v16  ;;  %v4454_v44 = vrot.slane %v4085_v38, %v4447_v32 }
 0x1b0   :  { %v4439_v15 = vsub.f32 %v4240_v22, %v536_v3  ;;  %v688_v24 = vsel %vm407_vm4, %v598_v43, 0.0  ;;  %v691_v10 = vsel %vm407_vm4, %v599_v20, 0.0 }
 0x1b1   :  { %689 = vadd.xlane.f32.xlu1 %v688_v24  ;;  %692 = vadd.xlane.f32.xlu0 %v691_v10  ;;  %v4458_v24 = vrot.slane %v4085_v38, %v4450_v14 }
 0x1b2   :  { %v600_v11 = vmul.f32 %v4439_v15, %v4439_v15 }
 0x1b4   :  { %v694_v2 = vsel %vm407_vm4, %v600_v11, 0.0 }
 0x1b5   :  { %695 = vadd.xlane.f32.xlu1 %v694_v2 }
 0x202   :  { %v603_v17 = vpop.xlane.xlu0 %602 }
 0x203   :  { %v697_v52 = vmul.f32 0.125, %v603_v17 }
 0x205   :  { %v729_v48 = vadd.f32 1e-05, %v697_v52 }
 0x206   :  { %v606_v23 = vpop.xlane.xlu1 %605  ;;  %v609_v26 = vpop.xlane.xlu0 %608 }
 0x207   :  { %3655 = vrsqrt.f32 %v729_v48  ;;  %v698_v22 = vmul.f32 0.125, %v606_v23  ;;  %v699_v28 = vmul.f32 0.125, %v609_v26 }
 0x209   :  { %v730_v29 = vadd.f32 1e-05, %v698_v22  ;;  %v731_v8 = vadd.f32 1e-05, %v699_v28 }
 0x20a   :  { %v612_v39 = vpop.xlane.xlu1 %611  ;;  %v615_v62 = vpop.xlane.xlu0 %614 }
 0x20b   :  { %3657 = vrsqrt.f32 %v730_v29  ;;  %v700_v54 = vmul.f32 0.125, %v612_v39  ;;  %v701_v40 = vmul.f32 0.125, %v615_v62 }
 0x20c   :  { %3659 = vrsqrt.f32 %v731_v8 }
 0x20d   :  { %v732_v46 = vadd.f32 1e-05, %v700_v54  ;;  %v733_v49 = vadd.f32 1e-05, %v701_v40 }
 0x20e   :  { %v618_v57 = vpop.xlane.xlu1 %617  ;;  %v621_v5 = vpop.xlane.xlu0 %620 }
 0x20f   :  { %3661 = vrsqrt.f32 %v732_v46  ;;  %v702_v60 = vmul.f32 0.125, %v618_v57  ;;  %v703_v63 = vmul.f32 0.125, %v621_v5 }
 0x210   :  { %3663 = vrsqrt.f32 %v733_v49 }
 0x211   :  { %v3656_v3 = vpop.eup %3655  ;;  %v734_v43 = vadd.f32 1e-05, %v702_v60  ;;  %v735_v20 = vadd.f32 1e-05, %v703_v63 }
 0x212   :  { %v624_v10 = vpop.xlane.xlu1 %623  ;;  %v627_v36 = vpop.xlane.xlu0 %626  ;;  %v793_v11 = vmul.f32 %v3656_v3, %v4255_v34 }
 0x213   :  { %3665 = vrsqrt.f32 %v734_v43  ;;  %v704_v2 = vmul.f32 0.125, %v624_v10  ;;  %v705_v17 = vmul.f32 0.125, %v627_v36 }
 0x214   :  { %3667 = vrsqrt.f32 %v735_v20  ;;  %v829_v52 = vmul.f32 %v4454_v44, %v793_v11 }
 0x215   :  { %v3658_v48 = vpop.eup %3657  ;;  %v736_v23 = vadd.f32 1e-05, %v704_v2  ;;  %v737_v26 = vadd.f32 1e-05, %v705_v17 }
 0x216   :  { %v3660_v22 = vpop.eup %3659  ;;  %v794_v28 = vmul.f32 %v3658_v48, %v4263_v55  ;;  %v630_v29 = vpop.xlane.xlu1 %629  ;;  %v865_v38 = vadd.f32 %v4458_v24, %v829_v52 }
 0x217   :  { %v633_v8 = vpop.xlane.xlu0 %632  ;;  %3669 = vrsqrt.f32 %v736_v23  ;;  %v706_v39 = vmul.f32 0.125, %v630_v29  ;;  %v795_v34 = vmul.f32 %v3660_v22, %v4260_v50 }
 0x218   :  { %v707_v62 = vmul.f32 0.125, %v633_v8  ;;  %v830_v54 = vmul.f32 %v4454_v44, %v794_v28  ;;  %3671 = vrsqrt.f32 %v737_v26  ;;  %v897_v40 = vmax.f32 %v865_v38, 0.0 }
 0x219   :  { %v3662_v46 = vpop.eup %3661  ;;  %v738_v49 = vadd.f32 1e-05, %v706_v39  ;;  %v831_v5 = vmul.f32 %v4454_v44, %v795_v34 }
 0x21a   :  { %v739_v57 = vadd.f32 1e-05, %v707_v62  ;;  %v3664_v60 = vpop.eup %3663  ;;  %v866_v55 = vadd.f32 %v4458_v24, %v830_v54  ;;  %v636_v63 = vpop.xlane.xlu1 %635  ;;  %3495 = vmatprep.mubr.msk.f32.mxu0 %vm407_vm4, %v897_v40  ;;  %v796_v43 = vmul.f32 %v3662_v46, %v4271_v4 }
 0x21b   :  { %v639_v3 = vpop.xlane.xlu0 %638  ;;  %3673 = vrsqrt.f32 %v738_v49  ;;  %v708_v50 = vmul.f32 0.125, %v636_v63  ;;  %v867_v10 = vadd.f32 %v4458_v24, %v831_v5  ;;  %v797_v2 = vmul.f32 %v3664_v60, %v4274_v47 }
 0x21c   :  { %v709_v20 = vmul.f32 0.125, %v639_v3  ;;  %3675 = vrsqrt.f32 %v739_v57  ;;  %v898_v36 = vmax.f32 %v866_v55, 0.0  ;;  %v832_v11 = vmul.f32 %v4454_v44, %v796_v43 }
 0x21d   :  { %v3666_v17 = vpop.eup %3665  ;;  %v740_v52 = vadd.f32 1e-05, %v708_v50  ;;  %v899_v23 = vmax.f32 %v867_v10, 0.0  ;;  %v833_v29 = vmul.f32 %v4454_v44, %v797_v2 }
 0x21e   :  { %v741_v48 = vadd.f32 1e-05, %v709_v20  ;;  %v3668_v26 = vpop.eup %3667  ;;  %v642_v22 = vpop.xlane.xlu1 %641  ;;  %3496 = vmatmul.mubr.msk.f32.vlgmr.msra.gmra.mrb[32].mxu0 %vm407_vm4, %v898_v36  ;;  %v868_v28 = vadd.f32 %v4458_v24, %v832_v11  ;;  %v798_v8 = vmul.f32 %v3666_v17, %v4283_v21 }
 0x21f   :  { %v645_v4 = vpop.xlane.xlu0 %644  ;;  %3677 = vrsqrt.f32 %v740_v52  ;;  %v710_v38 = vmul.f32 0.125, %v642_v22  ;;  %3498 = vmatprep.mubr.msk.f32.mxu0 %vm407_vm4, %v899_v23  ;;  %v799_v47 = vmul.f32 %v3668_v26, %v4286_v53  ;;  %v869_v34 = vadd.f32 %v4458_v24, %v833_v29 }
 0x220   :  { %v711_v39 = vmul.f32 0.125, %v645_v4  ;;  %3679 = vrsqrt.f32 %v741_v48  ;;  %v900_v62 = vmax.f32 %v868_v28, 0.0  ;;  %v834_v54 = vmul.f32 %v4454_v44, %v798_v8 }
 0x221   :  { %v3670_v40 = vpop.eup %3669  ;;  %v742_v46 = vadd.f32 1e-05, %v710_v38  ;;  %v835_v57 = vmul.f32 %v4454_v44, %v799_v47  ;;  %v901_v55 = vmax.f32 %v869_v34, 0.0 }
 0x222   :  { %v743_v49 = vadd.f32 1e-05, %v711_v39  ;;  %v3672_v5 = vpop.eup %3671  ;;  %v648_v21 = vpop.xlane.xlu1 %647  ;;  %3499 = vmatmul.mubr.msk.f32.gmra.mrb[34].mxu0 %vm407_vm4, %v900_v62  ;;  %v870_v63 = vadd.f32 %v4458_v24, %v834_v54  ;;  %v800_v53 = vmul.f32 %v3670_v40, %v4295_v35 }
 0x223   :  { %v651_v60 = vpop.xlane.xlu0 %650  ;;  %3681 = vrsqrt.f32 %v742_v46  ;;  %v712_v3 = vmul.f32 0.125, %v648_v21  ;;  %v871_v50 = vadd.f32 %v4458_v24, %v835_v57  ;;  %3501 = vmatprep.mubr.msk.f32.mxu0 %vm407_vm4, %v901_v55  ;;  %v801_v36 = vmul.f32 %v3672_v5, %v4298_v59 }
 0x224   :  { %v713_v43 = vmul.f32 0.125, %v651_v60  ;;  %3683 = vrsqrt.f32 %v743_v49  ;;  %v902_v20 = vmax.f32 %v870_v63, 0.0  ;;  %v836_v10 = vmul.f32 %v4454_v44, %v800_v53 }
 0x225   :  { %v3674_v11 = vpop.eup %3673  ;;  %v744_v2 = vadd.f32 1e-05, %v712_v3  ;;  %v903_v52 = vmax.f32 %v871_v50, 0.0  ;;  %v837_v22 = vmul.f32 %v4454_v44, %v801_v36 }
 0x226   :  { %v745_v17 = vadd.f32 1e-05, %v713_v43  ;;  %v3676_v48 = vpop.eup %3675  ;;  %v654_v23 = vpop.xlane.xlu1 %653  ;;  %3502 = vmatmul.mubr.msk.f32.gmra.mrb[36].mxu0 %vm407_vm4, %v902_v20  ;;  %v872_v26 = vadd.f32 %v4458_v24, %v836_v10  ;;  %v802_v4 = vmul.f32 %v3674_v11, %v4307_v42 }
 0x227   :  { %v657_v35 = vpop.xlane.xlu0 %656  ;;  %3685 = vrsqrt.f32 %v744_v2  ;;  %v714_v28 = vmul.f32 0.125, %v654_v23  ;;  %3504 = vmatprep.mubr.msk.f32.mxu0 %vm407_vm4, %v903_v52  ;;  %v803_v59 = vmul.f32 %v3676_v48, %v4310_v1  ;;  %v873_v38 = vadd.f32 %v4458_v24, %v837_v22 }
 0x228   :  { %v715_v29 = vmul.f32 0.125, %v657_v35  ;;  %3687 = vrsqrt.f32 %v745_v17  ;;  %v904_v8 = vmax.f32 %v872_v26, 0.0  ;;  %v838_v39 = vmul.f32 %v4454_v44, %v802_v4 }
 0x229   :  { %v3678_v47 = vpop.eup %3677  ;;  %v746_v62 = vadd.f32 1e-05, %v714_v28  ;;  %v839_v54 = vmul.f32 %v4454_v44, %v803_v59  ;;  %v905_v49 = vmax.f32 %v873_v38, 0.0 }
 0x22a   :  { %v747_v34 = vadd.f32 1e-05, %v715_v29  ;;  %v3680_v40 = vpop.eup %3679  ;;  %v660_v42 = vpop.xlane.xlu1 %659  ;;  %3505 = vmatmul.mubr.msk.f32.gmra.mrb[38].mxu0 %vm407_vm4, %v904_v8  ;;  %v874_v57 = vadd.f32 %v4458_v24, %v838_v39  ;;  %v804_v1 = vmul.f32 %v3678_v47, %v4319_v12 }
 0x22b   :  { %v663_v46 = vpop.xlane.xlu0 %662  ;;  %3689 = vrsqrt.f32 %v746_v62  ;;  %v716_v5 = vmul.f32 0.125, %v660_v42  ;;  %v875_v60 = vadd.f32 %v4458_v24, %v839_v54  ;;  %3507 = vmatprep.mubr.msk.f32.mxu0 %vm407_vm4, %v905_v49  ;;  %v805_v53 = vmul.f32 %v3680_v40, %v4322_v7 }
 0x22c   :  { %v717_v21 = vmul.f32 0.125, %v663_v46  ;;  %3691 = vrsqrt.f32 %v747_v34  ;;  %v906_v55 = vmax.f32 %v874_v57, 0.0  ;;  %v840_v63 = vmul.f32 %v4454_v44, %v804_v1 }
 0x22d   :  { %v3682_v3 = vpop.eup %3681  ;;  %v748_v43 = vadd.f32 1e-05, %v716_v5  ;;  %v907_v20 = vmax.f32 %v875_v60, 0.0  ;;  %v841_v2 = vmul.f32 %v4454_v44, %v805_v53 }
 0x22e   :  { %v749_v50 = vadd.f32 1e-05, %v717_v21  ;;  %v3684_v10 = vpop.eup %3683  ;;  %v666_v36 = vpop.xlane.xlu1 %665  ;;  %3508 = vmatmul.mubr.msk.f32.gmra.mrb[40].mxu0 %vm407_vm4, %v906_v55  ;;  %v876_v11 = vadd.f32 %v4458_v24, %v840_v63  ;;  %v806_v17 = vmul.f32 %v3682_v3, %v4331_v30 }
 0x22f   :  { %v669_v12 = vpop.xlane.xlu0 %668  ;;  %3693 = vrsqrt.f32 %v748_v43  ;;  %v718_v52 = vmul.f32 0.125, %v666_v36  ;;  %3510 = vmatprep.mubr.msk.f32.mxu1 %vm407_vm4, %v907_v20  ;;  %v807_v48 = vmul.f32 %v3684_v10, %v4334_v13  ;;  %v877_v35 = vadd.f32 %v4458_v24, %v841_v2 }
 0x230   :  { %v719_v7 = vmul.f32 0.125, %v669_v12  ;;  %3695 = vrsqrt.f32 %v749_v50  ;;  %v908_v23 = vmax.f32 %v876_v11, 0.0  ;;  %v842_v26 = vmul.f32 %v4454_v44, %v806_v17 }
 0x231   :  { %v3686_v22 = vpop.eup %3685  ;;  %v750_v4 = vadd.f32 1e-05, %v718_v52  ;;  %v843_v29 = vmul.f32 %v4454_v44, %v807_v48  ;;  %v909_v38 = vmax.f32 %v877_v35, 0.0 }
 0x232   :  { %v751_v28 = vadd.f32 1e-05, %v719_v7  ;;  %v3688_v59 = vpop.eup %3687  ;;  %v672_v30 = vpop.xlane.xlu1 %671  ;;  %3511 = vmatmul.mubr.msk.f32.vlgmr.msra.gmra.mrb[0].mxu1 %vm407_vm4, %v908_v23  ;;  %v878_v39 = vadd.f32 %v4458_v24, %v842_v26  ;;  %v808_v13 = vmul.f32 %v3686_v22, %v4343_v56 }
 0x233   :  { %v675_v8 = vpop.xlane.xlu0 %674  ;;  %3697 = vrsqrt.f32 %v750_v4  ;;  %v720_v47 = vmul.f32 0.125, %v672_v30  ;;  %v879_v34 = vadd.f32 %v4458_v24, %v843_v29  ;;  %3513 = vmatprep.mubr.msk.f32.mxu1 %vm407_vm4, %v909_v38  ;;  %v809_v42 = vmul.f32 %v3688_v59, %v4346_v19 }
 0x234   :  { %v721_v62 = vmul.f32 0.125, %v675_v8  ;;  %3699 = vrsqrt.f32 %v751_v28  ;;  %v910_v54 = vmax.f32 %v878_v39, 0.0  ;;  %v844_v40 = vmul.f32 %v4454_v44, %v808_v13 }
 0x235   :  { %v3690_v46 = vpop.eup %3689  ;;  %v752_v49 = vadd.f32 1e-05, %v720_v47  ;;  %v911_v1 = vmax.f32 %v879_v34, 0.0  ;;  %v845_v55 = vmul.f32 %v4454_v44, %v809_v42 }
 0x236   :  { %v753_v57 = vadd.f32 1e-05, %v721_v62  ;;  %v3692_v5 = vpop.eup %3691  ;;  %v678_v21 = vpop.xlane.xlu1 %677  ;;  %3514 = vmatmul.mubr.msk.f32.gmra.mrb[2].mxu1 %vm407_vm4, %v910_v54  ;;  %v880_v60 = vadd.f32 %v4458_v24, %v844_v40  ;;  %v810_v63 = vmul.f32 %v3690_v46, %v4355_v9 }
 0x237   :  { %v681_v56 = vpop.xlane.xlu0 %680  ;;  %3701 = vrsqrt.f32 %v752_v49  ;;  %v722_v53 = vmul.f32 0.125, %v678_v21  ;;  %3516 = vmatprep.mubr.msk.f32.mxu1 %vm407_vm4, %v911_v1  ;;  %v811_v19 = vmul.f32 %v3692_v5, %v4358_v25  ;;  %v881_v50 = vadd.f32 %v4458_v24, %v845_v55 }
 0x238   :  { %v723_v3 = vmul.f32 0.125, %v681_v56  ;;  %3703 = vrsqrt.f32 %v753_v57  ;;  %v912_v43 = vmax.f32 %v880_v60, 0.0  ;;  %v846_v20 = vmul.f32 %v4454_v44, %v810_v63 }
 0x239   :  { %v3694_v10 = vpop.eup %3693  ;;  %v754_v36 = vadd.f32 1e-05, %v722_v53  ;;  %v847_v11 = vmul.f32 %v4454_v44, %v811_v19  ;;  %v913_v52 = vmax.f32 %v881_v50, 0.0 }
 0x23a   :  { %v755_v12 = vadd.f32 1e-05, %v723_v3  ;;  %v3696_v2 = vpop.eup %3695  ;;  %v684_v9 = vpop.xlane.xlu1 %683  ;;  %3517 = vmatmul.mubr.msk.f32.gmra.mrb[4].mxu1 %vm407_vm4, %v912_v43  ;;  %v882_v7 = vadd.f32 %v4458_v24, %v846_v20  ;;  %v812_v25 = vmul.f32 %v3694_v10, %v4367_v27 }
 0x23b   :  { %v687_v17 = vpop.xlane.xlu0 %686  ;;  %3705 = vrsqrt.f32 %v754_v36  ;;  %v724_v48 = vmul.f32 0.125, %v684_v9  ;;  %v883_v35 = vadd.f32 %v4458_v24, %v847_v11  ;;  %3519 = vmatprep.mubr.msk.f32.mxu1 %vm407_vm4, %v913_v52  ;;  %v813_v4 = vmul.f32 %v3696_v2, %v4370_v31 }
 0x23c   :  { %v725_v23 = vmul.f32 0.125, %v687_v17  ;;  %3707 = vrsqrt.f32 %v755_v12  ;;  %v914_v26 = vmax.f32 %v882_v7, 0.0  ;;  %v848_v22 = vmul.f32 %v4454_v44, %v812_v25 }
 0x23d   :  { %v3698_v28 = vpop.eup %3697  ;;  %v756_v29 = vadd.f32 1e-05, %v724_v48  ;;  %v915_v30 = vmax.f32 %v883_v35, 0.0  ;;  %v849_v13 = vmul.f32 %v4454_v44, %v813_v4 }
 0x23e   :  { %v757_v59 = vadd.f32 1e-05, %v725_v23  ;;  %v3700_v8 = vpop.eup %3699  ;;  %v690_v38 = vpop.xlane.xlu1 %689  ;;  %3520 = vmatmul.mubr.msk.f32.gmra.mrb[6].mxu1 %vm407_vm4, %v914_v26  ;;  %v884_v39 = vadd.f32 %v4458_v24, %v848_v22  ;;  %v814_v47 = vmul.f32 %v3698_v28, %v4379_v45 }
 0x23f   :  { %v693_v27 = vpop.xlane.xlu0 %692  ;;  %3709 = vrsqrt.f32 %v756_v29  ;;  %v726_v62 = vmul.f32 0.125, %v690_v38  ;;  %3522 = vmatprep.mubr.msk.f32.mxu1 %vm407_vm4, %v915_v30  ;;  %v815_v31 = vmul.f32 %v3700_v8, %v4382_v41  ;;  %v885_v40 = vadd.f32 %v4458_v24, %v849_v13 }
 0x240   :  { %v727_v34 = vmul.f32 0.125, %v693_v27  ;;  %3711 = vrsqrt.f32 %v757_v59  ;;  %v916_v54 = vmax.f32 %v884_v39, 0.0  ;;  %v850_v42 = vmul.f32 %v4454_v44, %v814_v47 }
 0x241   :  { %v3702_v46 = vpop.eup %3701  ;;  %v758_v49 = vadd.f32 1e-05, %v726_v62  ;;  %v851_v1 = vmul.f32 %v4454_v44, %v815_v31  ;;  %v917_v21 = vmax.f32 %v885_v40, 0.0 }
 0x242   :  { %v759_v57 = vadd.f32 1e-05, %v727_v34  ;;  %v3704_v5 = vpop.eup %3703  ;;  %v696_v45 = vpop.xlane.xlu1 %695  ;;  %3523 = vmatmul.mubr.msk.f32.gmra.mrb[8].mxu1 %vm407_vm4, %v916_v54  ;;  %v886_v56 = vadd.f32 %v4458_v24, %v850_v42  ;;  %v816_v41 = vmul.f32 %v3702_v46, %v4391_v0 }
 0x243   :  { %3713 = vrsqrt.f32 %v758_v49  ;;  %v728_v60 = vmul.f32 0.125, %v696_v45  ;;  %v887_v55 = vadd.f32 %v4458_v24, %v851_v1  ;;  %v817_v63 = vmul.f32 %v3704_v5, %v4394_v51  ;;  %3525 = vmatprep.mubr.msk.f32.mxu1 %vm407_vm4, %v917_v21 }
 0x244   :  { %3715 = vrsqrt.f32 %v759_v57  ;;  %v918_v53 = vmax.f32 %v886_v56, 0.0  ;;  %v852_v3 = vmul.f32 %v4454_v44, %v816_v41 }
 0x245   :  { %v3706_v19 = vpop.eup %3705  ;;  %v760_v43 = vadd.f32 1e-05, %v728_v60  ;;  %v919_v50 = vmax.f32 %v887_v55, 0.0  ;;  %v853_v20 = vmul.f32 %v4454_v44, %v817_v63 }
 0x246   :  { %v3708_v10 = vpop.eup %3707  ;;  %3526 = vmatmul.mubr.msk.f32.gmra.mrb[10].mxu1 %vm407_vm4, %v918_v53  ;;  %v888_v0 = vadd.f32 %v4458_v24, %v852_v3  ;;  %v818_v36 = vmul.f32 %v3706_v19, %v4403_v18 }
 0x247   :  { %3717 = vrsqrt.f32 %v760_v43  ;;  %3528 = vmatprep.mubr.msk.f32.mxu1 %vm407_vm4, %v919_v50  ;;  %v889_v51 = vadd.f32 %v4458_v24, %v853_v20  ;;  %v819_v12 = vmul.f32 %v3708_v10, %v4406_v61 }
 0x248   :  { %v920_v11 = vmax.f32 %v888_v0, 0.0  ;;  %v854_v2 = vmul.f32 %v4454_v44, %v818_v36 }
 0x249   :  { %v3710_v9 = vpop.eup %3709  ;;  %v921_v17 = vmax.f32 %v889_v51, 0.0  ;;  %v855_v52 = vmul.f32 %v4454_v44, %v819_v12 }
 0x24a   :  { %v3712_v7 = vpop.eup %3711  ;;  %3529 = vmatmul.mubr.msk.f32.gmra.mrb[12].mxu1 %vm407_vm4, %v920_v11  ;;  %v890_v25 = vadd.f32 %v4458_v24, %v854_v2  ;;  %v820_v18 = vmul.f32 %v3710_v9, %v4415_v33 }
 0x24b   :  { %3531 = vmatprep.mubr.msk.f32.mxu1 %vm407_vm4, %v921_v17  ;;  %v891_v48 = vadd.f32 %v4458_v24, %v855_v52  ;;  %v821_v61 = vmul.f32 %v3712_v7, %v4418_v6 }
 0x24c   :  { %v922_v23 = vmax.f32 %v890_v25, 0.0  ;;  %v856_v35 = vmul.f32 %v4454_v44, %v820_v18 }
 0x24d   :  { %v3714_v26 = vpop.eup %3713  ;;  %v923_v22 = vmax.f32 %v891_v48, 0.0  ;;  %v857_v4 = vmul.f32 %v4454_v44, %v821_v61 }
 0x24e   :  { %v3716_v28 = vpop.eup %3715  ;;  %3532 = vmatmul.mubr.msk.f32.gmra.mrb[14].mxu1 %vm407_vm4, %v922_v23  ;;  %v892_v29 = vadd.f32 %v4458_v24, %v856_v35  ;;  %v822_v33 = vmul.f32 %v3714_v26, %v4427_v58 }
 0x24f   :  { %3534 = vmatprep.mubr.msk.f32.mxu1 %vm407_vm4, %v923_v22  ;;  %v893_v59 = vadd.f32 %v4458_v24, %v857_v4  ;;  %v823_v6 = vmul.f32 %v3716_v28, %v4430_v16 }
 0x250   :  { %v924_v30 = vmax.f32 %v892_v29, 0.0  ;;  %v858_v8 = vmul.f32 %v4454_v44, %v822_v33 }
 0x251   :  { %v3718_v38 = vpop.eup %3717  ;;  %v925_v27 = vmax.f32 %v893_v59, 0.0  ;;  %v859_v39 = vmul.f32 %v4454_v44, %v823_v6 }
 0x252   :  { %3535 = vmatmul.mubr.msk.f32.gmra.mrb[16].mxu1 %vm407_vm4, %v924_v30  ;;  %v894_v13 = vadd.f32 %v4458_v24, %v858_v8  ;;  %v824_v47 = vmul.f32 %v3718_v38, %v4439_v15  ;;  %v4591_v15 = vld [vmem:[%s5816_s4] sm:$0x7] }
 0x253   :  { %3537 = vmatprep.mubr.msk.f32.mxu1 %vm407_vm4, %v925_v27  ;;  %v895_v58 = vadd.f32 %v4458_v24, %v859_v39  ;;  %v4595_v40 = vrot.slane %v4591_v15, %v4080_v37 }
 0x254   :  { %v926_v62 = vmax.f32 %v894_v13, 0.0  ;;  %v860_v16 = vmul.f32 %v4454_v44, %v824_v47 }
 0x255   :  { %v927_v34 = vmax.f32 %v895_v58, 0.0 }
 0x256   :  { %3538 = vmatmul.mubr.msk.f32.gmra.mrb[18].mxu1 %vm407_vm4, %v926_v62  ;;  %v896_v31 = vadd.f32 %v4458_v24, %v860_v16 }
 0x257   :  { %3540 = vmatprep.mubr.msk.f32.mxu1 %vm407_vm4, %v927_v34 }
 0x258   :  { %v928_v54 = vmax.f32 %v896_v31, 0.0 }
 0x25a   :  { %3541 = vmatmul.mubr.msk.f32.gmra.mrb[20].mxu1 %vm407_vm4, %v928_v54 }
 0x2f1   :  { %v3497_v44 = vpop.f32.mrb[32].mxu0 }
 0x2f2   :  { %v4598_v42 = vadd.f32 %v3497_v44, %v4595_v40  ;;  %v1096_v24 = vpop.f32.mrb[33].mxu0 }
 0x2f3   :  { %v4601_v46 = vadd.f32 %v1096_v24, %v4595_v40 }
 0x2f4   :  { %v1259_v49 = vsel %vm1255_vm5, %v4598_v42, 0.0 }
 0x2f5   :  { %1260 = vadd.xlane.f32.xlu1 %v1259_v49  ;;  %v3500_v57 = vpop.f32.mrb[34].mxu0  ;;  %v1256_v1 = vsel %vm1255_vm5, %v4601_v46, 0.0 }
 0x2f6   :  { %v4608_v5 = vadd.f32 %v3500_v57, %v4595_v40  ;;  %1257 = vadd.xlane.f32.xlu0 %v1256_v1  ;;  %v1106_v45 = vpop.f32.mrb[35].mxu0 }
 0x2f7   :  { %v4611_v21 = vadd.f32 %v1106_v45, %v4595_v40 }
 0x2f8   :  { %v1265_v56 = vsel %vm1255_vm5, %v4608_v5, 0.0 }
 0x2f9   :  { %1266 = vadd.xlane.f32.xlu1 %v1265_v56  ;;  %v3503_v41 = vpop.f32.mrb[36].mxu0  ;;  %v1262_v60 = vsel %vm1255_vm5, %v4611_v21, 0.0 }
 0x2fa   :  { %v4618_v55 = vadd.f32 %v3503_v41, %v4595_v40  ;;  %1263 = vadd.xlane.f32.xlu0 %v1262_v60  ;;  %v1116_v63 = vpop.f32.mrb[37].mxu0 }
 0x2fb   :  { %v4621_v53 = vadd.f32 %v1116_v63, %v4595_v40 }
 0x2fc   :  { %v1271_v3 = vsel %vm1255_vm5, %v4618_v55, 0.0 }
 0x2fd   :  { %1272 = vadd.xlane.f32.xlu1 %v1271_v3  ;;  %v3506_v19 = vpop.f32.mrb[38].mxu0  ;;  %v1268_v43 = vsel %vm1255_vm5, %v4621_v53, 0.0 }
 0x2fe   :  { %v4628_v50 = vadd.f32 %v3506_v19, %v4595_v40  ;;  %1269 = vadd.xlane.f32.xlu0 %v1268_v43  ;;  %v1126_v20 = vpop.f32.mrb[39].mxu0 }
 0x2ff   :  { %v4631_v10 = vadd.f32 %v1126_v20, %v4595_v40 }
 0x300   :  { %v1277_v0 = vsel %vm1255_vm5, %v4628_v50, 0.0 }
 0x301   :  { %1278 = vadd.xlane.f32.xlu1 %v1277_v0  ;;  %v3509_v36 = vpop.f32.mrb[40].mxu0  ;;  %v1274_v51 = vsel %vm1255_vm5, %v4631_v10, 0.0 }
 0x302   :  { %v4638_v12 = vadd.f32 %v3509_v36, %v4595_v40  ;;  %1275 = vadd.xlane.f32.xlu0 %v1274_v51  ;;  %v1136_v11 = vpop.f32.mrb[41].mxu0 }
 0x303   :  { %v4641_v2 = vadd.f32 %v1136_v11, %v4595_v40 }
 0x304   :  { %v1283_v9 = vsel %vm1255_vm5, %v4638_v12, 0.0 }
 0x305   :  { %1284 = vadd.xlane.f32.xlu1 %v1283_v9  ;;  %v3512_v17 = vpop.f32.mrb[0].mxu1  ;;  %v1280_v52 = vsel %vm1255_vm5, %v4641_v2, 0.0 }
 0x306   :  { %v4648_v7 = vadd.f32 %v3512_v17, %v4595_v40  ;;  %1281 = vadd.xlane.f32.xlu0 %v1280_v52  ;;  %v1146_v25 = vpop.f32.mrb[1].mxu1 }
 0x307   :  { %v4651_v18 = vadd.f32 %v1146_v25, %v4595_v40 }
 0x308   :  { %v1289_v48 = vsel %vm1255_vm5, %v4648_v7, 0.0 }
 0x309   :  { %1290 = vadd.xlane.f32.xlu1 %v1289_v48  ;;  %v3515_v61 = vpop.f32.mrb[2].mxu1  ;;  %v1286_v23 = vsel %vm1255_vm5, %v4651_v18, 0.0 }
 0x30a   :  { %v4658_v35 = vadd.f32 %v3515_v61, %v4595_v40  ;;  %1287 = vadd.xlane.f32.xlu0 %v1286_v23  ;;  %v1156_v26 = vpop.f32.mrb[3].mxu1 }
 0x30b   :  { %v4661_v22 = vadd.f32 %v1156_v26, %v4595_v40 }
 0x30c   :  { %v1295_v4 = vsel %vm1255_vm5, %v4658_v35, 0.0 }
 0x30d   :  { %1296 = vadd.xlane.f32.xlu1 %v1295_v4  ;;  %v3518_v28 = vpop.f32.mrb[4].mxu1  ;;  %v1292_v29 = vsel %vm1255_vm5, %v4661_v22, 0.0 }
 0x30e   :  { %v4668_v33 = vadd.f32 %v3518_v28, %v4595_v40  ;;  %1293 = vadd.xlane.f32.xlu0 %v1292_v29  ;;  %v1166_v59 = vpop.f32.mrb[5].mxu1 }
 0x30f   :  { %v4671_v6 = vadd.f32 %v1166_v59, %v4595_v40 }
 0x310   :  { %v1301_v30 = vsel %vm1255_vm5, %v4668_v33, 0.0 }
 0x311   :  { %1302 = vadd.xlane.f32.xlu1 %v1301_v30  ;;  %v3521_v8 = vpop.f32.mrb[6].mxu1  ;;  %v1298_v38 = vsel %vm1255_vm5, %v4671_v6, 0.0 }
 0x312   :  { %v4678_v27 = vadd.f32 %v3521_v8, %v4595_v40  ;;  %1299 = vadd.xlane.f32.xlu0 %v1298_v38  ;;  %v1176_v39 = vpop.f32.mrb[7].mxu1 }
 0x313   :  { %v4681_v13 = vadd.f32 %v1176_v39, %v4595_v40 }
 0x314   :  { %v1307_v47 = vsel %vm1255_vm5, %v4678_v27, 0.0 }
 0x315   :  { %1308 = vadd.xlane.f32.xlu1 %v1307_v47  ;;  %v3524_v58 = vpop.f32.mrb[8].mxu1  ;;  %v1304_v62 = vsel %vm1255_vm5, %v4681_v13, 0.0 }
 0x316   :  { %v4688_v16 = vadd.f32 %v3524_v58, %v4595_v40  ;;  %1305 = vadd.xlane.f32.xlu0 %v1304_v62  ;;  %v1186_v34 = vpop.f32.mrb[9].mxu1 }
 0x317   :  { %v4691_v31 = vadd.f32 %v1186_v34, %v4595_v40  ;;  %v1777_v34 = vld [vmem:[%s5817_s5] sm:$0xff] }
 0x318   :  { %v1313_v54 = vsel %vm1255_vm5, %v4688_v16, 0.0 }
 0x319   :  { %1314 = vadd.xlane.f32.xlu1 %v1313_v54  ;;  %v3527_v44 = vpop.f32.mrb[10].mxu1  ;;  %v1310_v24 = vsel %vm1255_vm5, %v4691_v31, 0.0  ;;  %v1778_v54 = vld [vmem:[%s5817_s5 + $0x8] sm:$0xff] }
 0x31a   :  { %v4698_v49 = vadd.f32 %v3527_v44, %v4595_v40  ;;  %1311 = vadd.xlane.f32.xlu0 %v1310_v24  ;;  %v1196_v57 = vpop.f32.mrb[11].mxu1  ;;  %v3629_v44 = vpack.c.bf16 %v1778_v54, %v1777_v34 }
 0x31b   :  { %v4701_v1 = vadd.f32 %v1196_v57, %v4595_v40 }
 0x31c   :  { %v1319_v45 = vsel %vm1255_vm5, %v4698_v49, 0.0  ;;  %3630 = vmatprep.subr.bf16.mxu1 %v3629_v44 }
 0x31d   :  { %1320 = vadd.xlane.f32.xlu1 %v1319_v45  ;;  %v3530_v56 = vpop.f32.mrb[12].mxu1  ;;  %v1316_v41 = vsel %vm1255_vm5, %v4701_v1, 0.0  ;;  %3632 = vmatpush3.bf16.msra.mxu1 %v3629_v44 }
 0x31e   :  { %v4708_v60 = vadd.f32 %v3530_v56, %v4595_v40  ;;  %1317 = vadd.xlane.f32.xlu0 %v1316_v41  ;;  %v1206_v63 = vpop.f32.mrb[13].mxu1 }
 0x31f   :  { %v4711_v3 = vadd.f32 %v1206_v63, %v4595_v40 }
 0x320   :  { %v1325_v19 = vsel %vm1255_vm5, %v4708_v60, 0.0 }
 0x321   :  { %1326 = vadd.xlane.f32.xlu1 %v1325_v19  ;;  %v3533_v43 = vpop.f32.mrb[14].mxu1  ;;  %v1322_v20 = vsel %vm1255_vm5, %v4711_v3, 0.0 }
 0x322   :  { %v4718_v0 = vadd.f32 %v3533_v43, %v4595_v40  ;;  %1323 = vadd.xlane.f32.xlu0 %v1322_v20  ;;  %v1216_v36 = vpop.f32.mrb[15].mxu1 }
 0x323   :  { %v4721_v51 = vadd.f32 %v1216_v36, %v4595_v40 }
 0x324   :  { %v1331_v11 = vsel %vm1255_vm5, %v4718_v0, 0.0 }
 0x325   :  { %1332 = vadd.xlane.f32.xlu1 %v1331_v11  ;;  %v3536_v9 = vpop.f32.mrb[16].mxu1  ;;  %v1328_v17 = vsel %vm1255_vm5, %v4721_v51, 0.0 }
 0x326   :  { %v4728_v52 = vadd.f32 %v3536_v9, %v4595_v40  ;;  %1329 = vadd.xlane.f32.xlu0 %v1328_v17  ;;  %v1226_v25 = vpop.f32.mrb[17].mxu1 }
 0x327   :  { %v4731_v48 = vadd.f32 %v1226_v25, %v4595_v40 }
 0x328   :  { %v1337_v61 = vsel %vm1255_vm5, %v4728_v52, 0.0 }
 0x329   :  { %1338 = vadd.xlane.f32.xlu1 %v1337_v61  ;;  %v3539_v23 = vpop.f32.mrb[18].mxu1  ;;  %v1334_v26 = vsel %vm1255_vm5, %v4731_v48, 0.0 }
 0x32a   :  { %v4738_v4 = vadd.f32 %v3539_v23, %v4595_v40  ;;  %1335 = vadd.xlane.f32.xlu0 %v1334_v26  ;;  %v1236_v28 = vpop.f32.mrb[19].mxu1 }
 0x32b   :  { %v4741_v29 = vadd.f32 %v1236_v28, %v4595_v40 }
 0x32c   :  { %v1343_v59 = vsel %vm1255_vm5, %v4738_v4, 0.0 }
 0x32d   :  { %1344 = vadd.xlane.f32.xlu1 %v1343_v59  ;;  %v3542_v30 = vpop.f32.mrb[20].mxu1  ;;  %v1340_v8 = vsel %vm1255_vm5, %v4741_v29, 0.0 }
 0x32e   :  { %v4748_v38 = vadd.f32 %v3542_v30, %v4595_v40  ;;  %1341 = vadd.xlane.f32.xlu0 %v1340_v8  ;;  %v1246_v39 = vpop.f32.mrb[21].mxu1 }
 0x32f   :  { %v4751_v47 = vadd.f32 %v1246_v39, %v4595_v40 }
 0x330   :  { %v1349_v58 = vsel %vm1255_vm5, %v4748_v38, 0.0 }
 0x331   :  { %1350 = vadd.xlane.f32.xlu1 %v1349_v58  ;;  %v1346_v62 = vsel %vm1255_vm5, %v4751_v47, 0.0 }
 0x332   :  { %1347 = vadd.xlane.f32.xlu0 %v1346_v62 }
 0x382   :  { %v1261_v40 = vpop.xlane.xlu1 %1260 }
 0x383   :  { %v1354_v24 = vmul.f32 0.0625, %v1261_v40  ;;  %v1258_v57 = vpop.xlane.xlu0 %1257 }
 0x384   :  { %v1353_v45 = vmul.f32 0.0625, %v1258_v57 }
 0x385   :  { %v4764_v56 = vsub.f32 %v4598_v42, %v1354_v24 }
 0x386   :  { %v4767_v41 = vsub.f32 %v4601_v46, %v1353_v45  ;;  %v1267_v63 = vpop.xlane.xlu1 %1266 }
 0x387   :  { %v1356_v19 = vmul.f32 0.0625, %v1267_v63  ;;  %v1264_v43 = vpop.xlane.xlu0 %1263  ;;  %v1418_v20 = vmul.f32 %v4764_v56, %v4764_v56 }
 0x388   :  { %v1355_v36 = vmul.f32 0.0625, %v1264_v43  ;;  %v1417_v11 = vmul.f32 %v4767_v41, %v4767_v41 }
 0x389   :  { %v4774_v9 = vsub.f32 %v4608_v5, %v1356_v19  ;;  %v1452_v17 = vsel %vm1255_vm5, %v1418_v20, 0.0 }
 0x38a   :  { %v4778_v42 = vsub.f32 %v4611_v21, %v1355_v36  ;;  %v1273_v46 = vpop.xlane.xlu1 %1272  ;;  %1453 = vadd.xlane.f32.xlu1 %v1452_v17  ;;  %v1449_v25 = vsel %vm1255_vm5, %v1417_v11, 0.0 }
 0x38b   :  { %v1358_v61 = vmul.f32 0.0625, %v1273_v46  ;;  %1450 = vadd.xlane.f32.xlu0 %v1449_v25  ;;  %v1270_v23 = vpop.xlane.xlu0 %1269  ;;  %v1420_v26 = vmul.f32 %v4774_v9, %v4774_v9 }
 0x38c   :  { %v1357_v28 = vmul.f32 0.0625, %v1270_v23  ;;  %v1419_v5 = vmul.f32 %v4778_v42, %v4778_v42 }
 0x38d   :  { %v4786_v59 = vsub.f32 %v4618_v55, %v1358_v61  ;;  %v1458_v21 = vsel %vm1255_vm5, %v1420_v26, 0.0 }
 0x38e   :  { %v4790_v30 = vsub.f32 %v4621_v53, %v1357_v28  ;;  %v1279_v8 = vpop.xlane.xlu1 %1278  ;;  %1459 = vadd.xlane.f32.xlu1 %v1458_v21  ;;  %v1455_v39 = vsel %vm1255_vm5, %v1419_v5, 0.0 }
 0x38f   :  { %v1360_v58 = vmul.f32 0.0625, %v1279_v8  ;;  %1456 = vadd.xlane.f32.xlu0 %v1455_v39  ;;  %v1276_v62 = vpop.xlane.xlu0 %1275  ;;  %v1422_v34 = vmul.f32 %v4786_v59, %v4786_v59 }
 0x390   :  { %v1359_v54 = vmul.f32 0.0625, %v1276_v62  ;;  %v1421_v55 = vmul.f32 %v4790_v30, %v4790_v30 }
 0x391   :  { %v4798_v44 = vsub.f32 %v4628_v50, %v1360_v58  ;;  %v1464_v53 = vsel %vm1255_vm5, %v1422_v34, 0.0 }
 0x392   :  { %v4802_v40 = vsub.f32 %v4631_v10, %v1359_v54  ;;  %v1285_v24 = vpop.xlane.xlu1 %1284  ;;  %1465 = vadd.xlane.f32.xlu1 %v1464_v53  ;;  %v1461_v57 = vsel %vm1255_vm5, %v1421_v55, 0.0 }
 0x393   :  { %v1362_v45 = vmul.f32 0.0625, %v1285_v24  ;;  %1462 = vadd.xlane.f32.xlu0 %v1461_v57  ;;  %v1282_v63 = vpop.xlane.xlu0 %1281  ;;  %v1424_v19 = vmul.f32 %v4798_v44, %v4798_v44 }
 0x394   :  { %v1361_v43 = vmul.f32 0.0625, %v1282_v63  ;;  %v1423_v50 = vmul.f32 %v4802_v40, %v4802_v40 }
 0x395   :  { %v4810_v20 = vsub.f32 %v4638_v12, %v1362_v45  ;;  %v1470_v10 = vsel %vm1255_vm5, %v1424_v19, 0.0 }
 0x396   :  { %v4814_v36 = vsub.f32 %v4641_v2, %v1361_v43  ;;  %v1291_v11 = vpop.xlane.xlu1 %1290  ;;  %1471 = vadd.xlane.f32.xlu1 %v1470_v10  ;;  %v1467_v17 = vsel %vm1255_vm5, %v1423_v50, 0.0 }
 0x397   :  { %v1364_v46 = vmul.f32 0.0625, %v1291_v11  ;;  %1468 = vadd.xlane.f32.xlu0 %v1467_v17  ;;  %v1288_v25 = vpop.xlane.xlu0 %1287  ;;  %v1426_v61 = vmul.f32 %v4810_v20, %v4810_v20 }
 0x398   :  { %v1363_v23 = vmul.f32 0.0625, %v1288_v25  ;;  %v1425_v12 = vmul.f32 %v4814_v36, %v4814_v36 }
 0x399   :  { %v4822_v26 = vsub.f32 %v4648_v7, %v1364_v46  ;;  %v1476_v2 = vsel %vm1255_vm5, %v1426_v61, 0.0 }
 0x39a   :  { %v4826_v28 = vsub.f32 %v4651_v18, %v1363_v23  ;;  %v1297_v5 = vpop.xlane.xlu1 %1296  ;;  %1477 = vadd.xlane.f32.xlu1 %v1476_v2  ;;  %v1473_v21 = vsel %vm1255_vm5, %v1425_v12, 0.0 }
 0x39b   :  { %v1366_v8 = vmul.f32 0.0625, %v1297_v5  ;;  %1474 = vadd.xlane.f32.xlu0 %v1473_v21  ;;  %v1294_v39 = vpop.xlane.xlu0 %1293  ;;  %v1428_v58 = vmul.f32 %v4822_v26, %v4822_v26 }
 0x39c   :  { %v1365_v62 = vmul.f32 0.0625, %v1294_v39  ;;  %v1427_v7 = vmul.f32 %v4826_v28, %v4826_v28 }
 0x39d   :  { %v4834_v34 = vsub.f32 %v4658_v35, %v1366_v8  ;;  %v1482_v18 = vsel %vm1255_vm5, %v1428_v58, 0.0 }
 0x39e   :  { %v4838_v54 = vsub.f32 %v4661_v22, %v1365_v62  ;;  %v1303_v55 = vpop.xlane.xlu1 %1302  ;;  %1483 = vadd.xlane.f32.xlu1 %v1482_v18  ;;  %v1479_v53 = vsel %vm1255_vm5, %v1427_v7, 0.0 }
 0x39f   :  { %v1368_v24 = vmul.f32 0.0625, %v1303_v55  ;;  %1480 = vadd.xlane.f32.xlu0 %v1479_v53  ;;  %v1300_v57 = vpop.xlane.xlu0 %1299  ;;  %v1430_v45 = vmul.f32 %v4834_v34, %v4834_v34 }
 0x3a0   :  { %v1367_v63 = vmul.f32 0.0625, %v1300_v57  ;;  %v1429_v35 = vmul.f32 %v4838_v54, %v4838_v54 }
 0x3a1   :  { %v4846_v19 = vsub.f32 %v4668_v33, %v1368_v24  ;;  %v1488_v22 = vsel %vm1255_vm5, %v1430_v45, 0.0 }
 0x3a2   :  { %v4850_v43 = vsub.f32 %v4671_v6, %v1367_v63  ;;  %v1309_v50 = vpop.xlane.xlu1 %1308  ;;  %1489 = vadd.xlane.f32.xlu1 %v1488_v22  ;;  %v1485_v10 = vsel %vm1255_vm5, %v1429_v35, 0.0 }
 0x3a3   :  { %v1370_v11 = vmul.f32 0.0625, %v1309_v50  ;;  %1486 = vadd.xlane.f32.xlu0 %v1485_v10  ;;  %v1306_v17 = vpop.xlane.xlu0 %1305  ;;  %v1432_v46 = vmul.f32 %v4846_v19, %v4846_v19 }
 0x3a4   :  { %v1369_v25 = vmul.f32 0.0625, %v1306_v17  ;;  %v1431_v33 = vmul.f32 %v4850_v43, %v4850_v43 }
 0x3a5   :  { %v4858_v61 = vsub.f32 %v4678_v27, %v1370_v11  ;;  %v1494_v6 = vsel %vm1255_vm5, %v1432_v46, 0.0 }
 0x3a6   :  { %v4862_v23 = vsub.f32 %v4681_v13, %v1369_v25  ;;  %v1315_v12 = vpop.xlane.xlu1 %1314  ;;  %1495 = vadd.xlane.f32.xlu1 %v1494_v6  ;;  %v1491_v2 = vsel %vm1255_vm5, %v1431_v33, 0.0 }
 0x3a7   :  { %v1372_v5 = vmul.f32 0.0625, %v1315_v12  ;;  %1492 = vadd.xlane.f32.xlu0 %v1491_v2  ;;  %v1312_v21 = vpop.xlane.xlu0 %1311  ;;  %v1434_v8 = vmul.f32 %v4858_v61, %v4858_v61 }
 0x3a8   :  { %v1371_v39 = vmul.f32 0.0625, %v1312_v21  ;;  %v1433_v27 = vmul.f32 %v4862_v23, %v4862_v23 }
 0x3a9   :  { %v4870_v58 = vsub.f32 %v4688_v16, %v1372_v5  ;;  %v1500_v13 = vsel %vm1255_vm5, %v1434_v8, 0.0 }
 0x3aa   :  { %v4874_v62 = vsub.f32 %v4691_v31, %v1371_v39  ;;  %v1321_v7 = vpop.xlane.xlu1 %1320  ;;  %1501 = vadd.xlane.f32.xlu1 %v1500_v13  ;;  %v1497_v18 = vsel %vm1255_vm5, %v1433_v27, 0.0 }
 0x3ab   :  { %v1374_v55 = vmul.f32 0.0625, %v1321_v7  ;;  %1498 = vadd.xlane.f32.xlu0 %v1497_v18  ;;  %v1318_v53 = vpop.xlane.xlu0 %1317  ;;  %v1436_v24 = vmul.f32 %v4870_v58, %v4870_v58 }
 0x3ac   :  { %v1373_v57 = vmul.f32 0.0625, %v1318_v53  ;;  %v1435_v16 = vmul.f32 %v4874_v62, %v4874_v62 }
 0x3ad   :  { %v4882_v45 = vsub.f32 %v4698_v49, %v1374_v55  ;;  %v1506_v31 = vsel %vm1255_vm5, %v1436_v24, 0.0 }
 0x3ae   :  { %v4886_v63 = vsub.f32 %v4701_v1, %v1373_v57  ;;  %v1327_v35 = vpop.xlane.xlu1 %1326  ;;  %1507 = vadd.xlane.f32.xlu1 %v1506_v31  ;;  %v1503_v22 = vsel %vm1255_vm5, %v1435_v16, 0.0 }
 0x3af   :  { %v1376_v50 = vmul.f32 0.0625, %v1327_v35  ;;  %1504 = vadd.xlane.f32.xlu0 %v1503_v22  ;;  %v1324_v10 = vpop.xlane.xlu0 %1323  ;;  %v1438_v11 = vmul.f32 %v4882_v45, %v4882_v45 }
 0x3b0   :  { %v1375_v17 = vmul.f32 0.0625, %v1324_v10  ;;  %v1437_v49 = vmul.f32 %v4886_v63, %v4886_v63 }
 0x3b1   :  { %v4894_v46 = vsub.f32 %v4708_v60, %v1376_v50  ;;  %v1512_v1 = vsel %vm1255_vm5, %v1438_v11, 0.0 }
 0x3b2   :  { %v4898_v25 = vsub.f32 %v4711_v3, %v1375_v17  ;;  %v1333_v33 = vpop.xlane.xlu1 %1332  ;;  %1513 = vadd.xlane.f32.xlu1 %v1512_v1  ;;  %v1509_v6 = vsel %vm1255_vm5, %v1437_v49, 0.0 }
 0x3b3   :  { %v1378_v12 = vmul.f32 0.0625, %v1333_v33  ;;  %1510 = vadd.xlane.f32.xlu0 %v1509_v6  ;;  %v1330_v2 = vpop.xlane.xlu0 %1329  ;;  %v1440_v5 = vmul.f32 %v4894_v46, %v4894_v46 }
 0x3b4   :  { %v1377_v21 = vmul.f32 0.0625, %v1330_v2  ;;  %v1439_v60 = vmul.f32 %v4898_v25, %v4898_v25 }
 0x3b5   :  { %v4906_v8 = vsub.f32 %v4718_v0, %v1378_v12  ;;  %v1518_v3 = vsel %vm1255_vm5, %v1440_v5, 0.0 }
 0x3b6   :  { %v4910_v39 = vsub.f32 %v4721_v51, %v1377_v21  ;;  %v1339_v27 = vpop.xlane.xlu1 %1338  ;;  %1519 = vadd.xlane.f32.xlu1 %v1518_v3  ;;  %v1515_v13 = vsel %vm1255_vm5, %v1439_v60, 0.0 }
 0x3b7   :  { %v1380_v7 = vmul.f32 0.0625, %v1339_v27  ;;  %1516 = vadd.xlane.f32.xlu0 %v1515_v13  ;;  %v1336_v18 = vpop.xlane.xlu0 %1335  ;;  %v1442_v55 = vmul.f32 %v4906_v8, %v4906_v8 }
 0x3b8   :  { %v1379_v53 = vmul.f32 0.0625, %v1336_v18  ;;  %v1441_v0 = vmul.f32 %v4910_v39, %v4910_v39 }
 0x3b9   :  { %v4918_v24 = vsub.f32 %v4728_v52, %v1380_v7  ;;  %v1524_v51 = vsel %vm1255_vm5, %v1442_v55, 0.0 }
 0x3ba   :  { %v4922_v57 = vsub.f32 %v4731_v48, %v1379_v53  ;;  %v1345_v16 = vpop.xlane.xlu1 %1344  ;;  %1525 = vadd.xlane.f32.xlu1 %v1524_v51  ;;  %v1521_v31 = vsel %vm1255_vm5, %v1441_v0, 0.0 }
 0x3bb   :  { %v1382_v35 = vmul.f32 0.0625, %v1345_v16  ;;  %1522 = vadd.xlane.f32.xlu0 %v1521_v31  ;;  %v1342_v22 = vpop.xlane.xlu0 %1341  ;;  %v1444_v50 = vmul.f32 %v4918_v24, %v4918_v24 }
 0x3bc   :  { %v1381_v10 = vmul.f32 0.0625, %v1342_v22  ;;  %v1443_v52 = vmul.f32 %v4922_v57, %v4922_v57 }
 0x3bd   :  { %v4930_v11 = vsub.f32 %v4738_v4, %v1382_v35  ;;  %v1530_v48 = vsel %vm1255_vm5, %v1444_v50, 0.0 }
 0x3be   :  { %v4934_v17 = vsub.f32 %v4741_v29, %v1381_v10  ;;  %1531 = vadd.xlane.f32.xlu1 %v1530_v48  ;;  %v1351_v49 = vpop.xlane.xlu1 %1350  ;;  %v1527_v1 = vsel %vm1255_vm5, %v1443_v52, 0.0 }
 0x3bf   :  { %v1384_v33 = vmul.f32 0.0625, %v1351_v49  ;;  %1528 = vadd.xlane.f32.xlu0 %v1527_v1  ;;  %v1348_v6 = vpop.xlane.xlu0 %1347  ;;  %v1446_v12 = vmul.f32 %v4930_v11, %v4930_v11 }
 0x3c0   :  { %v1383_v2 = vmul.f32 0.0625, %v1348_v6  ;;  %v1445_v4 = vmul.f32 %v4934_v17, %v4934_v17 }
 0x3c1   :  { %v4942_v5 = vsub.f32 %v4748_v38, %v1384_v33  ;;  %v1536_v29 = vsel %vm1255_vm5, %v1446_v12, 0.0 }
 0x3c2   :  { %v4946_v21 = vsub.f32 %v4751_v47, %v1383_v2  ;;  %1537 = vadd.xlane.f32.xlu1 %v1536_v29  ;;  %v1533_v60 = vsel %vm1255_vm5, %v1445_v4, 0.0  ;;  %v4957_v4 = vrot.slane %v4591_v15, %v4447_v32 }
 0x3c3   :  { %1534 = vadd.xlane.f32.xlu0 %v1533_v60  ;;  %v1448_v3 = vmul.f32 %v4942_v5, %v4942_v5 }
 0x3c4   :  { %v1447_v27 = vmul.f32 %v4946_v21, %v4946_v21 }
 0x3c5   :  { %v1542_v13 = vsel %vm1255_vm5, %v1448_v3, 0.0 }
 0x3c6   :  { %1543 = vadd.xlane.f32.xlu1 %v1542_v13  ;;  %v1539_v38 = vsel %vm1255_vm5, %v1447_v27, 0.0  ;;  %v4961_v13 = vrot.slane %v4591_v15, %v4450_v14 }
 0x3c7   :  { %1540 = vadd.xlane.f32.xlu0 %v1539_v38 }
 0x417   :  { %v1454_v7 = vpop.xlane.xlu1 %1453 }
 0x418   :  { %v1546_v18 = vmul.f32 0.0625, %v1454_v7  ;;  %v1451_v47 = vpop.xlane.xlu0 %1450 }
 0x419   :  { %v1545_v55 = vmul.f32 0.0625, %v1451_v47 }
 0x41a   :  { %v1578_v53 = vadd.f32 1e-05, %v1546_v18 }
 0x41b   :  { %v1577_v0 = vadd.f32 1e-05, %v1545_v55  ;;  %v1460_v51 = vpop.xlane.xlu1 %1459 }
 0x41c   :  { %3719 = vrsqrt.f32 %v1578_v53  ;;  %v1548_v16 = vmul.f32 0.0625, %v1460_v51  ;;  %v1457_v31 = vpop.xlane.xlu0 %1456 }
 0x41d   :  { %3721 = vrsqrt.f32 %v1577_v0  ;;  %v1547_v35 = vmul.f32 0.0625, %v1457_v31 }
 0x41e   :  { %v1580_v22 = vadd.f32 1e-05, %v1548_v16 }
 0x41f   :  { %v1579_v50 = vadd.f32 1e-05, %v1547_v35  ;;  %v1466_v10 = vpop.xlane.xlu1 %1465 }
 0x420   :  { %3723 = vrsqrt.f32 %v1580_v22  ;;  %v1550_v52 = vmul.f32 0.0625, %v1466_v10  ;;  %v1463_v48 = vpop.xlane.xlu0 %1462 }
 0x421   :  { %3725 = vrsqrt.f32 %v1579_v50  ;;  %v1549_v49 = vmul.f32 0.0625, %v1463_v48 }
 0x422   :  { %v1582_v1 = vadd.f32 1e-05, %v1550_v52 }
 0x423   :  { %v1581_v33 = vadd.f32 1e-05, %v1549_v49  ;;  %v1472_v6 = vpop.xlane.xlu1 %1471 }
 0x424   :  { %3727 = vrsqrt.f32 %v1582_v1  ;;  %v1552_v12 = vmul.f32 0.0625, %v1472_v6  ;;  %v1469_v2 = vpop.xlane.xlu0 %1468 }
 0x425   :  { %3729 = vrsqrt.f32 %v1581_v33  ;;  %v1551_v29 = vmul.f32 0.0625, %v1469_v2 }
 0x426   :  { %v3720_v60 = vpop.eup %3719  ;;  %v1584_v3 = vadd.f32 1e-05, %v1552_v12 }
 0x427   :  { %v3722_v27 = vpop.eup %3721  ;;  %v1642_v38 = vmul.f32 %v3720_v60, %v4764_v56  ;;  %v1583_v7 = vadd.f32 1e-05, %v1551_v29  ;;  %v1478_v18 = vpop.xlane.xlu1 %1477 }
 0x428   :  { %3731 = vrsqrt.f32 %v1584_v3  ;;  %v1554_v47 = vmul.f32 0.0625, %v1478_v18  ;;  %v1475_v55 = vpop.xlane.xlu0 %1474  ;;  %v1641_v53 = vmul.f32 %v3722_v27, %v4767_v41 }
 0x429   :  { %v1678_v0 = vmul.f32 %v4957_v4, %v1642_v38  ;;  %3733 = vrsqrt.f32 %v1583_v7  ;;  %v1553_v51 = vmul.f32 0.0625, %v1475_v55 }
 0x42a   :  { %v3724_v16 = vpop.eup %3723  ;;  %v1586_v31 = vadd.f32 1e-05, %v1554_v47  ;;  %v1677_v35 = vmul.f32 %v4957_v4, %v1641_v53 }
 0x42b   :  { %v3726_v22 = vpop.eup %3725  ;;  %v1714_v15 = vadd.f32 %v4961_v13, %v1678_v0  ;;  %v1585_v50 = vadd.f32 1e-05, %v1553_v51  ;;  %v1484_v56 = vpop.xlane.xlu1 %1483  ;;  %v1644_v10 = vmul.f32 %v3724_v16, %v4774_v9 }
 0x42c   :  { %3735 = vrsqrt.f32 %v1586_v31  ;;  %v1556_v52 = vmul.f32 0.0625, %v1484_v56  ;;  %v1481_v48 = vpop.xlane.xlu0 %1480  ;;  %v1713_v41 = vadd.f32 %v4961_v13, %v1677_v35  ;;  %v1643_v49 = vmul.f32 %v3726_v22, %v4778_v42 }
 0x42d   :  { %3737 = vrsqrt.f32 %v1585_v50  ;;  %v1555_v1 = vmul.f32 0.0625, %v1481_v48  ;;  %v1680_v33 = vmul.f32 %v4957_v4, %v1644_v10  ;;  %v1746_v9 = vmax.f32 %v1714_v15, 0.0 }
 0x42e   :  { %v3728_v6 = vpop.eup %3727  ;;  %v1588_v12 = vadd.f32 1e-05, %v1556_v52  ;;  %v1745_v2 = vmax.f32 %v1713_v41, 0.0  ;;  %v1679_v29 = vmul.f32 %v4957_v4, %v1643_v49 }
 0x42f   :  { %v3730_v60 = vpop.eup %3729  ;;  %v1587_v3 = vadd.f32 1e-05, %v1555_v1  ;;  %v1490_v27 = vpop.xlane.xlu1 %1489  ;;  %v1716_v38 = vadd.f32 %v4961_v13, %v1680_v33  ;;  %v1646_v7 = vmul.f32 %v3728_v6, %v4786_v59 }
 0x430   :  { %3739 = vrsqrt.f32 %v1588_v12  ;;  %v1558_v18 = vmul.f32 0.0625, %v1490_v27  ;;  %3547 = vmatprep.mubr.msk.f32.mxu1 %vm1255_vm5, %v1745_v2  ;;  %v1487_v42 = vpop.xlane.xlu0 %1486  ;;  %v1715_v47 = vadd.f32 %v4961_v13, %v1679_v29  ;;  %v1645_v55 = vmul.f32 %v3730_v60, %v4790_v30 }
 0x431   :  { %3741 = vrsqrt.f32 %v1587_v3  ;;  %v1557_v53 = vmul.f32 0.0625, %v1487_v42  ;;  %3548 = vmatmul.mubr.msk.f32.vlgmr.msra.gmra.mrb[22].mxu1 %vm1255_vm5, %v1746_v9  ;;  %v1682_v0 = vmul.f32 %v4957_v4, %v1646_v7  ;;  %v1748_v50 = vmax.f32 %v1716_v38, 0.0 }
 0x432   :  { %v3732_v51 = vpop.eup %3731  ;;  %v1590_v16 = vadd.f32 1e-05, %v1558_v18  ;;  %v1747_v31 = vmax.f32 %v1715_v47, 0.0  ;;  %v1681_v59 = vmul.f32 %v4957_v4, %v1645_v55 }
 0x433   :  { %v3734_v35 = vpop.eup %3733  ;;  %v1589_v22 = vadd.f32 1e-05, %v1557_v53  ;;  %v1496_v15 = vpop.xlane.xlu1 %1495  ;;  %v1718_v56 = vadd.f32 %v4961_v13, %v1682_v0  ;;  %v1648_v10 = vmul.f32 %v3732_v51, %v4798_v44 }
 0x434   :  { %3743 = vrsqrt.f32 %v1590_v16  ;;  %v1560_v30 = vmul.f32 0.0625, %v1496_v15  ;;  %3550 = vmatprep.mubr.msk.f32.mxu1 %vm1255_vm5, %v1747_v31  ;;  %v1493_v52 = vpop.xlane.xlu0 %1492  ;;  %v1717_v48 = vadd.f32 %v4961_v13, %v1681_v59  ;;  %v1647_v41 = vmul.f32 %v3734_v35, %v4802_v40 }
 0x435   :  { %3745 = vrsqrt.f32 %v1589_v22  ;;  %v1559_v49 = vmul.f32 0.0625, %v1493_v52  ;;  %3551 = vmatmul.mubr.msk.f32.gmra.mrb[24].mxu1 %vm1255_vm5, %v1748_v50  ;;  %v1684_v1 = vmul.f32 %v4957_v4, %v1648_v10  ;;  %v1750_v3 = vmax.f32 %v1718_v56, 0.0 }
 0x436   :  { %v3736_v33 = vpop.eup %3735  ;;  %v1592_v6 = vadd.f32 1e-05, %v1560_v30  ;;  %v1749_v12 = vmax.f32 %v1717_v48, 0.0  ;;  %v1683_v44 = vmul.f32 %v4957_v4, %v1647_v41 }
 0x437   :  { %v3738_v2 = vpop.eup %3737  ;;  %v1591_v29 = vadd.f32 1e-05, %v1559_v49  ;;  %v1502_v60 = vpop.xlane.xlu1 %1501  ;;  %v1720_v27 = vadd.f32 %v4961_v13, %v1684_v1  ;;  %v1650_v9 = vmul.f32 %v3736_v33, %v4810_v20 }
 0x438   :  { %3747 = vrsqrt.f32 %v1592_v6  ;;  %v1562_v40 = vmul.f32 0.0625, %v1502_v60  ;;  %3553 = vmatprep.mubr.msk.f32.mxu1 %vm1255_vm5, %v1749_v12  ;;  %v1499_v38 = vpop.xlane.xlu0 %1498  ;;  %v1719_v7 = vadd.f32 %v4961_v13, %v1683_v44  ;;  %v1649_v18 = vmul.f32 %v3738_v2, %v4814_v36 }
 0x439   :  { %3749 = vrsqrt.f32 %v1591_v29  ;;  %v1561_v42 = vmul.f32 0.0625, %v1499_v38  ;;  %3554 = vmatmul.mubr.msk.f32.gmra.mrb[26].mxu1 %vm1255_vm5, %v1750_v3  ;;  %v1686_v47 = vmul.f32 %v4957_v4, %v1650_v9  ;;  %v1752_v59 = vmax.f32 %v1720_v27, 0.0 }
 0x43a   :  { %v3740_v55 = vpop.eup %3739  ;;  %v1594_v53 = vadd.f32 1e-05, %v1562_v40  ;;  %v1751_v0 = vmax.f32 %v1719_v7, 0.0  ;;  %v1685_v20 = vmul.f32 %v4957_v4, %v1649_v18 }
 0x43b   :  { %v3742_v51 = vpop.eup %3741  ;;  %v1593_v16 = vadd.f32 1e-05, %v1561_v42  ;;  %v1508_v31 = vpop.xlane.xlu1 %1507  ;;  %v1722_v35 = vadd.f32 %v4961_v13, %v1686_v47  ;;  %v1652_v22 = vmul.f32 %v3740_v55, %v4822_v26 }
 0x43c   :  { %3751 = vrsqrt.f32 %v1594_v53  ;;  %v1564_v36 = vmul.f32 0.0625, %v1508_v31  ;;  %3556 = vmatprep.mubr.msk.f32.mxu1 %vm1255_vm5, %v1751_v0  ;;  %v1505_v15 = vpop.xlane.xlu0 %1504  ;;  %v1721_v50 = vadd.f32 %v4961_v13, %v1685_v20  ;;  %v1651_v56 = vmul.f32 %v3742_v51, %v4826_v28 }
 0x43d   :  { %3753 = vrsqrt.f32 %v1593_v16  ;;  %v1563_v10 = vmul.f32 0.0625, %v1505_v15  ;;  %3557 = vmatmul.mubr.msk.f32.gmra.mrb[28].mxu1 %vm1255_vm5, %v1752_v59  ;;  %v1688_v30 = vmul.f32 %v4957_v4, %v1652_v22  ;;  %v1754_v6 = vmax.f32 %v1722_v35, 0.0 }
 0x43e   :  { %v3744_v52 = vpop.eup %3743  ;;  %v1596_v48 = vadd.f32 1e-05, %v1564_v36  ;;  %v1753_v41 = vmax.f32 %v1721_v50, 0.0  ;;  %v1687_v26 = vmul.f32 %v4957_v4, %v1651_v56 }
 0x43f   :  { %v3746_v49 = vpop.eup %3745  ;;  %v1595_v1 = vadd.f32 1e-05, %v1563_v10  ;;  %v1514_v33 = vpop.xlane.xlu1 %1513  ;;  %v1724_v12 = vadd.f32 %v4961_v13, %v1688_v30  ;;  %v1654_v44 = vmul.f32 %v3744_v52, %v4834_v34 }
 0x440   :  { %3755 = vrsqrt.f32 %v1596_v48  ;;  %v1566_v28 = vmul.f32 0.0625, %v1514_v33  ;;  %3559 = vmatprep.mubr.msk.f32.mxu1 %vm1255_vm5, %v1753_v41  ;;  %v1511_v2 = vpop.xlane.xlu0 %1510  ;;  %v1723_v29 = vadd.f32 %v4961_v13, %v1687_v26  ;;  %v1653_v60 = vmul.f32 %v3746_v49, %v4838_v54 }
 0x441   :  { %3757 = vrsqrt.f32 %v1595_v1  ;;  %v1565_v3 = vmul.f32 0.0625, %v1511_v2  ;;  %3560 = vmatmul.mubr.msk.f32.gmra.mrb[30].mxu1 %vm1255_vm5, %v1754_v6  ;;  %v1690_v27 = vmul.f32 %v4957_v4, %v1654_v44  ;;  %v1756_v47 = vmax.f32 %v1724_v12, 0.0 }
 0x442   :  { %v3748_v9 = vpop.eup %3747  ;;  %v1598_v40 = vadd.f32 1e-05, %v1566_v28  ;;  %v1755_v38 = vmax.f32 %v1723_v29, 0.0  ;;  %v1689_v34 = vmul.f32 %v4957_v4, %v1653_v60 }
 0x443   :  { %v3750_v7 = vpop.eup %3749  ;;  %v1597_v18 = vadd.f32 1e-05, %v1565_v3  ;;  %v1520_v42 = vpop.xlane.xlu1 %1519  ;;  %v1726_v55 = vadd.f32 %v4961_v13, %v1690_v27  ;;  %v1656_v53 = vmul.f32 %v3748_v9, %v4846_v19 }
 0x444   :  { %3759 = vrsqrt.f32 %v1598_v40  ;;  %v1568_v54 = vmul.f32 0.0625, %v1520_v42  ;;  %3562 = vmatprep.mubr.msk.f32.mxu1 %vm1255_vm5, %v1755_v38  ;;  %v1517_v0 = vpop.xlane.xlu0 %1516  ;;  %v1725_v20 = vadd.f32 %v4961_v13, %v1689_v34  ;;  %v1655_v51 = vmul.f32 %v3750_v7, %v4850_v43 }
 0x445   :  { %3761 = vrsqrt.f32 %v1597_v18  ;;  %v1567_v16 = vmul.f32 0.0625, %v1517_v0  ;;  %3563 = vmatmul.mubr.msk.f32.gmra.mrb[32].mxu1 %vm1255_vm5, %v1756_v47  ;;  %v1692_v31 = vmul.f32 %v4957_v4, %v1656_v53  ;;  %v1758_v56 = vmax.f32 %v1726_v55, 0.0 }
 0x446   :  { %v3752_v59 = vpop.eup %3751  ;;  %v1600_v35 = vadd.f32 1e-05, %v1568_v54  ;;  %v1757_v22 = vmax.f32 %v1725_v20, 0.0  ;;  %v1691_v19 = vmul.f32 %v4957_v4, %v1655_v51 }
 0x447   :  { %v3754_v36 = vpop.eup %3753  ;;  %v1599_v15 = vadd.f32 1e-05, %v1567_v16  ;;  %v1526_v50 = vpop.xlane.xlu1 %1525  ;;  %v1728_v10 = vadd.f32 %v4961_v13, %v1692_v31  ;;  %v1658_v30 = vmul.f32 %v3752_v59, %v4858_v61 }
 0x448   :  { %3763 = vrsqrt.f32 %v1600_v35  ;;  %v1570_v43 = vmul.f32 0.0625, %v1526_v50  ;;  %3565 = vmatprep.mubr.msk.f32.mxu1 %vm1255_vm5, %v1757_v22  ;;  %v1523_v52 = vpop.xlane.xlu0 %1522  ;;  %v1727_v48 = vadd.f32 %v4961_v13, %v1691_v19  ;;  %v1657_v41 = vmul.f32 %v3754_v36, %v4862_v23 }
 0x449   :  { %3765 = vrsqrt.f32 %v1599_v15  ;;  %v1569_v26 = vmul.f32 0.0625, %v1523_v52  ;;  %3566 = vmatmul.mubr.msk.f32.gmra.mrb[34].mxu1 %vm1255_vm5, %v1758_v56  ;;  %v1694_v49 = vmul.f32 %v4957_v4, %v1658_v30  ;;  %v1760_v2 = vmax.f32 %v1728_v10, 0.0 }
 0x44a   :  { %v3756_v1 = vpop.eup %3755  ;;  %v1602_v33 = vadd.f32 1e-05, %v1570_v43  ;;  %v1759_v6 = vmax.f32 %v1727_v48, 0.0  ;;  %v1693_v61 = vmul.f32 %v4957_v4, %v1657_v41 }
 0x44b   :  { %v3758_v12 = vpop.eup %3757  ;;  %v1601_v44 = vadd.f32 1e-05, %v1569_v26  ;;  %v1532_v28 = vpop.xlane.xlu1 %1531  ;;  %v1730_v29 = vadd.f32 %v4961_v13, %v1694_v49  ;;  %v1660_v60 = vmul.f32 %v3756_v1, %v4870_v58 }
 0x44c   :  { %3767 = vrsqrt.f32 %v1602_v33  ;;  %v1572_v23 = vmul.f32 0.0625, %v1532_v28  ;;  %3568 = vmatprep.mubr.msk.f32.mxu1 %vm1255_vm5, %v1759_v6  ;;  %v1529_v3 = vpop.xlane.xlu0 %1528  ;;  %v1729_v27 = vadd.f32 %v4961_v13, %v1693_v61  ;;  %v1659_v9 = vmul.f32 %v3758_v12, %v4874_v62 }
 0x44d   :  { %3769 = vrsqrt.f32 %v1601_v44  ;;  %v1571_v40 = vmul.f32 0.0625, %v1529_v3  ;;  %3569 = vmatmul.mubr.msk.f32.gmra.mrb[36].mxu1 %vm1255_vm5, %v1760_v2  ;;  %v1696_v38 = vmul.f32 %v4957_v4, %v1660_v60  ;;  %v1762_v53 = vmax.f32 %v1730_v29, 0.0 }
 0x44e   :  { %v3760_v34 = vpop.eup %3759  ;;  %v1604_v7 = vadd.f32 1e-05, %v1572_v23  ;;  %v1761_v18 = vmax.f32 %v1729_v27, 0.0  ;;  %v1695_v58 = vmul.f32 %v4957_v4, %v1659_v9 }
 0x44f   :  { %v3762_v42 = vpop.eup %3761  ;;  %v1603_v47 = vadd.f32 1e-05, %v1571_v40  ;;  %v1538_v55 = vpop.xlane.xlu1 %1537  ;;  %v1732_v54 = vadd.f32 %v4961_v13, %v1696_v38  ;;  %v1662_v0 = vmul.f32 %v3760_v34, %v4882_v45 }
 0x450   :  { %3771 = vrsqrt.f32 %v1604_v7  ;;  %v1574_v62 = vmul.f32 0.0625, %v1538_v55  ;;  %3571 = vmatprep.mubr.msk.f32.mxu1 %vm1255_vm5, %v1761_v18  ;;  %v1535_v20 = vpop.xlane.xlu0 %1534  ;;  %v1731_v51 = vadd.f32 %v4961_v13, %v1695_v58  ;;  %v1661_v16 = vmul.f32 %v3762_v42, %v4886_v63 }
 0x451   :  { %3773 = vrsqrt.f32 %v1603_v47  ;;  %v1573_v31 = vmul.f32 0.0625, %v1535_v20  ;;  %3572 = vmatmul.mubr.msk.f32.gmra.mrb[38].mxu1 %vm1255_vm5, %v1762_v53  ;;  %v1698_v59 = vmul.f32 %v4957_v4, %v1662_v0  ;;  %v1764_v56 = vmax.f32 %v1732_v54, 0.0 }
 0x452   :  { %v3764_v35 = vpop.eup %3763  ;;  %v1606_v22 = vadd.f32 1e-05, %v1574_v62  ;;  %v1763_v19 = vmax.f32 %v1731_v51, 0.0  ;;  %v1697_v45 = vmul.f32 %v4957_v4, %v1661_v16 }
 0x453   :  { %v3766_v36 = vpop.eup %3765  ;;  %v1605_v15 = vadd.f32 1e-05, %v1573_v31  ;;  %v1544_v50 = vpop.xlane.xlu1 %1543  ;;  %v1734_v10 = vadd.f32 %v4961_v13, %v1698_v59  ;;  %v1664_v30 = vmul.f32 %v3764_v35, %v4894_v46 }
 0x454   :  { %3775 = vrsqrt.f32 %v1606_v22  ;;  %v1576_v63 = vmul.f32 0.0625, %v1544_v50  ;;  %3574 = vmatprep.mubr.msk.f32.mxu1 %vm1255_vm5, %v1763_v19  ;;  %v1541_v43 = vpop.xlane.xlu0 %1540  ;;  %v1733_v52 = vadd.f32 %v4961_v13, %v1697_v45  ;;  %v1663_v48 = vmul.f32 %v3766_v36, %v4898_v25 }
 0x455   :  { %3777 = vrsqrt.f32 %v1605_v15  ;;  %v1575_v41 = vmul.f32 0.0625, %v1541_v43  ;;  %3575 = vmatmul.mubr.msk.f32.gmra.mrb[40].mxu1 %vm1255_vm5, %v1764_v56  ;;  %v1700_v26 = vmul.f32 %v4957_v4, %v1664_v30  ;;  %v1766_v12 = vmax.f32 %v1734_v10, 0.0 }
 0x456   :  { %v3768_v49 = vpop.eup %3767  ;;  %v1608_v1 = vadd.f32 1e-05, %v1576_v63  ;;  %v1765_v33 = vmax.f32 %v1733_v52, 0.0  ;;  %v1699_v46 = vmul.f32 %v4957_v4, %v1663_v48 }
 0x457   :  { %v3770_v6 = vpop.eup %3769  ;;  %v1607_v61 = vadd.f32 1e-05, %v1575_v41  ;;  %v1736_v44 = vadd.f32 %v4961_v13, %v1700_v26  ;;  %v1666_v28 = vmul.f32 %v3768_v49, %v4906_v8 }
 0x458   :  { %3779 = vrsqrt.f32 %v1608_v1  ;;  %3577 = vmatprep.mubr.msk.f32.mxu1 %vm1255_vm5, %v1765_v33  ;;  %v1735_v25 = vadd.f32 %v4961_v13, %v1699_v46  ;;  %v1665_v2 = vmul.f32 %v3770_v6, %v4910_v39 }
 0x459   :  { %3781 = vrsqrt.f32 %v1607_v61  ;;  %3578 = vmatmul.mubr.msk.f32.gmra.mrb[42].mxu1 %vm1255_vm5, %v1766_v12  ;;  %v1702_v29 = vmul.f32 %v4957_v4, %v1666_v28  ;;  %v1768_v9 = vmax.f32 %v1736_v44, 0.0 }
 0x45a   :  { %v3772_v60 = vpop.eup %3771  ;;  %v1767_v23 = vmax.f32 %v1735_v25, 0.0  ;;  %v1701_v3 = vmul.f32 %v4957_v4, %v1665_v2 }
 0x45b   :  { %v3774_v27 = vpop.eup %3773  ;;  %v1738_v8 = vadd.f32 %v4961_v13, %v1702_v29  ;;  %v1668_v40 = vmul.f32 %v3772_v60, %v4918_v24 }
 0x45c   :  { %3580 = vmatprep.mubr.msk.f32.mxu1 %vm1255_vm5, %v1767_v23  ;;  %v1737_v38 = vadd.f32 %v4961_v13, %v1701_v3  ;;  %v1667_v39 = vmul.f32 %v3774_v27, %v4922_v57 }
 0x45d   :  { %3581 = vmatmul.mubr.msk.f32.gmra.mrb[44].mxu1 %vm1255_vm5, %v1768_v9  ;;  %v1704_v34 = vmul.f32 %v4957_v4, %v1668_v40  ;;  %v1770_v47 = vmax.f32 %v1738_v8, 0.0 }
 0x45e   :  { %v3776_v7 = vpop.eup %3775  ;;  %v1769_v18 = vmax.f32 %v1737_v38, 0.0  ;;  %v1703_v58 = vmul.f32 %v4957_v4, %v1667_v39 }
 0x45f   :  { %v3778_v42 = vpop.eup %3777  ;;  %v1740_v55 = vadd.f32 %v4961_v13, %v1704_v34  ;;  %v1670_v24 = vmul.f32 %v3776_v7, %v4930_v11 }
 0x460   :  { %3583 = vmatprep.mubr.msk.f32.mxu1 %vm1255_vm5, %v1769_v18  ;;  %v1739_v53 = vadd.f32 %v4961_v13, %v1703_v58  ;;  %v1669_v57 = vmul.f32 %v3778_v42, %v4934_v17 }
 0x461   :  { %3584 = vmatmul.mubr.msk.f32.gmra.mrb[46].mxu1 %vm1255_vm5, %v1770_v47  ;;  %v1706_v54 = vmul.f32 %v4957_v4, %v1670_v24  ;;  %v1772_v16 = vmax.f32 %v1740_v55, 0.0 }
 0x462   :  { %v3780_v0 = vpop.eup %3779  ;;  %v1771_v62 = vmax.f32 %v1739_v53, 0.0  ;;  %v1705_v20 = vmul.f32 %v4957_v4, %v1669_v57 }
 0x463   :  { %v3782_v51 = vpop.eup %3781  ;;  %v1742_v31 = vadd.f32 %v4961_v13, %v1706_v54  ;;  %v1672_v11 = vmul.f32 %v3780_v0, %v4942_v5 }
 0x464   :  { %3586 = vmatprep.mubr.msk.f32.mxu1 %vm1255_vm5, %v1771_v62  ;;  %v1741_v59 = vadd.f32 %v4961_v13, %v1705_v20  ;;  %v1671_v17 = vmul.f32 %v3782_v51, %v4946_v21  ;;  %v5094_v21 = vld [vmem:[%s5818_s6] sm:$0x7] }
 0x465   :  { %3587 = vmatmul.mubr.msk.f32.gmra.mrb[48].mxu1 %vm1255_vm5, %v1772_v16  ;;  %v1708_v35 = vmul.f32 %v4957_v4, %v1672_v11  ;;  %v1774_v45 = vmax.f32 %v1742_v31, 0.0 }
 0x466   :  { %v1773_v22 = vmax.f32 %v1741_v59, 0.0  ;;  %v1707_v19 = vmul.f32 %v4957_v4, %v1671_v17  ;;  %v5098_v4 = vrot.slane %v5094_v21, %v4080_v37 }
 0x467   :  { %v1744_v36 = vadd.f32 %v4961_v13, %v1708_v35 }
 0x468   :  { %3589 = vmatprep.mubr.msk.f32.mxu1 %vm1255_vm5, %v1773_v22  ;;  %v1743_v5 = vadd.f32 %v4961_v13, %v1707_v19 }
 0x469   :  { %3590 = vmatmul.mubr.msk.f32.gmra.mrb[50].mxu1 %vm1255_vm5, %v1774_v45  ;;  %v1776_v50 = vmax.f32 %v1744_v36, 0.0 }
 0x46a   :  { %v1775_v15 = vmax.f32 %v1743_v5, 0.0 }
 0x46c   :  { %3592 = vmatprep.mubr.msk.f32.mxu1 %vm1255_vm5, %v1775_v15 }
 0x46d   :  { %3593 = vmatmul.mubr.msk.f32.gmra.mrb[52].mxu1 %vm1255_vm5, %v1776_v50 }
 0x504   :  { %v3549_v56 = vpop.f32.mrb[22].mxu1 }
 0x505   :  { %v5101_v13 = vadd.f32 %v3549_v56, %v5098_v4  ;;  %v1945_v10 = vpop.f32.mrb[23].mxu1 }
 0x506   :  { %v5104_v30 = vadd.f32 %v1945_v10, %v5098_v4 }
 0x507   :  { %v2108_v63 = vsel %vm2104_vm6, %v5101_v13, 0.0 }
 0x508   :  { %2109 = vadd.xlane.f32.xlu1 %v2108_v63  ;;  %v3552_v43 = vpop.f32.mrb[24].mxu1  ;;  %v2105_v52 = vsel %vm2104_vm6, %v5104_v30, 0.0 }
 0x509   :  { %v5111_v48 = vadd.f32 %v3552_v43, %v5098_v4  ;;  %2106 = vadd.xlane.f32.xlu0 %v2105_v52  ;;  %v1955_v41 = vpop.f32.mrb[25].mxu1 }
 0x50a   :  { %v5114_v26 = vadd.f32 %v1955_v41, %v5098_v4 }
 0x50b   :  { %v2114_v49 = vsel %vm2104_vm6, %v5111_v48, 0.0 }
 0x50c   :  { %2115 = vadd.xlane.f32.xlu1 %v2114_v49  ;;  %v3555_v1 = vpop.f32.mrb[26].mxu1  ;;  %v2111_v33 = vsel %vm2104_vm6, %v5114_v26, 0.0 }
 0x50d   :  { %v5121_v46 = vadd.f32 %v3555_v1, %v5098_v4  ;;  %2112 = vadd.xlane.f32.xlu0 %v2111_v33  ;;  %v1965_v6 = vpop.f32.mrb[27].mxu1 }
 0x50e   :  { %v5124_v61 = vadd.f32 %v1965_v6, %v5098_v4 }
 0x50f   :  { %v2120_v12 = vsel %vm2104_vm6, %v5121_v46, 0.0 }
 0x510   :  { %2121 = vadd.xlane.f32.xlu1 %v2120_v12  ;;  %v3558_v44 = vpop.f32.mrb[28].mxu1  ;;  %v2117_v29 = vsel %vm2104_vm6, %v5124_v61, 0.0 }
 0x511   :  { %v5129_v28 = vadd.f32 %v3558_v44, %v5098_v4  ;;  %v1975_v25 = vpop.f32.mrb[29].mxu1 }
 0x512   :  { %v5132_v2 = vadd.f32 %v1975_v25, %v5098_v4 }
 0x513   :  { %v2126_v60 = vsel %vm2104_vm6, %v5129_v28, 0.0 }
 0x514   :  { %2118 = vadd.xlane.f32.xlu1 %v2117_v29  ;;  %2127 = vadd.xlane.f32.xlu0 %v2126_v60  ;;  %v3561_v23 = vpop.f32.mrb[30].mxu1  ;;  %v2123_v8 = vsel %vm2104_vm6, %v5132_v2, 0.0 }
 0x515   :  { %v5139_v3 = vadd.f32 %v3561_v23, %v5098_v4  ;;  %v1985_v27 = vpop.f32.mrb[31].mxu1 }
 0x516   :  { %v5142_v9 = vadd.f32 %v1985_v27, %v5098_v4 }
 0x517   :  { %v2132_v40 = vsel %vm2104_vm6, %v5139_v3, 0.0 }
 0x518   :  { %2124 = vadd.xlane.f32.xlu1 %v2123_v8  ;;  %2133 = vadd.xlane.f32.xlu0 %v2132_v40  ;;  %v3564_v38 = vpop.f32.mrb[32].mxu1  ;;  %v2129_v18 = vsel %vm2104_vm6, %v5142_v9, 0.0 }
 0x519   :  { %v5149_v39 = vadd.f32 %v3564_v38, %v5098_v4  ;;  %v1995_v34 = vpop.f32.mrb[33].mxu1 }
 0x51a   :  { %v5152_v7 = vadd.f32 %v1995_v34, %v5098_v4 }
 0x51b   :  { %v2138_v58 = vsel %vm2104_vm6, %v5149_v39, 0.0 }
 0x51c   :  { %2130 = vadd.xlane.f32.xlu1 %v2129_v18  ;;  %2139 = vadd.xlane.f32.xlu0 %v2138_v58  ;;  %v3567_v42 = vpop.f32.mrb[34].mxu1  ;;  %v2135_v24 = vsel %vm2104_vm6, %v5152_v7, 0.0 }
 0x51d   :  { %v2005_v47 = vpop.f32.mrb[35].mxu1  ;;  %v5159_v55 = vadd.f32 %v3567_v42, %v5098_v4 }
 0x51e   :  { %v5167_v0 = vadd.f32 %v2005_v47, %v5098_v4 }
 0x51f   :  { %v2144_v62 = vsel %vm2104_vm6, %v5159_v55, 0.0 }
 0x520   :  { %2136 = vadd.xlane.f32.xlu0 %v2135_v24  ;;  %v3570_v53 = vpop.f32.mrb[36].mxu1  ;;  %v2141_v59 = vsel %vm2104_vm6, %v5167_v0, 0.0 }
 0x521   :  { %v2015_v57 = vpop.f32.mrb[37].mxu1  ;;  %v5177_v11 = vadd.f32 %v3570_v53, %v5098_v4 }
 0x522   :  { %v5164_v54 = vadd.f32 %v2015_v57, %v5098_v4 }
 0x523   :  { %v2150_v36 = vsel %vm2104_vm6, %v5177_v11, 0.0 }
 0x524   :  { %2145 = vadd.xlane.f32.xlu0 %v2144_v62  ;;  %v3573_v20 = vpop.f32.mrb[38].mxu1  ;;  %v2147_v51 = vsel %vm2104_vm6, %v5164_v54, 0.0 }
 0x525   :  { %2148 = vadd.xlane.f32.xlu1 %v2147_v51  ;;  %v2025_v16 = vpop.f32.mrb[39].mxu1  ;;  %v5187_v45 = vadd.f32 %v3573_v20, %v5098_v4 }
 0x526   :  { %v5174_v31 = vadd.f32 %v2025_v16, %v5098_v4 }
 0x527   :  { %v2156_v63 = vsel %vm2104_vm6, %v5187_v45, 0.0 }
 0x528   :  { %2142 = vadd.xlane.f32.xlu0 %v2141_v59  ;;  %v3576_v17 = vpop.f32.mrb[40].mxu1  ;;  %v2153_v35 = vsel %vm2104_vm6, %v5174_v31, 0.0 }
 0x529   :  { %2154 = vadd.xlane.f32.xlu1 %v2153_v35  ;;  %v2035_v22 = vpop.f32.mrb[41].mxu1  ;;  %v5197_v10 = vadd.f32 %v3576_v17, %v5098_v4 }
 0x52a   :  { %v5184_v19 = vadd.f32 %v2035_v22, %v5098_v4 }
 0x52b   :  { %v2162_v1 = vsel %vm2104_vm6, %v5197_v10, 0.0 }
 0x52c   :  { %2151 = vadd.xlane.f32.xlu0 %v2150_v36  ;;  %v3579_v5 = vpop.f32.mrb[42].mxu1  ;;  %v2159_v15 = vsel %vm2104_vm6, %v5184_v19, 0.0 }
 0x52d   :  { %v5194_v50 = vadd.f32 %v3579_v5, %v5098_v4  ;;  %2160 = vadd.xlane.f32.xlu1 %v2159_v15  ;;  %v2045_v56 = vpop.f32.mrb[43].mxu1 }
 0x52e   :  { %v5204_v52 = vadd.f32 %v2045_v56, %v5098_v4 }
 0x52f   :  { %v2168_v43 = vsel %vm2104_vm6, %v5194_v50, 0.0 }
 0x530   :  { %2157 = vadd.xlane.f32.xlu0 %v2156_v63  ;;  %v3582_v41 = vpop.f32.mrb[44].mxu1  ;;  %v2165_v12 = vsel %vm2104_vm6, %v5204_v52, 0.0 }
 0x531   :  { %2169 = vadd.xlane.f32.xlu1 %v2168_v43  ;;  %v2055_v49 = vpop.f32.mrb[45].mxu1  ;;  %v5239_v53 = vadd.f32 %v3582_v41, %v5098_v4 }
 0x532   :  { %v5209_v33 = vadd.f32 %v2055_v49, %v5098_v4 }
 0x533   :  { %v2174_v17 = vsel %vm2104_vm6, %v5239_v53, 0.0 }
 0x534   :  { %2163 = vadd.xlane.f32.xlu0 %v2162_v1  ;;  %v3585_v6 = vpop.f32.mrb[46].mxu1  ;;  %v2171_v23 = vsel %vm2104_vm6, %v5209_v33, 0.0 }
 0x535   :  { %2166 = vadd.xlane.f32.xlu1 %v2165_v12  ;;  %v2065_v44 = vpop.f32.mrb[47].mxu1  ;;  %v5217_v29 = vadd.f32 %v3585_v6, %v5098_v4 }
 0x536   :  { %v5214_v25 = vadd.f32 %v2065_v44, %v5098_v4 }
 0x537   :  { %v2180_v58 = vsel %vm2104_vm6, %v5217_v29, 0.0 }
 0x538   :  { %v3588_v60 = vpop.f32.mrb[48].mxu1  ;;  %v2177_v27 = vsel %vm2104_vm6, %v5214_v25, 0.0 }
 0x539   :  { %v5224_v8 = vadd.f32 %v3588_v60, %v5098_v4  ;;  %2172 = vadd.xlane.f32.xlu1 %v2171_v23  ;;  %2178 = vadd.xlane.f32.xlu0 %v2177_v27  ;;  %v2075_v40 = vpop.f32.mrb[49].mxu1 }
 0x53a   :  { %v5229_v34 = vadd.f32 %v2075_v40, %v5098_v4 }
 0x53b   :  { %v2186_v38 = vsel %vm2104_vm6, %v5224_v8, 0.0 }
 0x53c   :  { %v3591_v18 = vpop.f32.mrb[50].mxu1  ;;  %v2183_v20 = vsel %vm2104_vm6, %v5229_v34, 0.0 }
 0x53d   :  { %v5234_v42 = vadd.f32 %v3591_v18, %v5098_v4  ;;  %2181 = vadd.xlane.f32.xlu1 %v2180_v58  ;;  %2187 = vadd.xlane.f32.xlu0 %v2186_v38  ;;  %v2085_v47 = vpop.f32.mrb[51].mxu1 }
 0x53e   :  { %v5242_v57 = vadd.f32 %v2085_v47, %v5098_v4 }
 0x53f   :  { %v2192_v24 = vsel %vm2104_vm6, %v5234_v42, 0.0 }
 0x540   :  { %v3594_v62 = vpop.f32.mrb[52].mxu1  ;;  %v2189_v35 = vsel %vm2104_vm6, %v5242_v57, 0.0 }
 0x541   :  { %v5247_v51 = vadd.f32 %v3594_v62, %v5098_v4  ;;  %2184 = vadd.xlane.f32.xlu1 %v2183_v20  ;;  %2193 = vadd.xlane.f32.xlu0 %v2192_v24  ;;  %v2095_v16 = vpop.f32.mrb[53].mxu1 }
 0x542   :  { %v5250_v59 = vadd.f32 %v2095_v16, %v5098_v4 }
 0x543   :  { %v2198_v22 = vsel %vm2104_vm6, %v5247_v51, 0.0 }
 0x544   :  { %v2195_v36 = vsel %vm2104_vm6, %v5250_v59, 0.0 }
 0x545   :  { %2175 = vadd.xlane.f32.xlu1 %v2174_v17  ;;  %2190 = vadd.xlane.f32.xlu0 %v2189_v35 }
 0x549   :  { %2199 = vadd.xlane.f32.xlu1 %v2198_v22  ;;  %2196 = vadd.xlane.f32.xlu0 %v2195_v36 }
 0x595   :  { %v2110_v5 = vpop.xlane.xlu1 %2109 }
 0x596   :  { %v2203_v15 = vmul.f32 0.03125, %v2110_v5  ;;  %v2107_v4 = vpop.xlane.xlu0 %2106 }
 0x597   :  { %v2202_v56 = vmul.f32 0.03125, %v2107_v4 }
 0x598   :  { %v5261_v63 = vsub.f32 %v5101_v13, %v2203_v15 }
 0x599   :  { %v5264_v43 = vsub.f32 %v5104_v30, %v2202_v56  ;;  %v2116_v41 = vpop.xlane.xlu1 %2115 }
 0x59a   :  { %v2205_v49 = vmul.f32 0.03125, %v2116_v41  ;;  %v2113_v1 = vpop.xlane.xlu0 %2112  ;;  %v2267_v6 = vmul.f32 %v5261_v63, %v5261_v63 }
 0x59b   :  { %v2204_v12 = vmul.f32 0.03125, %v2113_v1  ;;  %v2266_v44 = vmul.f32 %v5264_v43, %v5264_v43 }
 0x59c   :  { %v5271_v60 = vsub.f32 %v5111_v48, %v2205_v49  ;;  %v2301_v23 = vsel %vm2104_vm6, %v2267_v6, 0.0 }
 0x59d   :  { %v5275_v13 = vsub.f32 %v5114_v26, %v2204_v12  ;;  %v2122_v30 = vpop.xlane.xlu1 %2121  ;;  %2302 = vadd.xlane.f32.xlu1 %v2301_v23  ;;  %v2298_v27 = vsel %vm2104_vm6, %v2266_v44, 0.0 }
 0x59e   :  { %v2207_v40 = vmul.f32 0.03125, %v2122_v30  ;;  %2299 = vadd.xlane.f32.xlu0 %v2298_v27  ;;  %v2269_v38 = vmul.f32 %v5271_v60, %v5271_v60 }
 0x59f   :  { %v2268_v18 = vmul.f32 %v5275_v13, %v5275_v13 }
 0x5a0   :  { %v5283_v48 = vsub.f32 %v5121_v46, %v2207_v40  ;;  %v2307_v58 = vsel %vm2104_vm6, %v2269_v38, 0.0 }
 0x5a1   :  { %v2119_v47 = vpop.xlane.xlu1 %2118  ;;  %2308 = vadd.xlane.f32.xlu1 %v2307_v58  ;;  %v2128_v26 = vpop.xlane.xlu0 %2127  ;;  %v2304_v24 = vsel %vm2104_vm6, %v2268_v18, 0.0 }
 0x5a2   :  { %v2206_v62 = vmul.f32 0.03125, %v2119_v47  ;;  %v2209_v20 = vmul.f32 0.03125, %v2128_v26  ;;  %2305 = vadd.xlane.f32.xlu0 %v2304_v24  ;;  %v2271_v16 = vmul.f32 %v5283_v48, %v5283_v48 }
 0x5a4   :  { %v5290_v17 = vsub.f32 %v5124_v61, %v2206_v62  ;;  %v5293_v35 = vsub.f32 %v5129_v28, %v2209_v20  ;;  %v2313_v46 = vsel %vm2104_vm6, %v2271_v16, 0.0 }
 0x5a5   :  { %v2125_v22 = vpop.xlane.xlu1 %2124  ;;  %2314 = vadd.xlane.f32.xlu1 %v2313_v46  ;;  %v2134_v36 = vpop.xlane.xlu0 %2133 }
 0x5a6   :  { %v2208_v5 = vmul.f32 0.03125, %v2125_v22  ;;  %v2211_v15 = vmul.f32 0.03125, %v2134_v36  ;;  %v2270_v4 = vmul.f32 %v5290_v17, %v5290_v17  ;;  %v2273_v56 = vmul.f32 %v5293_v35, %v5293_v35 }
 0x5a8   :  { %v5301_v41 = vsub.f32 %v5132_v2, %v2208_v5  ;;  %v5304_v61 = vsub.f32 %v5139_v3, %v2211_v15  ;;  %v2310_v28 = vsel %vm2104_vm6, %v2270_v4, 0.0  ;;  %v2319_v49 = vsel %vm2104_vm6, %v2273_v56, 0.0 }
 0x5a9   :  { %v2131_v1 = vpop.xlane.xlu1 %2130  ;;  %2311 = vadd.xlane.f32.xlu1 %v2310_v28  ;;  %2320 = vadd.xlane.f32.xlu0 %v2319_v49  ;;  %v2140_v6 = vpop.xlane.xlu0 %2139 }
 0x5aa   :  { %v2210_v12 = vmul.f32 0.03125, %v2131_v1  ;;  %v2213_v44 = vmul.f32 0.03125, %v2140_v6  ;;  %v2272_v23 = vmul.f32 %v5301_v41, %v5301_v41  ;;  %v2275_v2 = vmul.f32 %v5304_v61, %v5304_v61 }
 0x5ac   :  { %v5313_v30 = vsub.f32 %v5142_v9, %v2210_v12  ;;  %v5316_v3 = vsub.f32 %v5149_v39, %v2213_v44  ;;  %v2316_v27 = vsel %vm2104_vm6, %v2272_v23, 0.0  ;;  %v2325_v40 = vsel %vm2104_vm6, %v2275_v2, 0.0 }
 0x5ad   :  { %2317 = vadd.xlane.f32.xlu1 %v2316_v27  ;;  %2326 = vadd.xlane.f32.xlu0 %v2325_v40  ;;  %v2137_v38 = vpop.xlane.xlu0 %2136 }
 0x5ae   :  { %v2212_v18 = vmul.f32 0.03125, %v2137_v38  ;;  %v2274_v58 = vmul.f32 %v5313_v30, %v5313_v30  ;;  %v2277_v47 = vmul.f32 %v5316_v3, %v5316_v3 }
 0x5b0   :  { %v5325_v9 = vsub.f32 %v5152_v7, %v2212_v18  ;;  %v2322_v39 = vsel %vm2104_vm6, %v2274_v58, 0.0  ;;  %v2331_v26 = vsel %vm2104_vm6, %v2277_v47, 0.0 }
 0x5b1   :  { %2323 = vadd.xlane.f32.xlu1 %v2322_v39  ;;  %2332 = vadd.xlane.f32.xlu0 %v2331_v26  ;;  %v2146_v24 = vpop.xlane.xlu0 %2145 }
 0x5b2   :  { %v2215_v62 = vmul.f32 0.03125, %v2146_v24  ;;  %v2149_v20 = vpop.xlane.xlu1 %2148  ;;  %v2276_v16 = vmul.f32 %v5325_v9, %v5325_v9 }
 0x5b3   :  { %v2216_v46 = vmul.f32 0.03125, %v2149_v20 }
 0x5b4   :  { %v5332_v22 = vsub.f32 %v5159_v55, %v2215_v62  ;;  %v2328_v36 = vsel %vm2104_vm6, %v2276_v16, 0.0 }
 0x5b5   :  { %v5336_v7 = vsub.f32 %v5164_v54, %v2216_v46  ;;  %2329 = vadd.xlane.f32.xlu0 %v2328_v36  ;;  %v2143_v5 = vpop.xlane.xlu0 %2142 }
 0x5b6   :  { %v2214_v15 = vmul.f32 0.03125, %v2143_v5  ;;  %v2155_v4 = vpop.xlane.xlu1 %2154  ;;  %v2279_v56 = vmul.f32 %v5332_v22, %v5332_v22 }
 0x5b7   :  { %v2218_v28 = vmul.f32 0.03125, %v2155_v4  ;;  %v2280_v49 = vmul.f32 %v5336_v7, %v5336_v7 }
 0x5b8   :  { %v5343_v1 = vsub.f32 %v5167_v0, %v2214_v15  ;;  %v2337_v55 = vsel %vm2104_vm6, %v2279_v56, 0.0 }
 0x5b9   :  { %v5347_v6 = vsub.f32 %v5174_v31, %v2218_v28  ;;  %2338 = vadd.xlane.f32.xlu0 %v2337_v55  ;;  %v2152_v54 = vpop.xlane.xlu0 %2151  ;;  %v2340_v12 = vsel %vm2104_vm6, %v2280_v49, 0.0 }
 0x5ba   :  { %v2217_v44 = vmul.f32 0.03125, %v2152_v54  ;;  %v2161_v23 = vpop.xlane.xlu1 %2160  ;;  %2341 = vadd.xlane.f32.xlu1 %v2340_v12  ;;  %v2278_v2 = vmul.f32 %v5343_v1, %v5343_v1 }
 0x5bb   :  { %v2220_v27 = vmul.f32 0.03125, %v2161_v23  ;;  %v2282_v0 = vmul.f32 %v5347_v6, %v5347_v6 }
 0x5bc   :  { %v5355_v40 = vsub.f32 %v5177_v11, %v2217_v44  ;;  %v2334_v31 = vsel %vm2104_vm6, %v2278_v2, 0.0 }
 0x5bd   :  { %v5359_v38 = vsub.f32 %v5184_v19, %v2220_v27  ;;  %2335 = vadd.xlane.f32.xlu0 %v2334_v31  ;;  %v2158_v18 = vpop.xlane.xlu0 %2157  ;;  %v2346_v58 = vsel %vm2104_vm6, %v2282_v0, 0.0 }
 0x5be   :  { %v2219_v47 = vmul.f32 0.03125, %v2158_v18  ;;  %v2170_v39 = vpop.xlane.xlu1 %2169  ;;  %2347 = vadd.xlane.f32.xlu1 %v2346_v58  ;;  %v2281_v26 = vmul.f32 %v5355_v40, %v5355_v40 }
 0x5bf   :  { %v2223_v24 = vmul.f32 0.03125, %v2170_v39  ;;  %v2284_v11 = vmul.f32 %v5359_v38, %v5359_v38 }
 0x5c0   :  { %v5367_v62 = vsub.f32 %v5187_v45, %v2219_v47  ;;  %v2343_v19 = vsel %vm2104_vm6, %v2281_v26, 0.0 }
 0x5c1   :  { %v5371_v20 = vsub.f32 %v5194_v50, %v2223_v24  ;;  %2344 = vadd.xlane.f32.xlu0 %v2343_v19  ;;  %v2164_v16 = vpop.xlane.xlu0 %2163  ;;  %v2352_v46 = vsel %vm2104_vm6, %v2284_v11, 0.0 }
 0x5c2   :  { %v2221_v36 = vmul.f32 0.03125, %v2164_v16  ;;  %v2167_v5 = vpop.xlane.xlu1 %2166  ;;  %2353 = vadd.xlane.f32.xlu1 %v2352_v46  ;;  %v2283_v15 = vmul.f32 %v5367_v62, %v5367_v62 }
 0x5c3   :  { %v2222_v4 = vmul.f32 0.03125, %v2167_v5  ;;  %v2287_v45 = vmul.f32 %v5371_v20, %v5371_v20 }
 0x5c4   :  { %v5379_v56 = vsub.f32 %v5197_v10, %v2221_v36  ;;  %v2349_v50 = vsel %vm2104_vm6, %v2283_v15, 0.0 }
 0x5c5   :  { %v5383_v28 = vsub.f32 %v5204_v52, %v2222_v4  ;;  %2350 = vadd.xlane.f32.xlu0 %v2349_v50  ;;  %v2361_v49 = vsel %vm2104_vm6, %v2287_v45, 0.0 }
 0x5c6   :  { %v2173_v55 = vpop.xlane.xlu1 %2172  ;;  %2362 = vadd.xlane.f32.xlu1 %v2361_v49  ;;  %v2179_v54 = vpop.xlane.xlu0 %2178  ;;  %v2285_v12 = vmul.f32 %v5379_v56, %v5379_v56 }
 0x5c7   :  { %v2224_v44 = vmul.f32 0.03125, %v2173_v55  ;;  %v2226_v23 = vmul.f32 0.03125, %v2179_v54  ;;  %v2286_v10 = vmul.f32 %v5383_v28, %v5383_v28 }
 0x5c8   :  { %v2355_v2 = vsel %vm2104_vm6, %v2285_v12, 0.0 }
 0x5c9   :  { %v5392_v27 = vsub.f32 %v5209_v33, %v2224_v44  ;;  %v5395_v52 = vsub.f32 %v5214_v25, %v2226_v23  ;;  %2356 = vadd.xlane.f32.xlu0 %v2355_v2  ;;  %v2358_v0 = vsel %vm2104_vm6, %v2286_v10, 0.0 }
 0x5ca   :  { %v2182_v31 = vpop.xlane.xlu1 %2181  ;;  %2359 = vadd.xlane.f32.xlu1 %v2358_v0  ;;  %v2188_v18 = vpop.xlane.xlu0 %2187 }
 0x5cb   :  { %v2227_v58 = vmul.f32 0.03125, %v2182_v31  ;;  %v2229_v47 = vmul.f32 0.03125, %v2188_v18  ;;  %v2288_v39 = vmul.f32 %v5392_v27, %v5392_v27  ;;  %v2290_v26 = vmul.f32 %v5395_v52, %v5395_v52 }
 0x5cd   :  { %v5403_v33 = vsub.f32 %v5217_v29, %v2227_v58  ;;  %v5406_v25 = vsub.f32 %v5224_v8, %v2229_v47  ;;  %v2364_v24 = vsel %vm2104_vm6, %v2288_v39, 0.0  ;;  %v2370_v11 = vsel %vm2104_vm6, %v2290_v26, 0.0 }
 0x5ce   :  { %v2185_v19 = vpop.xlane.xlu1 %2184  ;;  %2365 = vadd.xlane.f32.xlu1 %v2364_v24  ;;  %2371 = vadd.xlane.f32.xlu0 %v2370_v11  ;;  %v2194_v16 = vpop.xlane.xlu0 %2193 }
 0x5cf   :  { %v2228_v46 = vmul.f32 0.03125, %v2185_v19  ;;  %v2231_v36 = vmul.f32 0.03125, %v2194_v16  ;;  %v2291_v5 = vmul.f32 %v5403_v33, %v5403_v33  ;;  %v2293_v29 = vmul.f32 %v5406_v25, %v5406_v25  ;;  %v2851_v16 = vld [vmem:[%s5819_s7 + $0x8] sm:$0xff] }
 0x5d1   :  { %v5415_v15 = vsub.f32 %v5229_v34, %v2228_v46  ;;  %v5418_v8 = vsub.f32 %v5234_v42, %v2231_v36  ;;  %v2373_v4 = vsel %vm2104_vm6, %v2291_v5, 0.0  ;;  %v2379_v45 = vsel %vm2104_vm6, %v2293_v29, 0.0  ;;  %v2852_v36 = vld [vmem:[%s5819_s7 + $0x10] sm:$0xff]  ;;  %v2853_v5 = vld [vmem:[%s5819_s7 + $0x18] sm:$0xff] }
 0x5d2   :  { %v2176_v50 = vpop.xlane.xlu1 %2175  ;;  %2374 = vadd.xlane.f32.xlu1 %v2373_v4  ;;  %2380 = vadd.xlane.f32.xlu0 %v2379_v45  ;;  %v2191_v49 = vpop.xlane.xlu0 %2190  ;;  %v3637_v29 = vpack.c.bf16 %v2853_v5, %v2852_v36 }
 0x5d3   :  { %v2225_v55 = vmul.f32 0.03125, %v2176_v50  ;;  %v2230_v54 = vmul.f32 0.03125, %v2191_v49  ;;  %v2292_v12 = vmul.f32 %v5415_v15, %v5415_v15  ;;  %v2295_v34 = vmul.f32 %v5418_v8, %v5418_v8 }
 0x5d5   :  { %v5427_v44 = vsub.f32 %v5239_v53, %v2225_v55  ;;  %v5430_v42 = vsub.f32 %v5242_v57, %v2230_v54  ;;  %v2376_v23 = vsel %vm2104_vm6, %v2292_v12, 0.0  ;;  %v2385_v10 = vsel %vm2104_vm6, %v2295_v34, 0.0 }
 0x5d6   :  { %2377 = vadd.xlane.f32.xlu1 %v2376_v23  ;;  %v2200_v2 = vpop.xlane.xlu1 %2199  ;;  %2386 = vadd.xlane.f32.xlu0 %v2385_v10  ;;  %v2197_v0 = vpop.xlane.xlu0 %2196 }
 0x5d7   :  { %v2233_v31 = vmul.f32 0.03125, %v2200_v2  ;;  %v2232_v18 = vmul.f32 0.03125, %v2197_v0  ;;  %v2289_v58 = vmul.f32 %v5427_v44, %v5427_v44  ;;  %v2294_v53 = vmul.f32 %v5430_v42, %v5430_v42 }
 0x5d9   :  { %v5439_v47 = vsub.f32 %v5247_v51, %v2233_v31  ;;  %v5442_v57 = vsub.f32 %v5250_v59, %v2232_v18  ;;  %v2367_v39 = vsel %vm2104_vm6, %v2289_v58, 0.0  ;;  %v2382_v26 = vsel %vm2104_vm6, %v2294_v53, 0.0  ;;  %v2850_v59 = vld [vmem:[%s5819_s7] sm:$0xff] }
 0x5da   :  { %2368 = vadd.xlane.f32.xlu1 %v2367_v39  ;;  %2383 = vadd.xlane.f32.xlu0 %v2382_v26  ;;  %v3633_v46 = vpack.c.bf16 %v2851_v16, %v2850_v59 }
 0x5db   :  { %v2297_v24 = vmul.f32 %v5439_v47, %v5439_v47  ;;  %v2296_v11 = vmul.f32 %v5442_v57, %v5442_v57 }
 0x5dc   :  { %3634 = vmatprep.subr.bf16.mxu0 %v3633_v46 }
 0x5dd   :  { %v2391_v19 = vsel %vm2104_vm6, %v2297_v24, 0.0  ;;  %v2388_v51 = vsel %vm2104_vm6, %v2296_v11, 0.0  ;;  %3636 = vmatpush3.bf16.msra.mxu0 %v3633_v46  ;;  %v5466_v11 = vrot.slane %v5094_v21, %v4447_v32  ;;  %v5470_v46 = vrot.slane %v5094_v21, %v4450_v14 }
 0x5de   :  { %2392 = vadd.xlane.f32.xlu1 %v2391_v19  ;;  %2389 = vadd.xlane.f32.xlu0 %v2388_v51 }
 0x5df   :  { %3638 = vmatprep.subr.bf16.mxu0 %v3637_v29 }
 0x5e1   :  { %3640 = vmatpush3.bf16.msra.mxu0 %v3637_v29 }
 0x62a   :  { %v2303_v4 = vpop.xlane.xlu1 %2302 }
 0x62b   :  { %v2395_v45 = vmul.f32 0.03125, %v2303_v4  ;;  %v2300_v50 = vpop.xlane.xlu0 %2299 }
 0x62c   :  { %v2394_v49 = vmul.f32 0.03125, %v2300_v50 }
 0x62d   :  { %v2427_v55 = vadd.f32 1e-05, %v2395_v45 }
 0x62e   :  { %v2426_v54 = vadd.f32 1e-05, %v2394_v49  ;;  %v2309_v12 = vpop.xlane.xlu1 %2308 }
 0x62f   :  { %3783 = vrsqrt.f32 %v2427_v55  ;;  %v2397_v34 = vmul.f32 0.03125, %v2309_v12  ;;  %v2306_v23 = vpop.xlane.xlu0 %2305 }
 0x630   :  { %3785 = vrsqrt.f32 %v2426_v54  ;;  %v2396_v10 = vmul.f32 0.03125, %v2306_v23 }
 0x631   :  { %v2429_v2 = vadd.f32 1e-05, %v2397_v34 }
 0x632   :  { %v2428_v0 = vadd.f32 1e-05, %v2396_v10  ;;  %v2315_v31 = vpop.xlane.xlu1 %2314 }
 0x633   :  { %3787 = vrsqrt.f32 %v2429_v2  ;;  %v2399_v18 = vmul.f32 0.03125, %v2315_v31 }
 0x634   :  { %3789 = vrsqrt.f32 %v2428_v0 }
 0x635   :  { %v2431_v58 = vadd.f32 1e-05, %v2399_v18 }
 0x636   :  { %v2312_v53 = vpop.xlane.xlu1 %2311  ;;  %v2321_v39 = vpop.xlane.xlu0 %2320 }
 0x637   :  { %3791 = vrsqrt.f32 %v2431_v58  ;;  %v2398_v26 = vmul.f32 0.03125, %v2312_v53  ;;  %v2401_v24 = vmul.f32 0.03125, %v2321_v39 }
 0x639   :  { %v3784_v19 = vpop.eup %3783  ;;  %v2430_v51 = vadd.f32 1e-05, %v2398_v26  ;;  %v2433_v59 = vadd.f32 1e-05, %v2401_v24 }
 0x63a   :  { %v3786_v16 = vpop.eup %3785  ;;  %v2491_v36 = vmul.f32 %v3784_v19, %v5261_v63  ;;  %v2318_v5 = vpop.xlane.xlu1 %2317 }
 0x63b   :  { %v2327_v29 = vpop.xlane.xlu0 %2326  ;;  %v2490_v4 = vmul.f32 %v3786_v16, %v5264_v43  ;;  %3793 = vrsqrt.f32 %v2430_v51  ;;  %v2400_v45 = vmul.f32 0.03125, %v2318_v5 }
 0x63c   :  { %v2403_v50 = vmul.f32 0.03125, %v2327_v29  ;;  %v2527_v49 = vmul.f32 %v5466_v11, %v2491_v36  ;;  %3795 = vrsqrt.f32 %v2433_v59 }
 0x63d   :  { %v3788_v55 = vpop.eup %3787  ;;  %v2526_v54 = vmul.f32 %v5466_v11, %v2490_v4  ;;  %v2432_v12 = vadd.f32 1e-05, %v2400_v45 }
 0x63e   :  { %v2435_v34 = vadd.f32 1e-05, %v2403_v50  ;;  %v3790_v23 = vpop.eup %3789  ;;  %v2563_v21 = vadd.f32 %v5470_v46, %v2527_v49  ;;  %v2493_v63 = vmul.f32 %v3788_v55, %v5271_v60  ;;  %v2324_v10 = vpop.xlane.xlu1 %2323 }
 0x63f   :  { %v2333_v2 = vpop.xlane.xlu0 %2332  ;;  %v2562_v43 = vadd.f32 %v5470_v46, %v2526_v54  ;;  %v2492_v0 = vmul.f32 %v3790_v23, %v5275_v13  ;;  %3797 = vrsqrt.f32 %v2432_v12  ;;  %v2402_v31 = vmul.f32 0.03125, %v2324_v10 }
 0x640   :  { %v2601_v18 = vsel %vm2104_vm6, %v2563_v21, 0.0  ;;  %v2529_v58 = vmul.f32 %v5466_v11, %v2493_v63  ;;  %3799 = vrsqrt.f32 %v2435_v34  ;;  %v2405_v53 = vmul.f32 0.03125, %v2333_v2 }
 0x641   :  { %v3792_v39 = vpop.eup %3791  ;;  %v2602_v26 = vrot.slane %v2601_v18, 4  ;;  %v2594_v24 = vsel %vm2104_vm6, %v2562_v43, 0.0  ;;  %v2528_v60 = vmul.f32 %v5466_v11, %v2492_v0  ;;  %v2434_v19 = vadd.f32 1e-05, %v2402_v31 }
 0x642   :  { %v2595_v51 = vrot.slane %v2594_v24, 4  ;;  %v2565_v59 = vadd.f32 %v5470_v46, %v2529_v58  ;;  %v2495_v13 = vmul.f32 %v3792_v39, %v5283_v48  ;;  %v2437_v16 = vadd.f32 1e-05, %v2405_v53 }
 0x643   :  { %v2330_v36 = vpop.xlane.xlu0 %2329  ;;  %v2603_v5 = vadd.f32 %v2602_v26, %v2601_v18  ;;  %v2564_v29 = vadd.f32 %v5470_v46, %v2528_v60  ;;  %3801 = vrsqrt.f32 %v2434_v19 }
 0x644   :  { %v2404_v4 = vmul.f32 0.03125, %v2330_v36  ;;  %v2596_v45 = vadd.f32 %v2595_v51, %v2594_v24  ;;  %v2615_v50 = vsel %vm2104_vm6, %v2565_v59, 0.0  ;;  %v2531_v49 = vmul.f32 %v5466_v11, %v2495_v13 }
 0x645   :  { %3803 = vrsqrt.f32 %v2437_v16  ;;  %v3794_v55 = vpop.eup %3793  ;;  %v2604_v54 = vrot.slane %v2603_v5, 2  ;;  %v2616_v12 = vrot.slane %v2615_v50, 4  ;;  %v2608_v34 = vsel %vm2104_vm6, %v2564_v29, 0.0 }
 0x646   :  { %v2436_v23 = vadd.f32 1e-05, %v2404_v4  ;;  %v3796_v48 = vpop.eup %3795  ;;  %v2597_v21 = vrot.slane %v2596_v45, 2  ;;  %v2609_v63 = vrot.slane %v2608_v34, 4  ;;  %v5491_v10 = vadd.f32 %v5470_v46, %v2531_v49 }
 0x647   :  { %v2494_v2 = vmul.f32 %v3794_v55, %v5290_v17  ;;  %v2339_v43 = vpop.xlane.xlu0 %2338  ;;  %v5494_v0 = vadd.f32 %v2604_v54, %v2603_v5  ;;  %v5496_v31 = vadd.f32 %v2616_v12, %v2615_v50  ;;  %v2497_v18 = vmul.f32 %v3796_v48, %v5293_v35  ;;  %v2342_v58 = vpop.xlane.xlu1 %2341 }
 0x648   :  { %3805 = vrsqrt.f32 %v2436_v23  ;;  %v2598_v53 = vadd.f32 %v2597_v21, %v2596_v45  ;;  %v2610_v39 = vadd.f32 %v2609_v63, %v2608_v34  ;;  %v2407_v24 = vmul.f32 0.03125, %v2339_v43 }
 0x649   :  { %v2530_v26 = vmul.f32 %v5466_v11, %v2494_v2  ;;  %v3798_v60 = vpop.eup %3797  ;;  %v2606_v19 = vrot.slane %v5494_v0, 1  ;;  %v2533_v51 = vmul.f32 %v5466_v11, %v2497_v18  ;;  %v2408_v17 = vmul.f32 0.03125, %v2342_v58 }
 0x64a   :  { %v2618_v59 = vrot.slane %v5496_v31, 2  ;;  %v3800_v13 = vpop.eup %3799  ;;  %v2599_v16 = vrot.slane %v2598_v53, 1  ;;  %v2611_v36 = vrot.slane %v2610_v39, 2  ;;  %v2496_v5 = vmul.f32 %v3798_v60, %v5301_v41 }
 0x64b   :  { %v2566_v35 = vadd.f32 %v5470_v46, %v2530_v26  ;;  %v2336_v29 = vpop.xlane.xlu0 %2335  ;;  %v2499_v4 = vmul.f32 %v3800_v13, %v5304_v61  ;;  %v2439_v45 = vadd.f32 1e-05, %v2407_v24  ;;  %v2440_v50 = vadd.f32 1e-05, %v2408_v17  ;;  %v2348_v55 = vpop.xlane.xlu1 %2347 }
 0x64c   :  { %v2406_v49 = vmul.f32 0.03125, %v2336_v29  ;;  %v5506_v54 = vadd.f32 %v2611_v36, %v2610_v39  ;;  %v2532_v34 = vmul.f32 %v5466_v11, %v2496_v5  ;;  %v2410_v23 = vmul.f32 0.03125, %v2348_v55 }
 0x64d   :  { %v5509_v12 = vsel %vm2104_vm6, %v2566_v35, 0.0  ;;  %v3802_v48 = vpop.eup %3801  ;;  %v2535_v41 = vmul.f32 %v5466_v11, %v2499_v4  ;;  %3807 = vrsqrt.f32 %v2439_v45  ;;  %v5522_v36 = vadd.f32 %v5470_v46, %v2533_v51 }
 0x64e   :  { %v2623_v21 = vrot.slane %v5509_v12, 4  ;;  %v2438_v63 = vadd.f32 1e-05, %v2406_v49  ;;  %v5515_v2 = vadd.f32 %v5470_v46, %v2532_v34  ;;  %v2498_v43 = vmul.f32 %v3802_v48, %v5313_v30 }
 0x64f   :  { %v3804_v61 = vpop.eup %3803  ;;  %3809 = vrsqrt.f32 %v2440_v50  ;;  %v2442_v18 = vadd.f32 1e-05, %v2410_v23  ;;  %v2345_v58 = vpop.xlane.xlu0 %2344  ;;  %v2571_v39 = vadd.f32 %v5470_v46, %v2535_v41  ;;  %v5526_v4 = vadd.f32 %v2599_v16, %v2598_v53 }
 0x650   :  { %v2501_v26 = vmul.f32 %v3804_v61, %v5316_v3  ;;  %3811 = vrsqrt.f32 %v2438_v63  ;;  %v2409_v24 = vmul.f32 0.03125, %v2345_v58  ;;  %v2354_v60 = vpop.xlane.xlu1 %2353  ;;  %v2534_v17 = vmul.f32 %v5466_v11, %v2498_v43 }
 0x651   :  { %3813 = vrsqrt.f32 %v2442_v18  ;;  %v2412_v13 = vmul.f32 0.03125, %v2354_v60  ;;  %v2657_v30 = vsel %vm2104_vm6, %v2571_v39, 0.0  ;;  %v5532_v48 = vadd.f32 %v2606_v19, %v5494_v0 }
 0x652   :  { %v3806_v35 = vpop.eup %3805  ;;  %v2537_v5 = vmul.f32 %v5466_v11, %v2501_v26  ;;  %v2441_v29 = vadd.f32 1e-05, %v2409_v24  ;;  %v2658_v45 = vrot.slane %v2657_v30, 4  ;;  %v2570_v3 = vadd.f32 %v5470_v46, %v2534_v17 }
 0x653   :  { %v2500_v50 = vmul.f32 %v3806_v35, %v5325_v9  ;;  %v2444_v49 = vadd.f32 1e-05, %v2412_v13  ;;  %v2351_v55 = vpop.xlane.xlu0 %2350  ;;  %v2613_v24 = vrot.slane %v5506_v54, 1 }
 0x654   :  { %v2573_v34 = vadd.f32 %v5470_v46, %v2537_v5  ;;  %3815 = vrsqrt.f32 %v2441_v29  ;;  %v2411_v51 = vmul.f32 0.03125, %v2351_v55  ;;  %v2363_v23 = vpop.xlane.xlu1 %2362  ;;  %v2659_v41 = vadd.f32 %v2658_v45, %v2657_v30 }
 0x655   :  { %v2650_v63 = vsel %vm2104_vm6, %v2570_v3, 0.0  ;;  %v2536_v53 = vmul.f32 %v5466_v11, %v2500_v50  ;;  %3817 = vrsqrt.f32 %v2444_v49  ;;  %v2415_v43 = vmul.f32 0.03125, %v2363_v23 }
 0x656   :  { %v2651_v16 = vrot.slane %v2650_v63, 4  ;;  %v2671_v61 = vsel %vm2104_vm6, %v2573_v34, 0.0  ;;  %v2443_v9 = vadd.f32 1e-05, %v2411_v51  ;;  %v2660_v18 = vrot.slane %v2659_v41, 2 }
 0x657   :  { %v2672_v58 = vrot.slane %v2671_v61, 4  ;;  %v2572_v39 = vadd.f32 %v5470_v46, %v2536_v53  ;;  %v2357_v26 = vpop.xlane.xlu0 %2356  ;;  %v3808_v0 = vpop.eup %3807  ;;  %v2447_v60 = vadd.f32 1e-05, %v2415_v43 }
 0x658   :  { %v2652_v19 = vadd.f32 %v2651_v16, %v2650_v63  ;;  %3819 = vrsqrt.f32 %v2443_v9  ;;  %v5539_v17 = vmul.f32 0.03125, %v2357_v26  ;;  %v2661_v35 = vadd.f32 %v2660_v18, %v2659_v41 }
 0x659   :  { %v3810_v13 = vpop.eup %3809  ;;  %v2673_v30 = vadd.f32 %v2672_v58, %v2671_v61  ;;  %v2664_v5 = vsel %vm2104_vm6, %v2572_v39, 0.0  ;;  %v2503_v29 = vmul.f32 %v3808_v0, %v5332_v22  ;;  %3821 = vrsqrt.f32 %v2447_v60  ;;  %v2360_v22 = vpop.xlane.xlu1 %2359 }
 0x65a   :  { %v3812_v45 = vpop.eup %3811  ;;  %v2653_v3 = vrot.slane %v2652_v19, 2  ;;  %v2665_v50 = vrot.slane %v2664_v5, 4  ;;  %v2504_v49 = vmul.f32 %v3810_v13, %v5336_v7  ;;  %v2662_v34 = vrot.slane %v2661_v35, 1 }
 0x65b   :  { %v3814_v55 = vpop.eup %3813  ;;  %v2674_v51 = vrot.slane %v2673_v30, 2  ;;  %v2539_v23 = vmul.f32 %v5466_v11, %v2503_v29  ;;  %v2502_v63 = vmul.f32 %v3812_v45, %v5343_v1 }
 0x65c   :  { %v2654_v53 = vadd.f32 %v2653_v3, %v2652_v19  ;;  %v2666_v41 = vadd.f32 %v2665_v50, %v2664_v5  ;;  %v2540_v16 = vmul.f32 %v5466_v11, %v2504_v49  ;;  %v2506_v61 = vmul.f32 %v3814_v55, %v5347_v6 }
 0x65d   :  { %v2663_v9 = vadd.f32 %v2662_v34, %v2661_v35  ;;  %v5548_v43 = vadd.f32 %v2674_v51, %v2673_v30  ;;  %v2575_v7 = vadd.f32 %v5470_v46, %v2539_v23  ;;  %v2538_v18 = vmul.f32 %v5466_v11, %v2502_v63 }
 0x65e   :  { %v3816_v58 = vpop.eup %3815  ;;  %v2655_v39 = vrot.slane %v2654_v53, 1  ;;  %v2667_v26 = vrot.slane %v2666_v41, 2  ;;  %v2576_v0 = vadd.f32 %v5470_v46, %v2540_v16  ;;  %v2542_v1 = vmul.f32 %v5466_v11, %v2506_v61  ;;  %v2366_v61 = vpop.xlane.xlu1 %2365 }
 0x65f   :  { %v3818_v19 = vpop.eup %3817  ;;  %v5554_v60 = vmul.f32 0.125, %v2663_v9  ;;  %v2676_v6 = vrot.slane %v5548_v43, 1  ;;  %v2685_v13 = vsel %vm2104_vm6, %v2575_v7, 0.0  ;;  %v2574_v35 = vadd.f32 %v5470_v46, %v2538_v18 }
 0x660   :  { %v2656_v30 = vadd.f32 %v2655_v39, %v2654_v53  ;;  %v2668_v5 = vadd.f32 %v2667_v26, %v2666_v41  ;;  %v2686_v29 = vrot.slane %v2685_v13, 4  ;;  %v2692_v45 = vsel %vm2104_vm6, %v2576_v0, 0.0  ;;  %v2372_v53 = vpop.xlane.xlu0 %2371 }
 0x661   :  { %v2693_v3 = vrot.slane %v2692_v45, 4  ;;  %v2678_v50 = vsel %vm2104_vm6, %v2574_v35, 0.0  ;;  %v2578_v49 = vadd.f32 %v5470_v46, %v2542_v1  ;;  %v2505_v55 = vmul.f32 %v3816_v58, %v5355_v40 }
 0x662   :  { %v3820_v34 = vpop.eup %3819  ;;  %v5563_v51 = vmul.f32 0.125, %v2656_v30  ;;  %v2669_v23 = vrot.slane %v2668_v5, 1  ;;  %v5565_v63 = vadd.f32 %v2686_v29, %v2685_v13  ;;  %v2679_v16 = vrot.slane %v2678_v50, 4 }
 0x663   :  { %v5567_v41 = vadd.f32 %v2693_v3, %v2692_v45  ;;  %v2706_v9 = vsel %vm2104_vm6, %v2578_v49, 0.0  ;;  %v2541_v7 = vmul.f32 %v5466_v11, %v2505_v55  ;;  %v2508_v18 = vmul.f32 %v3818_v19, %v5359_v38  ;;  %v3822_v39 = vpop.eup %3821 }
 0x664   :  { %v2670_v26 = vadd.f32 %v2669_v23, %v2668_v5  ;;  %v2688_v40 = vrot.slane %v5565_v63, 2  ;;  %v2680_v58 = vadd.f32 %v2679_v16, %v2678_v50  ;;  %v2707_v0 = vrot.slane %v2706_v9, 4 }
 0x665   :  { %v5574_v1 = vadd.f32 %v5470_v46, %v2541_v7  ;;  %v2544_v13 = vmul.f32 %v5466_v11, %v2508_v18  ;;  %v2507_v35 = vmul.f32 %v3820_v34, %v5367_v62  ;;  %v2511_v30 = vmul.f32 %v3822_v39, %v5371_v20  ;;  %v2375_v34 = vpop.xlane.xlu1 %2374  ;;  %v2381_v20 = vpop.xlane.xlu0 %2380 }
 0x666   :  { %v5579_v29 = vmul.f32 0.125, %v2670_v26  ;;  %v2681_v45 = vrot.slane %v2680_v58, 2  ;;  %v2708_v3 = vadd.f32 %v2707_v0, %v2706_v9  ;;  %v2445_v38 = vadd.f32 1e-05, %v5539_v17 }
 0x667   :  { %v2580_v19 = vadd.f32 %v5470_v46, %v2544_v13  ;;  %v2543_v5 = vmul.f32 %v5466_v11, %v2507_v35  ;;  %v2547_v50 = vmul.f32 %v5466_v11, %v2511_v30  ;;  %v2414_v49 = vmul.f32 0.03125, %v2360_v22 }
 0x668   :  { %v5585_v55 = vadd.f32 %v2681_v45, %v2680_v58  ;;  %v2709_v23 = vrot.slane %v2708_v3, 2  ;;  %3823 = vrsqrt.f32 %v2445_v38  ;;  %v2416_v62 = vmul.f32 0.03125, %v2366_v61 }
 0x669   :  { %v2720_v16 = vsel %vm2104_vm6, %v2580_v19, 0.0  ;;  %v2579_v9 = vadd.f32 %v5470_v46, %v2543_v5  ;;  %v5590_v17 = vadd.f32 %v5470_v46, %v2547_v50  ;;  %v2446_v7 = vadd.f32 1e-05, %v2414_v49 }
 0x66a   :  { %v5592_v18 = vadd.f32 %v2709_v23, %v2708_v3  ;;  %v2721_v39 = vrot.slane %v2720_v16, 4  ;;  %v2448_v26 = vadd.f32 1e-05, %v2416_v62  ;;  %v2418_v22 = vmul.f32 0.03125, %v2372_v53 }
 0x66b   :  { %v2713_v58 = vsel %vm2104_vm6, %v2579_v9, 0.0  ;;  %3825 = vrsqrt.f32 %v2446_v7  ;;  %v2419_v0 = vmul.f32 0.03125, %v2375_v34  ;;  %v2421_v61 = vmul.f32 0.03125, %v2381_v20 }
 0x66c   :  { %v2711_v13 = vrot.slane %v5592_v18, 1  ;;  %v2722_v35 = vadd.f32 %v2721_v39, %v2720_v16  ;;  %v2714_v30 = vrot.slane %v2713_v58, 4  ;;  %3827 = vrsqrt.f32 %v2448_v26 }
 0x66d   :  { %v2450_v45 = vadd.f32 1e-05, %v2418_v22  ;;  %v2451_v38 = vadd.f32 1e-05, %v2419_v0  ;;  %v2453_v19 = vadd.f32 1e-05, %v2421_v61  ;;  %v2614_v3 = vadd.f32 %v2613_v24, %v5506_v54 }
 0x66e   :  { %v2723_v53 = vrot.slane %v2722_v35, 2  ;;  %v2715_v5 = vadd.f32 %v2714_v30, %v2713_v58  ;;  %v2619_v50 = vadd.f32 %v2618_v59, %v5496_v31  ;;  %v2624_v49 = vadd.f32 %v2623_v21, %v5509_v12 }
 0x66f   :  { %3829 = vrsqrt.f32 %v2450_v45  ;;  %v2629_v23 = vsel %vm2104_vm6, %v5491_v10, 0.0  ;;  %v2636_v62 = vsel %vm2104_vm6, %v5515_v2, 0.0  ;;  %v2643_v54 = vsel %vm2104_vm6, %v5522_v36, 0.0 }
 0x670   :  { %v5611_v24 = vadd.f32 %v2723_v53, %v2722_v35  ;;  %v2716_v34 = vrot.slane %v2715_v5, 2  ;;  %3831 = vrsqrt.f32 %v2451_v38  ;;  %v2620_v20 = vrot.slane %v2619_v50, 1 }
 0x671   :  { %3833 = vrsqrt.f32 %v2453_v19  ;;  %v2625_v31 = vrot.slane %v2624_v49, 2  ;;  %v2630_v59 = vrot.slane %v2629_v23, 4  ;;  %v2637_v16 = vrot.slane %v2636_v62, 4 }
 0x672   :  { %v3824_v12 = vpop.eup %3823  ;;  %v5613_v21 = vadd.f32 %v2716_v34, %v2715_v5  ;;  %v2621_v9 = vadd.f32 %v2620_v20, %v2619_v50  ;;  %v2644_v10 = vrot.slane %v2643_v54, 4  ;;  %v2818_v7 = vmul.f32 0.125, %v5526_v4  ;;  %v2378_v4 = vpop.xlane.xlu1 %2377 }
 0x673   :  { %v2509_v2 = vmul.f32 %v3824_v12, %v5379_v56  ;;  %v2626_v39 = vadd.f32 %v2625_v31, %v2624_v49  ;;  %v2631_v36 = vadd.f32 %v2630_v59, %v2629_v23  ;;  %v2638_v26 = vadd.f32 %v2637_v16, %v2636_v62 }
 0x674   :  { %v2718_v22 = vrot.slane %v5613_v21, 1  ;;  %v2645_v58 = vadd.f32 %v2644_v10, %v2643_v54  ;;  %v2819_v0 = vmul.f32 0.125, %v5532_v48  ;;  %v2820_v61 = vmul.f32 0.125, %v2614_v3  ;;  %v2387_v54 = vpop.xlane.xlu0 %2386 }
 0x675   :  { %v3826_v35 = vpop.eup %3825  ;;  %v2545_v30 = vmul.f32 %v5466_v11, %v2509_v2  ;;  %v2627_v45 = vrot.slane %v2626_v39, 1  ;;  %v2632_v38 = vrot.slane %v2631_v36, 2  ;;  %v2639_v19 = vrot.slane %v2638_v26, 2 }
 0x676   :  { %v3828_v56 = vpop.eup %3827  ;;  %v2510_v53 = vmul.f32 %v3826_v35, %v5383_v28  ;;  %v2646_v5 = vrot.slane %v2645_v58, 2  ;;  %v2821_v50 = vmul.f32 0.125, %v2621_v9  ;;  %v2891_v49 = vsel %vm2890_vm7, %v2819_v0, %v2818_v7 }
 0x677   :  { %v2581_v48 = vadd.f32 %v5470_v46, %v2545_v30  ;;  %v2512_v3 = vmul.f32 %v3828_v56, %v5392_v27  ;;  %v2628_v23 = vadd.f32 %v2627_v45, %v2626_v39  ;;  %v2633_v62 = vadd.f32 %v2632_v38, %v2631_v36  ;;  %v2369_v30 = vpop.xlane.xlu1 %2368 }
 0x678   :  { %v2546_v34 = vmul.f32 %v5466_v11, %v2510_v53  ;;  %v2640_v20 = vadd.f32 %v2639_v19, %v2638_v26  ;;  %v2647_v31 = vadd.f32 %v2646_v5, %v2645_v58  ;;  %v2893_v59 = vsel %vm2892_vm8, %v2820_v61, %v2891_v49 }
 0x679   :  { %v3830_v28 = vpop.eup %3829  ;;  %v2727_v16 = vsel %vm2104_vm6, %v2581_v48, 0.0  ;;  %v2548_v12 = vmul.f32 %v5466_v11, %v2512_v3  ;;  %v2634_v9 = vrot.slane %v2633_v62, 1  ;;  %v2822_v10 = vmul.f32 0.125, %v2628_v23  ;;  %v2384_v48 = vpop.xlane.xlu0 %2383 }
 0x67a   :  { %v3832_v7 = vpop.eup %3831  ;;  %v2728_v2 = vrot.slane %v2727_v16, 4  ;;  %v2582_v27 = vadd.f32 %v5470_v46, %v2546_v34  ;;  %v2514_v39 = vmul.f32 %v3830_v28, %v5395_v52  ;;  %v2641_v36 = vrot.slane %v2640_v20, 1 }
 0x67b   :  { %v3834_v0 = vpop.eup %3833  ;;  %v5631_v26 = vadd.f32 %v5470_v46, %v2548_v12  ;;  %v2515_v58 = vmul.f32 %v3832_v7, %v5403_v33  ;;  %v2635_v61 = vadd.f32 %v2634_v9, %v2633_v62  ;;  %v2648_v35 = vrot.slane %v2647_v31, 1 }
 0x67c   :  { %v5634_v45 = vadd.f32 %v2728_v2, %v2727_v16  ;;  %v5637_v38 = vsel %vm2104_vm6, %v2582_v27, 0.0  ;;  %v2550_v19 = vmul.f32 %v5466_v11, %v2514_v39  ;;  %v2517_v56 = vmul.f32 %v3834_v0, %v5406_v25 }
 0x67d   :  { %v2735_v52 = vrot.slane %v5637_v38, 4  ;;  %v2551_v53 = vmul.f32 %v5466_v11, %v2515_v58  ;;  %v2642_v5 = vadd.f32 %v2641_v36, %v2640_v20  ;;  %v2649_v49 = vadd.f32 %v2648_v35, %v2647_v31 }
 0x67e   :  { %v2586_v33 = vadd.f32 %v5470_v46, %v2550_v19  ;;  %v2553_v3 = vmul.f32 %v5466_v11, %v2517_v56  ;;  %v2823_v23 = vmul.f32 0.125, %v2635_v61  ;;  %v2895_v62 = vsel %vm2894_vm9, %v2821_v50, %v2893_v59  ;;  %v2393_v50 = vpop.xlane.xlu1 %2392 }
 0x67f   :  { %v2587_v34 = vadd.f32 %v5470_v46, %v2551_v53  ;;  %v2824_v28 = vmul.f32 0.125, %v2642_v5  ;;  %v2825_v16 = vmul.f32 0.125, %v2649_v49  ;;  %v2897_v25 = vsel %vm2896_vm10, %v2822_v10, %v2895_v62 }
 0x680   :  { %v2762_v12 = vsel %vm2104_vm6, %v2586_v33, 0.0  ;;  %v2589_v9 = vadd.f32 %v5470_v46, %v2553_v3  ;;  %v2899_v20 = vsel %vm2898_vm11, %v2823_v23, %v2897_v25  ;;  %v2420_v31 = vmul.f32 0.03125, %v2378_v4  ;;  %v2390_v4 = vpop.xlane.xlu0 %2389 }
 0x681   :  { %v2763_v7 = vrot.slane %v2762_v12, 4  ;;  %v2769_v2 = vsel %vm2104_vm6, %v2587_v34, 0.0  ;;  %v2901_v27 = vsel %vm2900_vm12, %v2824_v28, %v2899_v20  ;;  %v2423_v39 = vmul.f32 0.03125, %v2387_v54 }
 0x682   :  { %v2770_v59 = vrot.slane %v2769_v2, 4  ;;  %v2783_v36 = vsel %vm2104_vm6, %v2589_v9, 0.0  ;;  %v2903_v0 = vsel %vm2902_vm13, %v2825_v16, %v2901_v27  ;;  %v2452_v10 = vadd.f32 1e-05, %v2420_v31 }
 0x683   :  { %v2764_v58 = vadd.f32 %v2763_v7, %v2762_v12  ;;  %v2784_v61 = vrot.slane %v2783_v36, 4  ;;  %3603 = vmatprep.mubr.msk.f32.mxu0 %vm2104_vm6, %v2903_v0  ;;  %v2455_v35 = vadd.f32 1e-05, %v2423_v39  ;;  %v2417_v19 = vmul.f32 0.03125, %v2369_v30 }
 0x684   :  { %v2771_v56 = vadd.f32 %v2770_v59, %v2769_v2  ;;  %3835 = vrsqrt.f32 %v2452_v10  ;;  %v2422_v53 = vmul.f32 0.03125, %v2384_v48  ;;  %v2425_v5 = vmul.f32 0.03125, %v2393_v50 }
 0x685   :  { %v2765_v49 = vrot.slane %v2764_v58, 2  ;;  %v5656_v54 = vadd.f32 %v2784_v61, %v2783_v36  ;;  %3837 = vrsqrt.f32 %v2455_v35  ;;  %v2449_v33 = vadd.f32 1e-05, %v2417_v19 }
 0x686   :  { %v2772_v3 = vrot.slane %v2771_v56, 2  ;;  %v2454_v23 = vadd.f32 1e-05, %v2422_v53  ;;  %v2457_v62 = vadd.f32 1e-05, %v2425_v5  ;;  %v2424_v34 = vmul.f32 0.03125, %v2390_v4 }
 0x687   :  { %v5658_v28 = vadd.f32 %v2765_v49, %v2764_v58  ;;  %3839 = vrsqrt.f32 %v2449_v33  ;;  %v2677_v30 = vadd.f32 %v2676_v6, %v5548_v43  ;;  %v2683_v16 = vrot.slane %v5585_v55, 1 }
 0x688   :  { %v5664_v48 = vadd.f32 %v2772_v3, %v2771_v56  ;;  %3841 = vrsqrt.f32 %v2454_v23  ;;  %v2456_v25 = vadd.f32 1e-05, %v2424_v34  ;;  %v2689_v12 = vadd.f32 %v2688_v40, %v5565_v63 }
 0x689   :  { %v2767_v9 = vrot.slane %v5658_v28, 1  ;;  %3843 = vrsqrt.f32 %v2457_v62  ;;  %v2684_v20 = vadd.f32 %v2683_v16, %v5585_v55  ;;  %v2695_v31 = vrot.slane %v5567_v41, 2 }
 0x68a   :  { %v2774_v7 = vrot.slane %v5664_v48, 1  ;;  %3845 = vrsqrt.f32 %v2456_v25  ;;  %v2690_v43 = vrot.slane %v2689_v12, 1  ;;  %v2699_v6 = vsel %vm2104_vm6, %v5574_v1, 0.0 }
 0x68b   :  { %v2696_v2 = vadd.f32 %v2695_v31, %v5567_v41  ;;  %v2700_v27 = vrot.slane %v2699_v6, 4  ;;  %v2829_v39 = vmul.f32 0.125, %v2677_v30  ;;  %v2830_v50 = vmul.f32 0.125, %v2684_v20 }
 0x68c   :  { %v2691_v63 = vadd.f32 %v2690_v43, %v2689_v12  ;;  %v2904_v40 = vsel %vm2890_vm7, %v5554_v60, %v5563_v51  ;;  %v5682_v55 = vadd.f32 %v2711_v13, %v5592_v18  ;;  %v5687_v59 = vadd.f32 %v2718_v22, %v5613_v21 }
 0x68d   :  { %v2697_v1 = vrot.slane %v2696_v2, 1  ;;  %v2701_v41 = vadd.f32 %v2700_v27, %v2699_v6  ;;  %v2905_v36 = vsel %vm2892_vm8, %v5579_v29, %v2904_v40  ;;  %v2725_v0 = vrot.slane %v5611_v24, 1 }
 0x68e   :  { %v3836_v10 = vpop.eup %3835  ;;  %v2831_v58 = vmul.f32 0.125, %v2691_v63  ;;  %v2906_v60 = vsel %vm2894_vm9, %v2829_v39, %v2905_v36  ;;  %v2730_v51 = vrot.slane %v5634_v45, 2  ;;  %v2736_v18 = vadd.f32 %v2735_v52, %v5637_v38 }
 0x68f   :  { %v3838_v13 = vpop.eup %3837  ;;  %v2516_v21 = vmul.f32 %v3836_v10, %v5415_v15  ;;  %v2698_v22 = vadd.f32 %v2697_v1, %v2696_v2  ;;  %v2702_v61 = vrot.slane %v2701_v41, 2  ;;  %v2907_v35 = vsel %vm2896_vm10, %v2830_v50, %v2906_v60 }
 0x690   :  { %v2519_v29 = vmul.f32 %v3838_v13, %v5418_v8  ;;  %v2908_v19 = vsel %vm2898_vm11, %v2831_v58, %v2907_v35  ;;  %v2726_v4 = vadd.f32 %v2725_v0, %v5611_v24  ;;  %v2731_v56 = vadd.f32 %v2730_v51, %v5634_v45 }
 0x691   :  { %v3840_v53 = vpop.eup %3839  ;;  %v2552_v5 = vmul.f32 %v5466_v11, %v2516_v21  ;;  %v2703_v49 = vadd.f32 %v2702_v61, %v2701_v41  ;;  %v2832_v38 = vmul.f32 0.125, %v2698_v22  ;;  %v2737_v52 = vrot.slane %v2736_v18, 2 }
 0x692   :  { %v3842_v33 = vpop.eup %3841  ;;  %v2555_v15 = vmul.f32 %v5466_v11, %v2519_v29  ;;  %v2513_v3 = vmul.f32 %v3840_v53, %v5427_v44  ;;  %v2732_v23 = vrot.slane %v2731_v56, 1  ;;  %v2741_v8 = vsel %vm2104_vm6, %v5590_v17, 0.0 }
 0x693   :  { %v3844_v62 = vpop.eup %3843  ;;  %v2588_v24 = vadd.f32 %v5470_v46, %v2552_v5  ;;  %v2518_v45 = vmul.f32 %v3842_v33, %v5430_v42  ;;  %v2704_v34 = vrot.slane %v2703_v49, 1  ;;  %v2909_v30 = vsel %vm2900_vm12, %v2832_v38, %v2908_v19 }
 0x694   :  { %v3846_v16 = vpop.eup %3845  ;;  %v2591_v25 = vadd.f32 %v5470_v46, %v2555_v15  ;;  %v2549_v12 = vmul.f32 %v5466_v11, %v2513_v3  ;;  %v2521_v20 = vmul.f32 %v3844_v62, %v5439_v47  ;;  %v2733_v44 = vadd.f32 %v2732_v23, %v2731_v56 }
 0x695   :  { %v2776_v31 = vsel %vm2104_vm6, %v2588_v24, 0.0  ;;  %v2554_v17 = vmul.f32 %v5466_v11, %v2518_v45  ;;  %v2520_v43 = vmul.f32 %v3846_v16, %v5442_v57  ;;  %v2705_v6 = vadd.f32 %v2704_v34, %v2703_v49 }
 0x696   :  { %v2777_v2 = vrot.slane %v2776_v31, 4  ;;  %v2557_v42 = vmul.f32 %v5466_v11, %v2521_v20  ;;  %v2585_v27 = vadd.f32 %v5470_v46, %v2549_v12  ;;  %v2738_v39 = vadd.f32 %v2737_v52, %v2736_v18 }
 0x697   :  { %v2590_v50 = vadd.f32 %v5470_v46, %v2554_v17  ;;  %v2556_v63 = vmul.f32 %v5466_v11, %v2520_v43  ;;  %v2833_v40 = vmul.f32 0.125, %v2705_v6  ;;  %v2742_v47 = vrot.slane %v2741_v8, 4 }
 0x698   :  { %v2778_v1 = vadd.f32 %v2777_v2, %v2776_v31  ;;  %v2739_v41 = vrot.slane %v2738_v39, 1  ;;  %v2748_v36 = vsel %vm2104_vm6, %v5631_v26, 0.0  ;;  %v2755_v57 = vsel %vm2104_vm6, %v2585_v27, 0.0 }
 0x699   :  { %v2790_v0 = vsel %vm2104_vm6, %v2590_v50, 0.0  ;;  %v2592_v10 = vadd.f32 %v5470_v46, %v2556_v63  ;;  %v2910_v58 = vsel %vm2902_vm13, %v2833_v40, %v2909_v30  ;;  %v2743_v60 = vadd.f32 %v2742_v47, %v2741_v8 }
 0x69a   :  { %v2779_v51 = vrot.slane %v2778_v1, 2  ;;  %v2791_v18 = vrot.slane %v2790_v0, 4  ;;  %3604 = vmatmul.mubr.msk.f32.vlgmr.msra.gmra.mrb[42].mxu0 %vm2104_vm6, %v2910_v58  ;;  %v2740_v11 = vadd.f32 %v2739_v41, %v2738_v39  ;;  %v2749_v13 = vrot.slane %v2748_v36, 4 }
 0x69b   :  { %v2744_v21 = vrot.slane %v2743_v60, 2  ;;  %v2756_v22 = vrot.slane %v2755_v57, 4  ;;  %v2834_v61 = vmul.f32 0.125, %v5682_v55  ;;  %v2835_v26 = vmul.f32 0.125, %v5687_v59 }
 0x69c   :  { %v2780_v35 = vadd.f32 %v2779_v51, %v2778_v1  ;;  %v2750_v29 = vadd.f32 %v2749_v13, %v2748_v36  ;;  %v2836_v19 = vmul.f32 0.125, %v2726_v4  ;;  %v2837_v56 = vmul.f32 0.125, %v2733_v44 }
 0x69d   :  { %v2745_v53 = vadd.f32 %v2744_v21, %v2743_v60  ;;  %v2757_v5 = vadd.f32 %v2756_v22, %v2755_v57  ;;  %v2838_v49 = vmul.f32 0.125, %v2740_v11  ;;  %v2911_v38 = vsel %vm2890_vm7, %v2835_v26, %v2834_v61 }
 0x69e   :  { %v2751_v52 = vrot.slane %v2750_v29, 2  ;;  %v2912_v33 = vsel %vm2892_vm8, %v2836_v19, %v2911_v38  ;;  %v2593_v15 = vadd.f32 %v5470_v46, %v2557_v42  ;;  %v2768_v55 = vadd.f32 %v2767_v9, %v5658_v28 }
 0x69f   :  { %v2746_v3 = vrot.slane %v2745_v53, 1  ;;  %v2758_v59 = vrot.slane %v2757_v5, 2  ;;  %v2913_v23 = vsel %vm2894_vm9, %v2837_v56, %v2912_v33  ;;  %v2775_v4 = vadd.f32 %v2774_v7, %v5664_v48 }
 0x6a0   :  { %v2752_v8 = vadd.f32 %v2751_v52, %v2750_v29  ;;  %v2914_v62 = vsel %vm2896_vm10, %v2838_v49, %v2913_v23  ;;  %v2781_v24 = vrot.slane %v2780_v35, 1  ;;  %v2786_v45 = vrot.slane %v5656_v54, 2 }
 0x6a1   :  { %v2747_v34 = vadd.f32 %v2746_v3, %v2745_v53  ;;  %v2759_v46 = vadd.f32 %v2758_v59, %v2757_v5  ;;  %v2792_v30 = vadd.f32 %v2791_v18, %v2790_v0  ;;  %v2797_v16 = vsel %vm2104_vm6, %v2591_v25, 0.0 }
 0x6a2   :  { %v2753_v28 = vrot.slane %v2752_v8, 1  ;;  %v2782_v9 = vadd.f32 %v2781_v24, %v2780_v35  ;;  %v2787_v12 = vadd.f32 %v2786_v45, %v5656_v54  ;;  %v2798_v20 = vrot.slane %v2797_v16, 4 }
 0x6a3   :  { %v2760_v44 = vrot.slane %v2759_v46, 1  ;;  %v2839_v31 = vmul.f32 0.125, %v2747_v34  ;;  %v2793_v17 = vrot.slane %v2792_v30, 2  ;;  %v2804_v48 = vsel %vm2104_vm6, %v2592_v10, 0.0 }
 0x6a4   :  { %v2754_v7 = vadd.f32 %v2753_v28, %v2752_v8  ;;  %v2788_v43 = vrot.slane %v2787_v12, 1  ;;  %v2799_v6 = vadd.f32 %v2798_v20, %v2797_v16  ;;  %v2805_v2 = vrot.slane %v2804_v48, 4  ;;  %v5761_v8 = vld [vmem:[%s5820_s8] sm:$0x7] }
 0x6a5   :  { %v2761_v42 = vadd.f32 %v2760_v44, %v2759_v46  ;;  %v2915_v27 = vsel %vm2898_vm11, %v2839_v31, %v2914_v62  ;;  %v2794_v39 = vadd.f32 %v2793_v17, %v2792_v30  ;;  %v2811_v25 = vsel %vm2104_vm6, %v2593_v15, 0.0 }
 0x6a6   :  { %v2840_v50 = vmul.f32 0.125, %v2754_v7  ;;  %v2789_v63 = vadd.f32 %v2788_v43, %v2787_v12  ;;  %v2800_v40 = vrot.slane %v2799_v6, 2  ;;  %v2806_v54 = vadd.f32 %v2805_v2, %v2804_v48 }
 0x6a7   :  { %v2841_v47 = vmul.f32 0.125, %v2761_v42  ;;  %v2795_v1 = vrot.slane %v2794_v39, 1  ;;  %v2812_v41 = vrot.slane %v2811_v25, 4  ;;  %v2842_v36 = vmul.f32 0.125, %v2768_v55 }
 0x6a8   :  { %v2916_v57 = vsel %vm2900_vm12, %v2840_v50, %v2915_v27  ;;  %v2801_v0 = vadd.f32 %v2800_v40, %v2799_v6  ;;  %v2807_v10 = vrot.slane %v2806_v54, 2  ;;  %v2843_v58 = vmul.f32 0.125, %v2775_v4 }
 0x6a9   :  { %v2917_v60 = vsel %vm2902_vm13, %v2841_v47, %v2916_v57  ;;  %v2796_v51 = vadd.f32 %v2795_v1, %v2794_v39  ;;  %v2813_v18 = vadd.f32 %v2812_v41, %v2811_v25  ;;  %v2844_v11 = vmul.f32 0.125, %v2782_v9 }
 0x6aa   :  { %3606 = vmatprep.mubr.msk.f32.mxu0 %vm2104_vm6, %v2917_v60  ;;  %v2802_v13 = vrot.slane %v2801_v0, 1  ;;  %v2808_v21 = vadd.f32 %v2807_v10, %v2806_v54  ;;  %v2918_v22 = vsel %vm2890_vm7, %v2843_v58, %v2842_v36  ;;  %v2845_v26 = vmul.f32 0.125, %v2789_v63  ;;  %v3091_v10 = vld [vmem:[%s5821_s9 + $0x8] sm:$0xff]  ;;  %v3092_v58 = vld [vmem:[%s5821_s9 + $0x10] sm:$0xff] }
 0x6ab   :  { %v2814_v61 = vrot.slane %v2813_v18, 2  ;;  %v2846_v35 = vmul.f32 0.125, %v2796_v51  ;;  %v2919_v29 = vsel %vm2892_vm8, %v2844_v11, %v2918_v22  ;;  %v2857_v62 = vrot.slane %v5761_v8, %v4080_v37  ;;  %v3093_v51 = vld [vmem:[%s5821_s9 + $0x18] sm:$0xff] }
 0x6ac   :  { %v2803_v19 = vadd.f32 %v2802_v13, %v2801_v0  ;;  %v2809_v56 = vrot.slane %v2808_v21, 1  ;;  %v2920_v5 = vsel %vm2894_vm9, %v2845_v26, %v2919_v29  ;;  %v3090_v0 = vld [vmem:[%s5821_s9] sm:$0xff] }
 0x6ad   :  { %v2815_v53 = vadd.f32 %v2814_v61, %v2813_v18  ;;  %v2921_v38 = vsel %vm2896_vm10, %v2846_v35, %v2920_v5  ;;  %v3641_v60 = vpack.c.bf16 %v3091_v10, %v3090_v0  ;;  %v3645_v18 = vpack.c.bf16 %v3093_v51, %v3092_v58 }
 0x6ae   :  { %v2810_v49 = vadd.f32 %v2809_v56, %v2808_v21  ;;  %v2847_v33 = vmul.f32 0.125, %v2803_v19  ;;  %v3073_v35 = vrot.slane %v5761_v8, %v4447_v32  ;;  %v3081_v56 = vrot.slane %v5761_v8, %v4450_v14 }
 0x6af   :  { %v2816_v52 = vrot.slane %v2815_v53, 1  ;;  %3642 = vmatprep.subr.bf16.mxu0 %v3641_v60 }
 0x6b0   :  { %v2848_v15 = vmul.f32 0.125, %v2810_v49  ;;  %v2922_v3 = vsel %vm2898_vm11, %v2847_v33, %v2921_v38  ;;  %3644 = vmatpush3.bf16.msra.mxu0 %v3641_v60 }
 0x6b1   :  { %v2817_v55 = vadd.f32 %v2816_v52, %v2815_v53  ;;  %3646 = vmatprep.subr.bf16.mxu0 %v3645_v18 }
 0x6b2   :  { %v2923_v59 = vsel %vm2900_vm12, %v2848_v15, %v2922_v3 }
 0x6b3   :  { %v2849_v23 = vmul.f32 0.125, %v2817_v55 }
 0x6b4   :  { %3648 = vmatpush3.bf16.msra.mxu0 %v3645_v18 }
 0x6b5   :  { %v2924_v4 = vsel %vm2902_vm13, %v2849_v23, %v2923_v59 }
 0x6b6   :  { %3607 = vmatmul.mubr.msk.f32.gmra.mrb[44].mxu0 %vm2104_vm6, %v2924_v4 }
 0x76d   :  { %v3605_v24 = vpop.f32.mrb[42].mxu0 }
 0x76e   :  { %v3005_v45 = vadd.f32 %v3605_v24, %v2857_v62  ;;  %v2999_v34 = vpop.f32.mrb[43].mxu0 }
 0x76f   :  { %v3000_v46 = vadd.f32 %v2999_v34, %v2857_v62 }
 0x770   :  { %v3021_v30 = vsel %vm2104_vm6, %v3005_v45, 0.0 }
 0x771   :  { %3022 = vadd.xlane.f32.xlu1 %v3021_v30  ;;  %v3018_v16 = vsel %vm2104_vm6, %v3000_v46, 0.0 }
 0x772   :  { %3019 = vadd.xlane.f32.xlu0 %v3018_v16 }
 0x789   :  { %v3608_v28 = vpop.f32.mrb[44].mxu0 }
 0x78a   :  { %v3015_v9 = vadd.f32 %v3608_v28, %v2857_v62  ;;  %v3009_v12 = vpop.f32.mrb[45].mxu0 }
 0x78b   :  { %v3010_v20 = vadd.f32 %v3009_v12, %v2857_v62  ;;  %v3319_v12 = vld [vmem:[%s5822_s10] ss:$0 sm:$0xff]  ;;  %s3855_s10 = scalar_lea.vmem %s3208_s3, 512 }
 0x78c   :  { %v3027_v44 = vsel %vm2104_vm6, %v3015_v9, 0.0  ;;  %p3856_p0 = scmp.ne.s32.totalorder %s3208_s3, %s3855_s10  ;;  %p3861_p2 = scmp.lt.s32.totalorder %s3855_s10, %s3855_s10 }
 0x78d   :  { %3028 = vadd.xlane.f32.xlu1 %v3027_v44  ;;  %v3024_v31 = vsel %vm2104_vm6, %v3010_v20, 0.0 }
 0x78e   :  { %3025 = vadd.xlane.f32.xlu0 %v3024_v31  ;;  %p3862_p3 = por %p3861_p2, %p3860_p1 }
 0x790   :  { %p3863_p4 = pnand %p3862_p3, %p3856_p0 }
 0x7fe   :  { %v3023_v37 = vpop.xlane.xlu1 %3022 }
 0x7ff   :  { %v3031_v17 = vmul.f32 0.03125, %v3023_v37  ;;  %v3020_v48 = vpop.xlane.xlu0 %3019 }
 0x800   :  { %v3030_v7 = vmul.f32 0.03125, %v3020_v48 }
 0x801   :  { %v3035_v43 = vsub.f32 %v3005_v45, %v3031_v17 }
 0x802   :  { %v3034_v6 = vsub.f32 %v3000_v46, %v3030_v7 }
 0x803   :  { %v3039_v2 = vmul.f32 %v3035_v43, %v3035_v43 }
 0x804   :  { %v3038_v42 = vmul.f32 %v3034_v6, %v3034_v6 }
 0x805   :  { %v3045_v27 = vsel %vm2104_vm6, %v3039_v2, 0.0 }
 0x806   :  { %3046 = vadd.xlane.f32.xlu1 %v3045_v27  ;;  %v3042_v39 = vsel %vm2104_vm6, %v3038_v42, 0.0 }
 0x807   :  { %3043 = vadd.xlane.f32.xlu0 %v3042_v39 }
 0x81a   :  { %v3029_v25 = vpop.xlane.xlu1 %3028 }
 0x81b   :  { %v3033_v50 = vmul.f32 0.03125, %v3029_v25  ;;  %v3026_v63 = vpop.xlane.xlu0 %3025 }
 0x81c   :  { %v3032_v40 = vmul.f32 0.03125, %v3026_v63 }
 0x81d   :  { %v3037_v54 = vsub.f32 %v3015_v9, %v3033_v50 }
 0x81e   :  { %v3036_v47 = vsub.f32 %v3010_v20, %v3032_v40 }
 0x81f   :  { %v3041_v1 = vmul.f32 %v3037_v54, %v3037_v54 }
 0x820   :  { %v3040_v41 = vmul.f32 %v3036_v47, %v3036_v47 }
 0x821   :  { %v3051_v36 = vsel %vm2104_vm6, %v3041_v1, 0.0 }
 0x822   :  { %3052 = vadd.xlane.f32.xlu1 %v3051_v36  ;;  %v3048_v57 = vsel %vm2104_vm6, %v3040_v41, 0.0 }
 0x823   :  { %3049 = vadd.xlane.f32.xlu0 %v3048_v57 }
 0x893   :  { %v3047_v11 = vpop.xlane.xlu1 %3046 }
 0x894   :  { %v3055_v13 = vmul.f32 0.03125, %v3047_v11  ;;  %v3044_v21 = vpop.xlane.xlu0 %3043 }
 0x895   :  { %v3054_v22 = vmul.f32 0.03125, %v3044_v21 }
 0x896   :  { %v3059_v61 = vadd.f32 1e-05, %v3055_v13 }
 0x897   :  { %v3058_v26 = vadd.f32 1e-05, %v3054_v22 }
 0x898   :  { %3847 = vrsqrt.f32 %v3059_v61 }
 0x899   :  { %3849 = vrsqrt.f32 %v3058_v26 }
 0x8a2   :  { %v3848_v29 = vpop.eup %3847 }
 0x8a3   :  { %v3850_v19 = vpop.eup %3849  ;;  %v3067_v53 = vmul.f32 %v3848_v29, %v3035_v43 }
 0x8a4   :  { %v3066_v5 = vmul.f32 %v3850_v19, %v3034_v6 }
 0x8a5   :  { %v3075_v49 = vmul.f32 %v3073_v35, %v3067_v53 }
 0x8a6   :  { %v3074_v38 = vmul.f32 %v3073_v35, %v3066_v5 }
 0x8a7   :  { %v3083_v52 = vadd.f32 %v3081_v56, %v3075_v49 }
 0x8a8   :  { %v3082_v33 = vadd.f32 %v3081_v56, %v3074_v38 }
 0x8a9   :  { %v3087_v55 = vmax.f32 %v3083_v52, 0.0 }
 0x8aa   :  { %v3086_v15 = vmax.f32 %v3082_v33, 0.0 }
 0x8ac   :  { %3617 = vmatprep.mubr.msk.f32.mxu0 %vm2104_vm6, %v3086_v15 }
 0x8ad   :  { %3618 = vmatmul.mubr.msk.f32.vlgmr.msra.gmra.mrb[46].mxu0 %vm2104_vm6, %v3087_v55 }
 0x8af   :  { %v3053_v3 = vpop.xlane.xlu1 %3052 }
 0x8b0   :  { %v3057_v59 = vmul.f32 0.03125, %v3053_v3  ;;  %v3050_v32 = vpop.xlane.xlu0 %3049 }
 0x8b1   :  { %v3056_v23 = vmul.f32 0.03125, %v3050_v32 }
 0x8b2   :  { %v3061_v4 = vadd.f32 1e-05, %v3057_v59 }
 0x8b3   :  { %v3060_v62 = vadd.f32 1e-05, %v3056_v23 }
 0x8b4   :  { %3851 = vrsqrt.f32 %v3061_v4 }
 0x8b5   :  { %3853 = vrsqrt.f32 %v3060_v62 }
 0x8be   :  { %v3852_v14 = vpop.eup %3851 }
 0x8bf   :  { %v3854_v8 = vpop.eup %3853  ;;  %v3069_v24 = vmul.f32 %v3852_v14, %v3037_v54 }
 0x8c0   :  { %v3068_v45 = vmul.f32 %v3854_v8, %v3036_v47 }
 0x8c1   :  { %v3077_v34 = vmul.f32 %v3073_v35, %v3069_v24 }
 0x8c2   :  { %v3076_v46 = vmul.f32 %v3073_v35, %v3068_v45 }
 0x8c3   :  { %v3085_v30 = vadd.f32 %v3081_v56, %v3077_v34 }
 0x8c4   :  { %v3084_v16 = vadd.f32 %v3081_v56, %v3076_v46 }
 0x8c5   :  { %v3089_v9 = vmax.f32 %v3085_v30, 0.0 }
 0x8c6   :  { %v3088_v28 = vmax.f32 %v3084_v16, 0.0 }
 0x8c8   :  { %3620 = vmatprep.mubr.msk.f32.mxu0 %vm2104_vm6, %v3088_v28 }
 0x8c9   :  { %3621 = vmatmul.mubr.msk.f32.gmra.mrb[48].mxu0 %vm2104_vm6, %v3089_v9 }
 0x980   :  { %v3619_v20 = vpop.f32.mrb[46].mxu0 }
 0x981   :  { %v3185_v44 = vadd.f32 %v3619_v20, %v3319_v12  ;;  %v3179_v31 = vpop.f32.mrb[47].mxu0 }
 0x982   :  { %v3180_v37 = vadd.f32 %v3319_v12, %v3179_v31 }
 0x983   :  { %3199 = vst.msk [vmem:[#allocation2 + $0x8] sm:$0xff] %vm2104_vm6, %v3185_v44 }
 0x984   :  { %3198 = vst.msk [vmem:[#allocation2] sm:$0xff] %vm2104_vm6, %v3180_v37 }
 0x99c   :  { %v3622_v17 = vpop.f32.mrb[48].mxu0 }
 0x99d   :  { %v3195_v48 = vadd.f32 %v3622_v17, %v3319_v12  ;;  %v3189_v7 = vpop.f32.mrb[49].mxu0 }
 0x99e   :  { %v3190_v43 = vadd.f32 %v3319_v12, %v3189_v7 }
 0x99f   :  { %3201 = vst.msk [vmem:[#allocation2 + $0x18] sm:$0xff] %vm2104_vm6, %v3195_v48 }
 0x9a0   :  { %3200 = vst.msk [vmem:[#allocation2 + $0x10] sm:$0xff] %vm2104_vm6, %v3190_v43 }
 0x9a1   :  { %3866 = shalt.err (!%p3863_p4)
}
 0x9a2   :  { %s3867_s27 = scalar_lea.hbm %s5823_s11, 512 }
 0x9a3   :  { %p3868_p5 = scmp.ne.s32.totalorder %s5823_s11, %s3867_s27  ;;  %p3871_p6 = scmp.lt.u32.totalorder %s3867_s27, %s5823_s11 }
 0x9a5   :  { %p3873_p7 = pnand %p3871_p6, %p3868_p5 }
 0x9a7   :  { %3876 = shalt.err (!%p3873_p7)
}
 0x9a8   :  { %s3881_s6 = smov 128   ;;  %s3882_s12 = smov 8  }
 0x9a9   :  { %3213 = dma.vmem_to_hbm [thread:$0]  %s3208_s3, 512, %s5823_s11, [#allocation3], %s3881_s6, %s3881_s6, %s3882_s12  }
 0x9aa   :  { %3877 = dma.done.wait [#allocation3], 512  }
 0x9ab   :  { %3878 = vsyncadd [#allocation3], 4294966784 }
 0x9ac   :  { %3217 = vsyncpa [#allocation3], 1 }

</bundles_post_ra>
